<compile_context>
chip_gen: v6e
topology: v6e:2x2x1
jax: 0.10.0
libtpu: 0.0.40
codegen_flags: <defaults>
</compile_context>

<pallas_src>
import math
from functools import partial

import jax
import jax.numpy as jnp
from jax.experimental import pallas as pl
from jax.experimental.pallas import tpu as pltpu

_BN_EPS = 1e-5
_BN_SCALE = 1.0 / math.sqrt(1.0 + _BN_EPS)

_CP = 128          # padded channel width / gate-block width (lanes)
_T = 4             # LSTM seq length for L=64 (64 ->conv 32 ->pool 16 ->conv 8 ->pool 4)
_NSUP = 5          # super-rows: (64 + 1 left-pad) positions padded to 80 = 5 * 16
_BATCH_TILE = 64   # samples per grid program (bounds VMEM, enables megacore)


# ------------------------------ fused kernel --------------------------------

def _fused_forward_kernel(xg_ref, glob_ref,
                          w1_ref, b1_ref, w2_ref, b2_ref,
                          wih_ref, whh_ref, bl_ref,
                          wd1h_ref, wd1g_ref, bd1_ref,
                          wd2_ref, bd2_ref, w3_ref, b3_ref,
                          out_ref):
    """Whole forward pass for one batch tile (default config: L=64, k=3, s=2, pool=2).

    xg_ref  : (5*BT, 16*128) local features, channel-last, 128-padded channels;
              row = super_row*BT + sample, 16 consecutive positions on lanes.
    glob_ref: (BT, 128) zero-padded global features.
    Weights pre-packed / 128-padded / BN-folded by `pack_params`.
    """
    f32 = jnp.float32
    Bp = glob_ref.shape[0]            # batch-tile size
    R4 = 4 * Bp

    b1 = b1_ref[...]
    b2 = b2_ref[...]

    # -------- conv1(s=2,p=1,k=3) + ReLU + MaxPool(2), batched over sublanes ----
    # P[r] row (q, b) = pooled1[4q + r] of sample b.
    P = []
    for r in range(4):
        lo = 4 * r * _CP
        ma = jnp.dot(xg_ref[0:R4, lo:lo + 3 * _CP], w1_ref[...],
                     preferred_element_type=f32)
        if r < 3:
            mb = jnp.dot(xg_ref[0:R4, lo + 2 * _CP:lo + 5 * _CP], w1_ref[...],
                         preferred_element_type=f32)
        else:
            # odd conv position crosses into the next super-row (3rd tap).
            mb = (jnp.dot(xg_ref[0:R4, lo + 2 * _CP:lo + 4 * _CP],
                          w1_ref[0:2 * _CP, :], preferred_element_type=f32)
                  + jnp.dot(xg_ref[Bp:5 * Bp, 0:_CP], w1_ref[2 * _CP:3 * _CP, :],
                            preferred_element_type=f32))
        P.append(jnp.maximum(jnp.maximum(ma, mb) + b1, 0.0))   # relu(max) = pool
    P0, P1, P2, P3 = P
    # pooled1[4p-1] (zero row = conv2 left padding for p == 0): shift down by Bp.
    P3s = jnp.concatenate([jnp.zeros((Bp, _CP), f32), P3[0:3 * Bp, :]], axis=0)

    # -------- conv2 + ReLU + MaxPool(2) -> time-major LSTM input ---------------
    v0 = w2_ref[0 * _CP:1 * _CP, :]
    v1 = w2_ref[1 * _CP:2 * _CP, :]
    v2 = w2_ref[2 * _CP:3 * _CP, :]
    ca = (jnp.dot(P3s, v0, preferred_element_type=f32)
          + jnp.dot(P0, v1, preferred_element_type=f32)
          + jnp.dot(P1, v2, preferred_element_type=f32))
    cb = (jnp.dot(P1, v0, preferred_element_type=f32)
          + jnp.dot(P2, v1, preferred_element_type=f32)
          + jnp.dot(P3, v2, preferred_element_type=f32))
    x_lstm = jnp.maximum(jnp.maximum(ca, cb) + b2, 0.0)     # (T*Bp, 128), row=(t,b)

    # -------- BiLSTM ------------------------------------------------------------
    # Hoisted input projection for both directions / all steps.  Gate blocks
    # [i | f | o | g] of 128 lanes; fwd dir on lanes [0:64), bwd on [64:128) of
    # each block.  Fwd/bwd merge is hoisted out of the recurrence.
    gx = jnp.dot(x_lstm, wih_ref[...], preferred_element_type=f32) + bl_ref[...]
    lane = jax.lax.broadcasted_iota(jnp.int32, (Bp, 4 * _CP), 1)
    fwd_mask = (lane & 64) == 0
    merged = []
    for t in range(_T):
        tr = _T - 1 - t
        merged.append(jnp.where(fwd_mask,
                                gx[t * Bp:(t + 1) * Bp, :],
                                gx[tr * Bp:(tr + 1) * Bp, :]))

    hcat = jnp.zeros((Bp, _CP), f32)      # [h_fwd | h_bwd] packed into 128 lanes
    ccat = jnp.zeros((Bp, _CP), f32)
    for t in range(_T):                   # static -> unrolled; matmul + gates only
        g = merged[t] + jnp.dot(hcat, whh_ref[...], preferred_element_type=f32)
        sig = jax.nn.sigmoid(g[:, 0:3 * _CP])      # i, f, o gates
        i_g = sig[:, 0 * _CP:1 * _CP]
        f_g = sig[:, 1 * _CP:2 * _CP]
        o_g = sig[:, 2 * _CP:3 * _CP]
        g_g = jnp.tanh(g[:, 3 * _CP:4 * _CP])      # cell gate
        ccat = f_g * ccat + i_g * g_g
        hcat = o_g * jnp.tanh(ccat)
    # hcat now holds [h_n_fwd | h_n_bwd] = torch.cat((h[-2], h[-1]), dim=1).

    # -------- fused MLP head (no lane concat; bn_dense folded into wd1*) -------
    d1 = jnp.maximum(
        jnp.dot(hcat, wd1h_ref[...], preferred_element_type=f32)
        + jnp.dot(glob_ref[...], wd1g_ref[...], preferred_element_type=f32)
        + bd1_ref[...], 0.0)
    d2 = jnp.maximum(jnp.dot(d1, wd2_ref[...], preferred_element_type=f32)
                     + bd2_ref[...], 0.0)
    logit = jnp.sum(d2 * w3_ref[...], axis=1, keepdims=True) + b3_ref[:, 0:1]
    out_ref[...] = jax.nn.sigmoid(logit)                      # (Bp, 1)


# ------------------------------ wrappers -------------------------------------

def _prep_inputs(x, local_idx, global_idx, bt):
    """NCL input -> (nt, 5*bt, 2048) batch-on-sublane local slab + (nt, bt, 128) globals."""
    B, _, L = x.shape
    glob = x[:, jnp.asarray(global_idx), 0]                  # (B, n_glob)
    glob = jnp.pad(glob, ((0, 0), (0, _CP - glob.shape[1])))
    loc = x[:, jnp.asarray(local_idx), :]                    # (B, C0, L)
    loc = jnp.transpose(loc, (0, 2, 1))                      # (B, L, C0)
    rows = L + 1                                             # +1 conv left-pad row
    rows_p = ((rows + 15) // 16) * 16
    n_super = rows_p // 16
    loc = jnp.pad(loc, ((0, 0), (1, rows_p - rows), (0, _CP - loc.shape[2])))
    xg = loc.reshape(B, n_super, 16 * _CP)                   # (B, 5, 2048)

    nt = -(-B // bt)                                         # batch tiles
    bpad = nt * bt
    xg = jnp.pad(xg, ((0, bpad - B), (0, 0), (0, 0)))
    glob = jnp.pad(glob, ((0, bpad - B), (0, 0)))
    # per-tile row layout: row = super_row * bt + sample
    xg = xg.reshape(nt, bt, n_super, 16 * _CP)
    xg = jnp.transpose(xg, (0, 2, 1, 3)).reshape(nt, n_super * bt, 16 * _CP)
    glob = glob.reshape(nt, bt, _CP)
    return xg.astype(jnp.float32), glob.astype(jnp.float32), nt


def forward(x, packed, *, local_idx, global_idx, batch_tile=_BATCH_TILE):
    B, _, L = x.shape
    assert L == 64, "kernel is specialized for the default pipeline (L=64 -> T=4)"
    bt = min(batch_tile, B)
    xg, glob, nt = _prep_inputs(x, local_idx, global_idx, bt)
    assert xg.shape == (nt, _NSUP * bt, 16 * _CP)

    w_names = ("w1", "b1", "w2", "b2", "wih", "whh", "bl",
               "wd1h", "wd1g", "bd1", "wd2", "bd2", "w3", "b3")
    weights = [packed[k] for k in w_names]
    w_specs = [pl.BlockSpec(w.shape, lambda i: (0, 0)) for w in weights]

    out = pl.pallas_call(
        _fused_forward_kernel,
        out_shape=jax.ShapeDtypeStruct((nt, bt, 1), jnp.float32),
        grid=(nt,),
        in_specs=[pl.BlockSpec((None, _NSUP * bt, 16 * _CP), lambda i: (i, 0, 0)),
                  pl.BlockSpec((None, bt, _CP), lambda i: (i, 0, 0))] + w_specs,
        out_specs=pl.BlockSpec((None, bt, 1), lambda i: (i, 0, 0)),
        compiler_params=pltpu.CompilerParams(
            dimension_semantics=("parallel",)),   # megacore on v7x; pipelined xg DMA
    )(xg, glob, *weights)
    return out.reshape(nt * bt, 1)[:B]


# ------------------------------ parameters -----------------------------------

def init_params(key, n_local, n_global, c1=100, c2=100, k=3, H=50, d1=60, d2=60):
    keys = jax.random.split(key, 18)

    def kaiming(kk, shape, fan_in):                 # kaiming_uniform_ (gain sqrt(2))
        bound = math.sqrt(6.0 / fan_in)
        return jax.random.uniform(kk, shape, jnp.float32, -bound, bound)

    def unif_bias(kk, shape, fan_in):               # PyTorch default bias init
        bound = 1.0 / math.sqrt(fan_in)
        return jax.random.uniform(kk, shape, jnp.float32, -bound, bound)

    s = 1.0 / math.sqrt(H)

    def lstm_u(kk, shape):                          # PyTorch LSTM default init
        return jax.random.uniform(kk, shape, jnp.float32, -s, s)

    p = {}
    p["w_conv1"] = kaiming(keys[0], (c1, n_local, k), n_local * k)
    p["b_conv1"] = unif_bias(keys[1], (c1,), n_local * k)
    p["w_conv2"] = kaiming(keys[2], (c2, c1, k), c1 * k)
    p["b_conv2"] = unif_bias(keys[3], (c2,), c1 * k)
    p["w_ih_f"] = lstm_u(keys[4], (4 * H, c2))
    p["w_hh_f"] = lstm_u(keys[5], (4 * H, H))
    p["b_ih_f"] = lstm_u(keys[6], (4 * H,))
    p["b_hh_f"] = lstm_u(keys[7], (4 * H,))
    p["w_ih_b"] = lstm_u(keys[8], (4 * H, c2))
    p["w_hh_b"] = lstm_u(keys[9], (4 * H, H))
    p["b_ih_b"] = lstm_u(keys[10], (4 * H,))
    p["b_hh_b"] = lstm_u(keys[11], (4 * H,))
    din = 2 * H + n_global
    p["w_d1"] = kaiming(keys[12], (din, d1), din)
    p["b_d1"] = unif_bias(keys[13], (d1,), din)
    p["w_d2"] = kaiming(keys[14], (d1, d2), d1)
    p["b_d2"] = unif_bias(keys[15], (d2,), d1)
    p["w_d3"] = kaiming(keys[16], (d2, 1), d2)
    p["b_d3"] = unif_bias(keys[17], (1,), d2)
    return p


def pack_params(p):
    """128-pad, transpose for x@W, fold eval-mode BN scales, pack both LSTM
    directions per 128-lane gate block (blocks ordered [i, f, o, g])."""
    f32 = jnp.float32
    c1, c0, K = p["w_conv1"].shape
    c2 = p["w_conv2"].shape[0]
    H = p["w_hh_f"].shape[1]
    d1 = p["w_d1"].shape[1]
    d2 = p["w_d2"].shape[1]
    ng = p["w_d1"].shape[0] - 2 * H
    assert K == 3 and max(c0, c1, c2, d1, d2, ng) <= _CP
    assert H <= 64, "gate packing requires both directions to fit one 128-lane block"

    w1 = jnp.zeros((K * _CP, _CP), f32)
    w2 = jnp.zeros((K * _CP, _CP), f32)
    for k in range(K):
        w1 = w1.at[k * _CP:k * _CP + c0, :c1].set(p["w_conv1"][:, :, k].T * _BN_SCALE)
        w2 = w2.at[k * _CP:k * _CP + c1, :c2].set(p["w_conv2"][:, :, k].T * _BN_SCALE)
    b1 = jnp.zeros((1, _CP), f32).at[0, :c1].set(p["b_conv1"])
    b2 = jnp.zeros((1, _CP), f32).at[0, :c2].set(p["b_conv2"])

    # LSTM: 4 gate blocks of 128 lanes in order [i, f, o, g] (sigmoid 0:384,
    # tanh 384:512); within a block forward dir occupies lanes [0:H), backward
    # [64:64+H).  bn_cnn2 folded into W_ih.
    blk_of_gate = {0: 0, 1: 1, 2: 3, 3: 2}         # torch gate order i,f,g,o
    wih = jnp.zeros((_CP, 4 * _CP), f32)
    whh = jnp.zeros((_CP, 4 * _CP), f32)           # rows 0:64 fwd h, 64:128 bwd h
    bl = jnp.zeros((1, 4 * _CP), f32)
    for d, sfx in enumerate(("f", "b")):
        w_ih = p["w_ih_" + sfx]
        w_hh = p["w_hh_" + sfx]
        bsum = p["b_ih_" + sfx] + p["b_hh_" + sfx]
        doff = 64 * d
        for g in range(4):
            col = blk_of_gate[g] * _CP + doff
            wih = wih.at[:c2, col:col + H].set(w_ih[g * H:(g + 1) * H, :].T * _BN_SCALE)
            whh = whh.at[doff:doff + H, col:col + H].set(w_hh[g * H:(g + 1) * H, :].T)
            bl = bl.at[0, col:col + H].set(bsum[g * H:(g + 1) * H])

    # Dense head; hidden layout = [h_fwd(0:H) | pad | h_bwd(64:64+H) | pad];
    # global features get their own (128,128) weight half.  bn_dense folded.
    wd1h = jnp.zeros((_CP, _CP), f32)
    wd1h = wd1h.at[0:H, :d1].set(p["w_d1"][0:H, :] * _BN_SCALE)
    wd1h = wd1h.at[64:64 + H, :d1].set(p["w_d1"][H:2 * H, :] * _BN_SCALE)
    wd1g = jnp.zeros((_CP, _CP), f32).at[0:ng, :d1].set(p["w_d1"][2 * H:, :] * _BN_SCALE)
    bd1 = jnp.zeros((1, _CP), f32).at[0, :d1].set(p["b_d1"])
    wd2 = jnp.zeros((_CP, _CP), f32).at[:d1, :d2].set(p["w_d2"])
    bd2 = jnp.zeros((1, _CP), f32).at[0, :d2].set(p["b_d2"])
    w3 = jnp.zeros((1, _CP), f32).at[0, :d2].set(p["w_d3"][:, 0])
    b3 = jnp.full((1, _CP), p["b_d3"][0], f32)
    return dict(w1=w1, b1=b1, w2=w2, b2=b2, wih=wih, whh=whh, bl=bl,
                wd1h=wd1h, wd1g=wd1g, bd1=bd1, wd2=wd2, bd2=bd2, w3=w3, b3=b3)


# ------------------------------ main ------------------------------------------

if __name__ == "__main__":
    B, C_total, L = 2, 8, 64
    local_idx = (0, 1, 2, 3, 4, 5)     # 6 local feature channels
    global_idx = (6, 7)                # 2 global feature channels (use_global_features=True)

    key = jax.random.PRNGKey(0)
    kx, kp = jax.random.split(key)
    x = jax.random.normal(kx, (B, C_total, L), jnp.float32)
    raw = init_params(kp, len(local_idx), len(global_idx))
    packed = pack_params(raw)          # one-time padding / folding / gate packing

    fwd = jax.jit(partial(forward, local_idx=local_idx, global_idx=global_idx))
    out = jax.block_until_ready(fwd(x, packed))
    assert out.shape == (B, 1) and out.dtype == jnp.float32
    assert bool(jnp.all(jnp.isfinite(out)))
    print("KERNEL_OK")
</pallas_src>

<mosaic_0001>
module attributes {stable_mosaic.version = 11 : i64} {
  func.func @_fused_forward_kernel(%arg0: i32, %arg1: memref<1x10x2048xf32, #tpu.memory_space<vmem>>, %arg2: memref<1x2x128xf32, #tpu.memory_space<vmem>>, %arg3: memref<384x128xf32, #tpu.memory_space<vmem>>, %arg4: memref<1x128xf32, #tpu.memory_space<vmem>>, %arg5: memref<384x128xf32, #tpu.memory_space<vmem>>, %arg6: memref<1x128xf32, #tpu.memory_space<vmem>>, %arg7: memref<128x512xf32, #tpu.memory_space<vmem>>, %arg8: memref<128x512xf32, #tpu.memory_space<vmem>>, %arg9: memref<1x512xf32, #tpu.memory_space<vmem>>, %arg10: memref<128x128xf32, #tpu.memory_space<vmem>>, %arg11: memref<128x128xf32, #tpu.memory_space<vmem>>, %arg12: memref<1x128xf32, #tpu.memory_space<vmem>>, %arg13: memref<128x128xf32, #tpu.memory_space<vmem>>, %arg14: memref<1x128xf32, #tpu.memory_space<vmem>>, %arg15: memref<1x128xf32, #tpu.memory_space<vmem>>, %arg16: memref<1x128xf32, #tpu.memory_space<vmem>>, %arg17: memref<1x2x1xf32, #tpu.memory_space<vmem>>) attributes {dimension_semantics = [#tpu.dimension_semantics<parallel>], iteration_bounds = array<i64: 1>, scalar_prefetch = 0 : i64, scratch_operands = 0 : i64, tpu.core_type = #tpu.core_type<tc>, window_params = [{transform_indices = @transform_0, window_bounds = array<i64: 1, 10, 2048>}, {transform_indices = @transform_1, window_bounds = array<i64: 1, 2, 128>}, {pipeline_mode = #tpu.pipeline_mode<synchronous>, transform_indices = @transform_2, window_bounds = array<i64: 384, 128>}, {pipeline_mode = #tpu.pipeline_mode<synchronous>, transform_indices = @transform_3, window_bounds = array<i64: 1, 128>}, {pipeline_mode = #tpu.pipeline_mode<synchronous>, transform_indices = @transform_4, window_bounds = array<i64: 384, 128>}, {pipeline_mode = #tpu.pipeline_mode<synchronous>, transform_indices = @transform_5, window_bounds = array<i64: 1, 128>}, {pipeline_mode = #tpu.pipeline_mode<synchronous>, transform_indices = @transform_6, window_bounds = array<i64: 128, 512>}, {pipeline_mode = #tpu.pipeline_mode<synchronous>, transform_indices = @transform_7, window_bounds = array<i64: 128, 512>}, {pipeline_mode = #tpu.pipeline_mode<synchronous>, transform_indices = @transform_8, window_bounds = array<i64: 1, 512>}, {pipeline_mode = #tpu.pipeline_mode<synchronous>, transform_indices = @transform_9, window_bounds = array<i64: 128, 128>}, {pipeline_mode = #tpu.pipeline_mode<synchronous>, transform_indices = @transform_10, window_bounds = array<i64: 128, 128>}, {pipeline_mode = #tpu.pipeline_mode<synchronous>, transform_indices = @transform_11, window_bounds = array<i64: 1, 128>}, {pipeline_mode = #tpu.pipeline_mode<synchronous>, transform_indices = @transform_12, window_bounds = array<i64: 128, 128>}, {pipeline_mode = #tpu.pipeline_mode<synchronous>, transform_indices = @transform_13, window_bounds = array<i64: 1, 128>}, {pipeline_mode = #tpu.pipeline_mode<synchronous>, transform_indices = @transform_14, window_bounds = array<i64: 1, 128>}, {pipeline_mode = #tpu.pipeline_mode<synchronous>, transform_indices = @transform_15, window_bounds = array<i64: 1, 128>}, {transform_indices = @transform_16, window_bounds = array<i64: 1, 2, 1>}]} {
    %c0 = arith.constant 0 : index
    %c0_0 = arith.constant 0 : index
    %0 = vector.load %arg4[%c0, %c0_0] : memref<1x128xf32, #tpu.memory_space<vmem>>, vector<1x128xf32>
    %c0_1 = arith.constant 0 : index
    %c0_2 = arith.constant 0 : index
    %1 = vector.load %arg6[%c0_1, %c0_2] : memref<1x128xf32, #tpu.memory_space<vmem>>, vector<1x128xf32>
    %c0_3 = arith.constant 0 : index
    %c0_4 = arith.constant 0 : index
    %c0_5 = arith.constant 0 : index
    %2 = vector.load %arg1[%c0_3, %c0_4, %c0_5] : memref<1x10x2048xf32, #tpu.memory_space<vmem>>, vector<1x8x384xf32>
    %3 = vector.shape_cast %2 : vector<1x8x384xf32> to vector<8x384xf32>
    %c0_6 = arith.constant 0 : index
    %c0_7 = arith.constant 0 : index
    %4 = vector.load %arg3[%c0_6, %c0_7] : memref<384x128xf32, #tpu.memory_space<vmem>>, vector<384x128xf32>
    %cst = arith.constant dense<0.000000e+00> : vector<8x128xf32>
    %5 = tpu.matmul %3, %4, %cst {dimension_numbers = #tpu.dot_dimension_numbers<[1], [0], [0], [1], [0, 0, 1, 1], [], []>} : vector<8x384xf32>, vector<384x128xf32>, vector<8x128xf32> -> vector<8x128xf32>
    %c0_8 = arith.constant 0 : index
    %c0_9 = arith.constant 0 : index
    %c256 = arith.constant 256 : index
    %6 = vector.load %arg1[%c0_8, %c0_9, %c256] : memref<1x10x2048xf32, #tpu.memory_space<vmem>>, vector<1x8x384xf32>
    %7 = vector.shape_cast %6 : vector<1x8x384xf32> to vector<8x384xf32>
    %c0_10 = arith.constant 0 : index
    %c0_11 = arith.constant 0 : index
    %8 = vector.load %arg3[%c0_10, %c0_11] : memref<384x128xf32, #tpu.memory_space<vmem>>, vector<384x128xf32>
    %cst_12 = arith.constant dense<0.000000e+00> : vector<8x128xf32>
    %9 = tpu.matmul %7, %8, %cst_12 {dimension_numbers = #tpu.dot_dimension_numbers<[1], [0], [0], [1], [0, 0, 1, 1], [], []>} : vector<8x384xf32>, vector<384x128xf32>, vector<8x128xf32> -> vector<8x128xf32>
    %10 = arith.maximumf %5, %9 : vector<8x128xf32>
    %11 = vector.broadcast %0 : vector<1x128xf32> to vector<8x128xf32>
    %12 = arith.addf %10, %11 : vector<8x128xf32>
    %cst_13 = arith.constant 0.000000e+00 : f32
    %13 = vector.broadcast %cst_13 : f32 to vector<8x128xf32>
    %14 = arith.maximumf %12, %13 : vector<8x128xf32>
    %c0_14 = arith.constant 0 : index
    %c0_15 = arith.constant 0 : index
    %c512 = arith.constant 512 : index
    %15 = vector.load %arg1[%c0_14, %c0_15, %c512] : memref<1x10x2048xf32, #tpu.memory_space<vmem>>, vector<1x8x384xf32>
    %16 = vector.shape_cast %15 : vector<1x8x384xf32> to vector<8x384xf32>
    %c0_16 = arith.constant 0 : index
    %c0_17 = arith.constant 0 : index
    %17 = vector.load %arg3[%c0_16, %c0_17] : memref<384x128xf32, #tpu.memory_space<vmem>>, vector<384x128xf32>
    %cst_18 = arith.constant dense<0.000000e+00> : vector<8x128xf32>
    %18 = tpu.matmul %16, %17, %cst_18 {dimension_numbers = #tpu.dot_dimension_numbers<[1], [0], [0], [1], [0, 0, 1, 1], [], []>} : vector<8x384xf32>, vector<384x128xf32>, vector<8x128xf32> -> vector<8x128xf32>
    %c0_19 = arith.constant 0 : index
    %c0_20 = arith.constant 0 : index
    %c768 = arith.constant 768 : index
    %19 = vector.load %arg1[%c0_19, %c0_20, %c768] : memref<1x10x2048xf32, #tpu.memory_space<vmem>>, vector<1x8x384xf32>
    %20 = vector.shape_cast %19 : vector<1x8x384xf32> to vector<8x384xf32>
    %c0_21 = arith.constant 0 : index
    %c0_22 = arith.constant 0 : index
    %21 = vector.load %arg3[%c0_21, %c0_22] : memref<384x128xf32, #tpu.memory_space<vmem>>, vector<384x128xf32>
    %cst_23 = arith.constant dense<0.000000e+00> : vector<8x128xf32>
    %22 = tpu.matmul %20, %21, %cst_23 {dimension_numbers = #tpu.dot_dimension_numbers<[1], [0], [0], [1], [0, 0, 1, 1], [], []>} : vector<8x384xf32>, vector<384x128xf32>, vector<8x128xf32> -> vector<8x128xf32>
    %23 = arith.maximumf %18, %22 : vector<8x128xf32>
    %24 = vector.broadcast %0 : vector<1x128xf32> to vector<8x128xf32>
    %25 = arith.addf %23, %24 : vector<8x128xf32>
    %cst_24 = arith.constant 0.000000e+00 : f32
    %26 = vector.broadcast %cst_24 : f32 to vector<8x128xf32>
    %27 = arith.maximumf %25, %26 : vector<8x128xf32>
    %c0_25 = arith.constant 0 : index
    %c0_26 = arith.constant 0 : index
    %c1024 = arith.constant 1024 : index
    %28 = vector.load %arg1[%c0_25, %c0_26, %c1024] : memref<1x10x2048xf32, #tpu.memory_space<vmem>>, vector<1x8x384xf32>
    %29 = vector.shape_cast %28 : vector<1x8x384xf32> to vector<8x384xf32>
    %c0_27 = arith.constant 0 : index
    %c0_28 = arith.constant 0 : index
    %30 = vector.load %arg3[%c0_27, %c0_28] : memref<384x128xf32, #tpu.memory_space<vmem>>, vector<384x128xf32>
    %cst_29 = arith.constant dense<0.000000e+00> : vector<8x128xf32>
    %31 = tpu.matmul %29, %30, %cst_29 {dimension_numbers = #tpu.dot_dimension_numbers<[1], [0], [0], [1], [0, 0, 1, 1], [], []>} : vector<8x384xf32>, vector<384x128xf32>, vector<8x128xf32> -> vector<8x128xf32>
    %c0_30 = arith.constant 0 : index
    %c0_31 = arith.constant 0 : index
    %c1280 = arith.constant 1280 : index
    %32 = vector.load %arg1[%c0_30, %c0_31, %c1280] : memref<1x10x2048xf32, #tpu.memory_space<vmem>>, vector<1x8x384xf32>
    %33 = vector.shape_cast %32 : vector<1x8x384xf32> to vector<8x384xf32>
    %c0_32 = arith.constant 0 : index
    %c0_33 = arith.constant 0 : index
    %34 = vector.load %arg3[%c0_32, %c0_33] : memref<384x128xf32, #tpu.memory_space<vmem>>, vector<384x128xf32>
    %cst_34 = arith.constant dense<0.000000e+00> : vector<8x128xf32>
    %35 = tpu.matmul %33, %34, %cst_34 {dimension_numbers = #tpu.dot_dimension_numbers<[1], [0], [0], [1], [0, 0, 1, 1], [], []>} : vector<8x384xf32>, vector<384x128xf32>, vector<8x128xf32> -> vector<8x128xf32>
    %36 = arith.maximumf %31, %35 : vector<8x128xf32>
    %37 = vector.broadcast %0 : vector<1x128xf32> to vector<8x128xf32>
    %38 = arith.addf %36, %37 : vector<8x128xf32>
    %cst_35 = arith.constant 0.000000e+00 : f32
    %39 = vector.broadcast %cst_35 : f32 to vector<8x128xf32>
    %40 = arith.maximumf %38, %39 : vector<8x128xf32>
    %c0_36 = arith.constant 0 : index
    %c0_37 = arith.constant 0 : index
    %c1536 = arith.constant 1536 : index
    %41 = vector.load %arg1[%c0_36, %c0_37, %c1536] : memref<1x10x2048xf32, #tpu.memory_space<vmem>>, vector<1x8x384xf32>
    %42 = vector.shape_cast %41 : vector<1x8x384xf32> to vector<8x384xf32>
    %c0_38 = arith.constant 0 : index
    %c0_39 = arith.constant 0 : index
    %43 = vector.load %arg3[%c0_38, %c0_39] : memref<384x128xf32, #tpu.memory_space<vmem>>, vector<384x128xf32>
    %cst_40 = arith.constant dense<0.000000e+00> : vector<8x128xf32>
    %44 = tpu.matmul %42, %43, %cst_40 {dimension_numbers = #tpu.dot_dimension_numbers<[1], [0], [0], [1], [0, 0, 1, 1], [], []>} : vector<8x384xf32>, vector<384x128xf32>, vector<8x128xf32> -> vector<8x128xf32>
    %c0_41 = arith.constant 0 : index
    %c0_42 = arith.constant 0 : index
    %c1792 = arith.constant 1792 : index
    %45 = vector.load %arg1[%c0_41, %c0_42, %c1792] : memref<1x10x2048xf32, #tpu.memory_space<vmem>>, vector<1x8x256xf32>
    %46 = vector.shape_cast %45 : vector<1x8x256xf32> to vector<8x256xf32>
    %c0_43 = arith.constant 0 : index
    %c0_44 = arith.constant 0 : index
    %47 = vector.load %arg3[%c0_43, %c0_44] : memref<384x128xf32, #tpu.memory_space<vmem>>, vector<256x128xf32>
    %cst_45 = arith.constant dense<0.000000e+00> : vector<8x128xf32>
    %48 = tpu.matmul %46, %47, %cst_45 {dimension_numbers = #tpu.dot_dimension_numbers<[1], [0], [0], [1], [0, 0, 1, 1], [], []>} : vector<8x256xf32>, vector<256x128xf32>, vector<8x128xf32> -> vector<8x128xf32>
    %c0_46 = arith.constant 0 : index
    %c2 = arith.constant 2 : index
    %c0_47 = arith.constant 0 : index
    %49 = vector.load %arg1[%c0_46, %c2, %c0_47] : memref<1x10x2048xf32, #tpu.memory_space<vmem>>, vector<1x8x128xf32>
    %50 = vector.shape_cast %49 : vector<1x8x128xf32> to vector<8x128xf32>
    %c256_48 = arith.constant 256 : index
    %c0_49 = arith.constant 0 : index
    %51 = vector.load %arg3[%c256_48, %c0_49] : memref<384x128xf32, #tpu.memory_space<vmem>>, vector<128x128xf32>
    %cst_50 = arith.constant dense<0.000000e+00> : vector<8x128xf32>
    %52 = tpu.matmul %50, %51, %cst_50 {dimension_numbers = #tpu.dot_dimension_numbers<[1], [0], [0], [1], [0, 0, 1, 1], [], []>} : vector<8x128xf32>, vector<128x128xf32>, vector<8x128xf32> -> vector<8x128xf32>
    %53 = arith.addf %48, %52 : vector<8x128xf32>
    %54 = arith.maximumf %44, %53 : vector<8x128xf32>
    %55 = vector.broadcast %0 : vector<1x128xf32> to vector<8x128xf32>
    %56 = arith.addf %54, %55 : vector<8x128xf32>
    %cst_51 = arith.constant 0.000000e+00 : f32
    %57 = vector.broadcast %cst_51 : f32 to vector<8x128xf32>
    %58 = arith.maximumf %56, %57 : vector<8x128xf32>
    %cst_52 = arith.constant 0.000000e+00 : f32
    %59 = vector.broadcast %cst_52 : f32 to vector<2x128xf32>
    %60 = vector.extract_strided_slice %58 {offsets = [0, 0], sizes = [6, 128], strides = [1, 1]} : vector<8x128xf32> to vector<6x128xf32>
    %61 = tpu.concatenate %59, %60 in 0 : vector<2x128xf32>, vector<6x128xf32> -> vector<8x128xf32>
    %c0_53 = arith.constant 0 : index
    %c0_54 = arith.constant 0 : index
    %62 = vector.load %arg5[%c0_53, %c0_54] : memref<384x128xf32, #tpu.memory_space<vmem>>, vector<128x128xf32>
    %c128 = arith.constant 128 : index
    %c0_55 = arith.constant 0 : index
    %63 = vector.load %arg5[%c128, %c0_55] : memref<384x128xf32, #tpu.memory_space<vmem>>, vector<128x128xf32>
    %c256_56 = arith.constant 256 : index
    %c0_57 = arith.constant 0 : index
    %64 = vector.load %arg5[%c256_56, %c0_57] : memref<384x128xf32, #tpu.memory_space<vmem>>, vector<128x128xf32>
    %cst_58 = arith.constant dense<0.000000e+00> : vector<8x128xf32>
    %65 = tpu.matmul %61, %62, %cst_58 {dimension_numbers = #tpu.dot_dimension_numbers<[1], [0], [0], [1], [0, 0, 1, 1], [], []>} : vector<8x128xf32>, vector<128x128xf32>, vector<8x128xf32> -> vector<8x128xf32>
    %cst_59 = arith.constant dense<0.000000e+00> : vector<8x128xf32>
    %66 = tpu.matmul %14, %63, %cst_59 {dimension_numbers = #tpu.dot_dimension_numbers<[1], [0], [0], [1], [0, 0, 1, 1], [], []>} : vector<8x128xf32>, vector<128x128xf32>, vector<8x128xf32> -> vector<8x128xf32>
    %67 = arith.addf %65, %66 : vector<8x128xf32>
    %cst_60 = arith.constant dense<0.000000e+00> : vector<8x128xf32>
    %68 = tpu.matmul %27, %64, %cst_60 {dimension_numbers = #tpu.dot_dimension_numbers<[1], [0], [0], [1], [0, 0, 1, 1], [], []>} : vector<8x128xf32>, vector<128x128xf32>, vector<8x128xf32> -> vector<8x128xf32>
    %69 = arith.addf %67, %68 : vector<8x128xf32>
    %cst_61 = arith.constant dense<0.000000e+00> : vector<8x128xf32>
    %70 = tpu.matmul %27, %62, %cst_61 {dimension_numbers = #tpu.dot_dimension_numbers<[1], [0], [0], [1], [0, 0, 1, 1], [], []>} : vector<8x128xf32>, vector<128x128xf32>, vector<8x128xf32> -> vector<8x128xf32>
    %cst_62 = arith.constant dense<0.000000e+00> : vector<8x128xf32>
    %71 = tpu.matmul %40, %63, %cst_62 {dimension_numbers = #tpu.dot_dimension_numbers<[1], [0], [0], [1], [0, 0, 1, 1], [], []>} : vector<8x128xf32>, vector<128x128xf32>, vector<8x128xf32> -> vector<8x128xf32>
    %72 = arith.addf %70, %71 : vector<8x128xf32>
    %cst_63 = arith.constant dense<0.000000e+00> : vector<8x128xf32>
    %73 = tpu.matmul %58, %64, %cst_63 {dimension_numbers = #tpu.dot_dimension_numbers<[1], [0], [0], [1], [0, 0, 1, 1], [], []>} : vector<8x128xf32>, vector<128x128xf32>, vector<8x128xf32> -> vector<8x128xf32>
    %74 = arith.addf %72, %73 : vector<8x128xf32>
    %75 = arith.maximumf %69, %74 : vector<8x128xf32>
    %76 = vector.broadcast %1 : vector<1x128xf32> to vector<8x128xf32>
    %77 = arith.addf %75, %76 : vector<8x128xf32>
    %cst_64 = arith.constant 0.000000e+00 : f32
    %78 = vector.broadcast %cst_64 : f32 to vector<8x128xf32>
    %79 = arith.maximumf %77, %78 : vector<8x128xf32>
    %c0_65 = arith.constant 0 : index
    %c0_66 = arith.constant 0 : index
    %80 = vector.load %arg7[%c0_65, %c0_66] : memref<128x512xf32, #tpu.memory_space<vmem>>, vector<128x512xf32>
    %cst_67 = arith.constant dense<0.000000e+00> : vector<8x512xf32>
    %81 = tpu.matmul %79, %80, %cst_67 {dimension_numbers = #tpu.dot_dimension_numbers<[1], [0], [0], [1], [0, 0, 1, 1], [], []>} : vector<8x128xf32>, vector<128x512xf32>, vector<8x512xf32> -> vector<8x512xf32>
    %c0_68 = arith.constant 0 : index
    %c0_69 = arith.constant 0 : index
    %82 = vector.load %arg9[%c0_68, %c0_69] : memref<1x512xf32, #tpu.memory_space<vmem>>, vector<1x512xf32>
    %83 = vector.broadcast %82 : vector<1x512xf32> to vector<8x512xf32>
    %84 = arith.addf %81, %83 : vector<8x512xf32>
    %85 = tpu.iota {dimensions = array<i32: 1>} : vector<2x512xi32>
    %c64_i32 = arith.constant 64 : i32
    %86 = vector.broadcast %c64_i32 : i32 to vector<2x512xi32>
    %87 = arith.andi %85, %86 : vector<2x512xi32>
    %c0_i32 = arith.constant 0 : i32
    %88 = vector.broadcast %c0_i32 : i32 to vector<2x512xi32>
    %89 = arith.cmpi eq, %87, %88 : vector<2x512xi32>
    %90 = vector.extract_strided_slice %84 {offsets = [0, 0], sizes = [2, 512], strides = [1, 1]} : vector<8x512xf32> to vector<2x512xf32>
    %91 = vector.extract_strided_slice %84 {offsets = [6, 0], sizes = [2, 512], strides = [1, 1]} : vector<8x512xf32> to vector<2x512xf32>
    %92 = arith.select %89, %90, %91 : vector<2x512xi1>, vector<2x512xf32>
    %93 = vector.extract_strided_slice %84 {offsets = [2, 0], sizes = [2, 512], strides = [1, 1]} : vector<8x512xf32> to vector<2x512xf32>
    %94 = vector.extract_strided_slice %84 {offsets = [4, 0], sizes = [2, 512], strides = [1, 1]} : vector<8x512xf32> to vector<2x512xf32>
    %95 = arith.select %89, %93, %94 : vector<2x512xi1>, vector<2x512xf32>
    %96 = vector.extract_strided_slice %84 {offsets = [4, 0], sizes = [2, 512], strides = [1, 1]} : vector<8x512xf32> to vector<2x512xf32>
    %97 = vector.extract_strided_slice %84 {offsets = [2, 0], sizes = [2, 512], strides = [1, 1]} : vector<8x512xf32> to vector<2x512xf32>
    %98 = arith.select %89, %96, %97 : vector<2x512xi1>, vector<2x512xf32>
    %99 = vector.extract_strided_slice %84 {offsets = [6, 0], sizes = [2, 512], strides = [1, 1]} : vector<8x512xf32> to vector<2x512xf32>
    %100 = vector.extract_strided_slice %84 {offsets = [0, 0], sizes = [2, 512], strides = [1, 1]} : vector<8x512xf32> to vector<2x512xf32>
    %101 = arith.select %89, %99, %100 : vector<2x512xi1>, vector<2x512xf32>
    %cst_70 = arith.constant 0.000000e+00 : f32
    %102 = vector.broadcast %cst_70 : f32 to vector<2x128xf32>
    %cst_71 = arith.constant 0.000000e+00 : f32
    %103 = vector.broadcast %cst_71 : f32 to vector<2x128xf32>
    %c0_72 = arith.constant 0 : index
    %c0_73 = arith.constant 0 : index
    %104 = vector.load %arg8[%c0_72, %c0_73] : memref<128x512xf32, #tpu.memory_space<vmem>>, vector<128x512xf32>
    %cst_74 = arith.constant dense<0.000000e+00> : vector<2x512xf32>
    %105 = tpu.matmul %102, %104, %cst_74 {dimension_numbers = #tpu.dot_dimension_numbers<[1], [0], [0], [1], [0, 0, 1, 1], [], []>} : vector<2x128xf32>, vector<128x512xf32>, vector<2x512xf32> -> vector<2x512xf32>
    %106 = arith.addf %92, %105 : vector<2x512xf32>
    %107 = vector.extract_strided_slice %106 {offsets = [0, 0], sizes = [2, 384], strides = [1, 1]} : vector<2x512xf32> to vector<2x384xf32>
    %108 = arith.negf %107 : vector<2x384xf32>
    %109 = math.exp %108 : vector<2x384xf32>
    %cst_75 = arith.constant 1.000000e+00 : f32
    %110 = vector.broadcast %cst_75 : f32 to vector<2x384xf32>
    %111 = arith.addf %110, %109 : vector<2x384xf32>
    %112 = arith.divf %110, %111 : vector<2x384xf32>
    %113 = vector.extract_strided_slice %112 {offsets = [0, 0], sizes = [2, 128], strides = [1, 1]} : vector<2x384xf32> to vector<2x128xf32>
    %114 = vector.extract_strided_slice %112 {offsets = [0, 128], sizes = [2, 128], strides = [1, 1]} : vector<2x384xf32> to vector<2x128xf32>
    %115 = vector.extract_strided_slice %112 {offsets = [0, 256], sizes = [2, 128], strides = [1, 1]} : vector<2x384xf32> to vector<2x128xf32>
    %116 = vector.extract_strided_slice %106 {offsets = [0, 384], sizes = [2, 128], strides = [1, 1]} : vector<2x512xf32> to vector<2x128xf32>
    %117 = math.tanh %116 : vector<2x128xf32>
    %118 = arith.mulf %114, %103 : vector<2x128xf32>
    %119 = arith.mulf %113, %117 : vector<2x128xf32>
    %120 = arith.addf %118, %119 : vector<2x128xf32>
    %121 = math.tanh %120 : vector<2x128xf32>
    %122 = arith.mulf %115, %121 : vector<2x128xf32>
    %c0_76 = arith.constant 0 : index
    %c0_77 = arith.constant 0 : index
    %123 = vector.load %arg8[%c0_76, %c0_77] : memref<128x512xf32, #tpu.memory_space<vmem>>, vector<128x512xf32>
    %cst_78 = arith.constant dense<0.000000e+00> : vector<2x512xf32>
    %124 = tpu.matmul %122, %123, %cst_78 {dimension_numbers = #tpu.dot_dimension_numbers<[1], [0], [0], [1], [0, 0, 1, 1], [], []>} : vector<2x128xf32>, vector<128x512xf32>, vector<2x512xf32> -> vector<2x512xf32>
    %125 = arith.addf %95, %124 : vector<2x512xf32>
    %126 = vector.extract_strided_slice %125 {offsets = [0, 0], sizes = [2, 384], strides = [1, 1]} : vector<2x512xf32> to vector<2x384xf32>
    %127 = arith.negf %126 : vector<2x384xf32>
    %128 = math.exp %127 : vector<2x384xf32>
    %cst_79 = arith.constant 1.000000e+00 : f32
    %129 = vector.broadcast %cst_79 : f32 to vector<2x384xf32>
    %130 = arith.addf %129, %128 : vector<2x384xf32>
    %131 = arith.divf %129, %130 : vector<2x384xf32>
    %132 = vector.extract_strided_slice %131 {offsets = [0, 0], sizes = [2, 128], strides = [1, 1]} : vector<2x384xf32> to vector<2x128xf32>
    %133 = vector.extract_strided_slice %131 {offsets = [0, 128], sizes = [2, 128], strides = [1, 1]} : vector<2x384xf32> to vector<2x128xf32>
    %134 = vector.extract_strided_slice %131 {offsets = [0, 256], sizes = [2, 128], strides = [1, 1]} : vector<2x384xf32> to vector<2x128xf32>
    %135 = vector.extract_strided_slice %125 {offsets = [0, 384], sizes = [2, 128], strides = [1, 1]} : vector<2x512xf32> to vector<2x128xf32>
    %136 = math.tanh %135 : vector<2x128xf32>
    %137 = arith.mulf %133, %120 : vector<2x128xf32>
    %138 = arith.mulf %132, %136 : vector<2x128xf32>
    %139 = arith.addf %137, %138 : vector<2x128xf32>
    %140 = math.tanh %139 : vector<2x128xf32>
    %141 = arith.mulf %134, %140 : vector<2x128xf32>
    %c0_80 = arith.constant 0 : index
    %c0_81 = arith.constant 0 : index
    %142 = vector.load %arg8[%c0_80, %c0_81] : memref<128x512xf32, #tpu.memory_space<vmem>>, vector<128x512xf32>
    %cst_82 = arith.constant dense<0.000000e+00> : vector<2x512xf32>
    %143 = tpu.matmul %141, %142, %cst_82 {dimension_numbers = #tpu.dot_dimension_numbers<[1], [0], [0], [1], [0, 0, 1, 1], [], []>} : vector<2x128xf32>, vector<128x512xf32>, vector<2x512xf32> -> vector<2x512xf32>
    %144 = arith.addf %98, %143 : vector<2x512xf32>
    %145 = vector.extract_strided_slice %144 {offsets = [0, 0], sizes = [2, 384], strides = [1, 1]} : vector<2x512xf32> to vector<2x384xf32>
    %146 = arith.negf %145 : vector<2x384xf32>
    %147 = math.exp %146 : vector<2x384xf32>
    %cst_83 = arith.constant 1.000000e+00 : f32
    %148 = vector.broadcast %cst_83 : f32 to vector<2x384xf32>
    %149 = arith.addf %148, %147 : vector<2x384xf32>
    %150 = arith.divf %148, %149 : vector<2x384xf32>
    %151 = vector.extract_strided_slice %150 {offsets = [0, 0], sizes = [2, 128], strides = [1, 1]} : vector<2x384xf32> to vector<2x128xf32>
    %152 = vector.extract_strided_slice %150 {offsets = [0, 128], sizes = [2, 128], strides = [1, 1]} : vector<2x384xf32> to vector<2x128xf32>
    %153 = vector.extract_strided_slice %150 {offsets = [0, 256], sizes = [2, 128], strides = [1, 1]} : vector<2x384xf32> to vector<2x128xf32>
    %154 = vector.extract_strided_slice %144 {offsets = [0, 384], sizes = [2, 128], strides = [1, 1]} : vector<2x512xf32> to vector<2x128xf32>
    %155 = math.tanh %154 : vector<2x128xf32>
    %156 = arith.mulf %152, %139 : vector<2x128xf32>
    %157 = arith.mulf %151, %155 : vector<2x128xf32>
    %158 = arith.addf %156, %157 : vector<2x128xf32>
    %159 = math.tanh %158 : vector<2x128xf32>
    %160 = arith.mulf %153, %159 : vector<2x128xf32>
    %c0_84 = arith.constant 0 : index
    %c0_85 = arith.constant 0 : index
    %161 = vector.load %arg8[%c0_84, %c0_85] : memref<128x512xf32, #tpu.memory_space<vmem>>, vector<128x512xf32>
    %cst_86 = arith.constant dense<0.000000e+00> : vector<2x512xf32>
    %162 = tpu.matmul %160, %161, %cst_86 {dimension_numbers = #tpu.dot_dimension_numbers<[1], [0], [0], [1], [0, 0, 1, 1], [], []>} : vector<2x128xf32>, vector<128x512xf32>, vector<2x512xf32> -> vector<2x512xf32>
    %163 = arith.addf %101, %162 : vector<2x512xf32>
    %164 = vector.extract_strided_slice %163 {offsets = [0, 0], sizes = [2, 384], strides = [1, 1]} : vector<2x512xf32> to vector<2x384xf32>
    %165 = arith.negf %164 : vector<2x384xf32>
    %166 = math.exp %165 : vector<2x384xf32>
    %cst_87 = arith.constant 1.000000e+00 : f32
    %167 = vector.broadcast %cst_87 : f32 to vector<2x384xf32>
    %168 = arith.addf %167, %166 : vector<2x384xf32>
    %169 = arith.divf %167, %168 : vector<2x384xf32>
    %170 = vector.extract_strided_slice %169 {offsets = [0, 0], sizes = [2, 128], strides = [1, 1]} : vector<2x384xf32> to vector<2x128xf32>
    %171 = vector.extract_strided_slice %169 {offsets = [0, 128], sizes = [2, 128], strides = [1, 1]} : vector<2x384xf32> to vector<2x128xf32>
    %172 = vector.extract_strided_slice %169 {offsets = [0, 256], sizes = [2, 128], strides = [1, 1]} : vector<2x384xf32> to vector<2x128xf32>
    %173 = vector.extract_strided_slice %163 {offsets = [0, 384], sizes = [2, 128], strides = [1, 1]} : vector<2x512xf32> to vector<2x128xf32>
    %174 = math.tanh %173 : vector<2x128xf32>
    %175 = arith.mulf %171, %158 : vector<2x128xf32>
    %176 = arith.mulf %170, %174 : vector<2x128xf32>
    %177 = arith.addf %175, %176 : vector<2x128xf32>
    %178 = math.tanh %177 : vector<2x128xf32>
    %179 = arith.mulf %172, %178 : vector<2x128xf32>
    %c0_88 = arith.constant 0 : index
    %c0_89 = arith.constant 0 : index
    %180 = vector.load %arg10[%c0_88, %c0_89] : memref<128x128xf32, #tpu.memory_space<vmem>>, vector<128x128xf32>
    %cst_90 = arith.constant dense<0.000000e+00> : vector<2x128xf32>
    %181 = tpu.matmul %179, %180, %cst_90 {dimension_numbers = #tpu.dot_dimension_numbers<[1], [0], [0], [1], [0, 0, 1, 1], [], []>} : vector<2x128xf32>, vector<128x128xf32>, vector<2x128xf32> -> vector<2x128xf32>
    %c0_91 = arith.constant 0 : index
    %c0_92 = arith.constant 0 : index
    %c0_93 = arith.constant 0 : index
    %182 = vector.load %arg2[%c0_91, %c0_92, %c0_93] : memref<1x2x128xf32, #tpu.memory_space<vmem>>, vector<1x2x128xf32>
    %183 = vector.shape_cast %182 : vector<1x2x128xf32> to vector<2x128xf32>
    %c0_94 = arith.constant 0 : index
    %c0_95 = arith.constant 0 : index
    %184 = vector.load %arg11[%c0_94, %c0_95] : memref<128x128xf32, #tpu.memory_space<vmem>>, vector<128x128xf32>
    %cst_96 = arith.constant dense<0.000000e+00> : vector<2x128xf32>
    %185 = tpu.matmul %183, %184, %cst_96 {dimension_numbers = #tpu.dot_dimension_numbers<[1], [0], [0], [1], [0, 0, 1, 1], [], []>} : vector<2x128xf32>, vector<128x128xf32>, vector<2x128xf32> -> vector<2x128xf32>
    %186 = arith.addf %181, %185 : vector<2x128xf32>
    %c0_97 = arith.constant 0 : index
    %c0_98 = arith.constant 0 : index
    %187 = vector.load %arg12[%c0_97, %c0_98] : memref<1x128xf32, #tpu.memory_space<vmem>>, vector<1x128xf32>
    %188 = vector.broadcast %187 : vector<1x128xf32> to vector<2x128xf32>
    %189 = arith.addf %186, %188 : vector<2x128xf32>
    %cst_99 = arith.constant 0.000000e+00 : f32
    %190 = vector.broadcast %cst_99 : f32 to vector<2x128xf32>
    %191 = arith.maximumf %189, %190 : vector<2x128xf32>
    %c0_100 = arith.constant 0 : index
    %c0_101 = arith.constant 0 : index
    %192 = vector.load %arg13[%c0_100, %c0_101] : memref<128x128xf32, #tpu.memory_space<vmem>>, vector<128x128xf32>
    %cst_102 = arith.constant dense<0.000000e+00> : vector<2x128xf32>
    %193 = tpu.matmul %191, %192, %cst_102 {dimension_numbers = #tpu.dot_dimension_numbers<[1], [0], [0], [1], [0, 0, 1, 1], [], []>} : vector<2x128xf32>, vector<128x128xf32>, vector<2x128xf32> -> vector<2x128xf32>
    %c0_103 = arith.constant 0 : index
    %c0_104 = arith.constant 0 : index
    %194 = vector.load %arg14[%c0_103, %c0_104] : memref<1x128xf32, #tpu.memory_space<vmem>>, vector<1x128xf32>
    %195 = vector.broadcast %194 : vector<1x128xf32> to vector<2x128xf32>
    %196 = arith.addf %193, %195 : vector<2x128xf32>
    %cst_105 = arith.constant 0.000000e+00 : f32
    %197 = vector.broadcast %cst_105 : f32 to vector<2x128xf32>
    %198 = arith.maximumf %196, %197 : vector<2x128xf32>
    %c0_106 = arith.constant 0 : index
    %c0_107 = arith.constant 0 : index
    %199 = vector.load %arg15[%c0_106, %c0_107] : memref<1x128xf32, #tpu.memory_space<vmem>>, vector<1x128xf32>
    %200 = vector.broadcast %199 : vector<1x128xf32> to vector<2x128xf32>
    %201 = arith.mulf %198, %200 : vector<2x128xf32>
    %cst_108 = arith.constant dense<0.000000e+00> : vector<2xf32>
    %202 = vector.multi_reduction <add>, %201, %cst_108 [1] : vector<2x128xf32> to vector<2xf32>
    %203 = vector.shape_cast %202 : vector<2xf32> to vector<2x1xf32>
    %c0_109 = arith.constant 0 : index
    %c0_110 = arith.constant 0 : index
    %204 = vector.load %arg16[%c0_109, %c0_110] : memref<1x128xf32, #tpu.memory_space<vmem>>, vector<1x1xf32>
    %205 = vector.broadcast %204 : vector<1x1xf32> to vector<2x1xf32>
    %206 = arith.addf %203, %205 : vector<2x1xf32>
    %207 = arith.negf %206 : vector<2x1xf32>
    %208 = math.exp %207 : vector<2x1xf32>
    %cst_111 = arith.constant 1.000000e+00 : f32
    %209 = vector.broadcast %cst_111 : f32 to vector<2x1xf32>
    %210 = arith.addf %209, %208 : vector<2x1xf32>
    %211 = arith.divf %209, %210 : vector<2x1xf32>
    %c0_112 = arith.constant 0 : index
    %c0_113 = arith.constant 0 : index
    %c0_114 = arith.constant 0 : index
    %212 = vector.load %arg17[%c0_112, %c0_113, %c0_114] : memref<1x2x1xf32, #tpu.memory_space<vmem>>, vector<1x2x1xf32>
    %213 = vector.shape_cast %212 : vector<1x2x1xf32> to vector<2x1xf32>
    %214 = vector.shape_cast %211 : vector<2x1xf32> to vector<1x2x1xf32>
    tpu.vector_store %arg17[%c0_112, %c0_113, %c0_114], %214 {strides = array<i32>} : memref<1x2x1xf32, #tpu.memory_space<vmem>>, vector<1x2x1xf32>,
    return
  }
  func.func @transform_0(%arg0: i32) -> (i32, i32, i32) {
    %c0_i32 = arith.constant 0 : i32
    %c0_i32_0 = arith.constant 0 : i32
    %c0_i32_1 = arith.constant 0 : i32
    return %arg0, %c0_i32, %c0_i32_0 : i32, i32, i32
  }
  func.func @transform_1(%arg0: i32) -> (i32, i32, i32) {
    %c0_i32 = arith.constant 0 : i32
    %c0_i32_0 = arith.constant 0 : i32
    %c0_i32_1 = arith.constant 0 : i32
    return %arg0, %c0_i32, %c0_i32_0 : i32, i32, i32
  }
  func.func @transform_2(%arg0: i32) -> (i32, i32) {
    %c0_i32 = arith.constant 0 : i32
    %c0_i32_0 = arith.constant 0 : i32
    %c0_i32_1 = arith.constant 0 : i32
    return %c0_i32, %c0_i32_0 : i32, i32
  }
  func.func @transform_3(%arg0: i32) -> (i32, i32) {
    %c0_i32 = arith.constant 0 : i32
    %c0_i32_0 = arith.constant 0 : i32
    %c0_i32_1 = arith.constant 0 : i32
    return %c0_i32, %c0_i32_0 : i32, i32
  }
  func.func @transform_4(%arg0: i32) -> (i32, i32) {
    %c0_i32 = arith.constant 0 : i32
    %c0_i32_0 = arith.constant 0 : i32
    %c0_i32_1 = arith.constant 0 : i32
    return %c0_i32, %c0_i32_0 : i32, i32
  }
  func.func @transform_5(%arg0: i32) -> (i32, i32) {
    %c0_i32 = arith.constant 0 : i32
    %c0_i32_0 = arith.constant 0 : i32
    %c0_i32_1 = arith.constant 0 : i32
    return %c0_i32, %c0_i32_0 : i32, i32
  }
  func.func @transform_6(%arg0: i32) -> (i32, i32) {
    %c0_i32 = arith.constant 0 : i32
    %c0_i32_0 = arith.constant 0 : i32
    %c0_i32_1 = arith.constant 0 : i32
    return %c0_i32, %c0_i32_0 : i32, i32
  }
  func.func @transform_7(%arg0: i32) -> (i32, i32) {
    %c0_i32 = arith.constant 0 : i32
    %c0_i32_0 = arith.constant 0 : i32
    %c0_i32_1 = arith.constant 0 : i32
    return %c0_i32, %c0_i32_0 : i32, i32
  }
  func.func @transform_8(%arg0: i32) -> (i32, i32) {
    %c0_i32 = arith.constant 0 : i32
    %c0_i32_0 = arith.constant 0 : i32
    %c0_i32_1 = arith.constant 0 : i32
    return %c0_i32, %c0_i32_0 : i32, i32
  }
  func.func @transform_9(%arg0: i32) -> (i32, i32) {
    %c0_i32 = arith.constant 0 : i32
    %c0_i32_0 = arith.constant 0 : i32
    %c0_i32_1 = arith.constant 0 : i32
    return %c0_i32, %c0_i32_0 : i32, i32
  }
  func.func @transform_10(%arg0: i32) -> (i32, i32) {
    %c0_i32 = arith.constant 0 : i32
    %c0_i32_0 = arith.constant 0 : i32
    %c0_i32_1 = arith.constant 0 : i32
    return %c0_i32, %c0_i32_0 : i32, i32
  }
  func.func @transform_11(%arg0: i32) -> (i32, i32) {
    %c0_i32 = arith.constant 0 : i32
    %c0_i32_0 = arith.constant 0 : i32
    %c0_i32_1 = arith.constant 0 : i32
    return %c0_i32, %c0_i32_0 : i32, i32
  }
  func.func @transform_12(%arg0: i32) -> (i32, i32) {
    %c0_i32 = arith.constant 0 : i32
    %c0_i32_0 = arith.constant 0 : i32
    %c0_i32_1 = arith.constant 0 : i32
    return %c0_i32, %c0_i32_0 : i32, i32
  }
  func.func @transform_13(%arg0: i32) -> (i32, i32) {
    %c0_i32 = arith.constant 0 : i32
    %c0_i32_0 = arith.constant 0 : i32
    %c0_i32_1 = arith.constant 0 : i32
    return %c0_i32, %c0_i32_0 : i32, i32
  }
  func.func @transform_14(%arg0: i32) -> (i32, i32) {
    %c0_i32 = arith.constant 0 : i32
    %c0_i32_0 = arith.constant 0 : i32
    %c0_i32_1 = arith.constant 0 : i32
    return %c0_i32, %c0_i32_0 : i32, i32
  }
  func.func @transform_15(%arg0: i32) -> (i32, i32) {
    %c0_i32 = arith.constant 0 : i32
    %c0_i32_0 = arith.constant 0 : i32
    %c0_i32_1 = arith.constant 0 : i32
    return %c0_i32, %c0_i32_0 : i32, i32
  }
  func.func @transform_16(%arg0: i32) -> (i32, i32, i32) {
    %c0_i32 = arith.constant 0 : i32
    %c0_i32_0 = arith.constant 0 : i32
    %c0_i32_1 = arith.constant 0 : i32
    return %arg0, %c0_i32, %c0_i32_0 : i32, i32, i32
  }
}

</mosaic_0001>

<bundles_post_ra>
// kernel: forward.1
= control target key start
LH: loop header
LB: loop body
LE: loop exit
PB: predicated region body
PF: predicated region fallthrough
CT: control target
= control target key end

     0   :  { %v7027_v0 = vmov 0.0   ;;  %vm4435_vm0 = vmmov 0   ;;  %vm1157_vm1 = vcmask 1045504   ;;  %vm1308_vm2 = vcmask 1041408   ;;  %s7009_s2 = inlined_call_operand.vmem [shape: f32[384,128], index: 2, kind: input, shape index: {}]   ;;  %s7010_s0 = inlined_call_operand.vmem [shape: f32[1,10,2048], index: 0, kind: input, shape index: {}]   ;;  %s7011_s4 = inlined_call_operand.vmem [shape: f32[384,128], index: 4, kind: input, shape index: {}]   ;;  %s7012_s3 = inlined_call_operand.vmem [shape: f32[1,128], index: 3, kind: input, shape index: {}]   ;;  %s7013_s6 = inlined_call_operand.vmem [shape: f32[128,512], index: 6, kind: input, shape index: {}]   ;;  %s7014_s7 = inlined_call_operand.vmem [shape: f32[128,512], index: 7, kind: input, shape index: {}]   ;;  %s7015_s5 = inlined_call_operand.vmem [shape: f32[1,128], index: 5, kind: input, shape index: {}]   ;;  %s7016_s8 = inlined_call_operand.vmem [shape: f32[1,512], index: 8, kind: input, shape index: {}]   ;;  %s7017_s10 = inlined_call_operand.vmem [shape: f32[128,128], index: 10, kind: input, shape index: {}]   ;;  %s7018_s9 = inlined_call_operand.vmem [shape: f32[128,128], index: 9, kind: input, shape index: {}]   ;;  %s7019_s1 = inlined_call_operand.vmem [shape: f32[1,2,128], index: 1, kind: input, shape index: {}]   ;;  %s7020_s12 = inlined_call_operand.vmem [shape: f32[128,128], index: 12, kind: input, shape index: {}]   ;;  %s7021_s11 = inlined_call_operand.vmem [shape: f32[1,128], index: 11, kind: input, shape index: {}]   ;;  %s7022_s13 = inlined_call_operand.vmem [shape: f32[1,128], index: 13, kind: input, shape index: {}]   ;;  %s7023_s14 = inlined_call_operand.vmem [shape: f32[1,128], index: 14, kind: input, shape index: {}]   ;;  %s7024_s15 = inlined_call_operand.vmem [shape: f32[1,128], index: 15, kind: input, shape index: {}]   ;;  %s7025_s16 = inlined_call_operand.vmem [shape: f32[1,2,1], index: 16, kind: output, shape index: {}]  }
   0x1   :  { %7085 = sst [smem:[#allocation32_spill]] %s7009_s2  ;;  %3753 = vmatprep.subr.mxu1 %v7027_v0  ;;  %3785 = vmatprep.mubr.msk.f32.mxu1 %vm4435_vm0, %v7027_v0  ;;  %v56_v49 = vld [vmem:[%s7010_s0 + $0x8] sm:$0xff]  ;;  %v4830_v50 = vld [vmem:[%s7010_s0 + $0x10] sm:$0xff]  ;;  %v55_v51 = vld [vmem:[%s7010_s0] sm:$0xff]  ;;  %vm3157_vm8 = vcmask 1024  }
   0x2   :  { %s7086_s23 = sld [smem:[#allocation32_spill]]  ;;  %170 = vmatprep.mubr.f32.mxu0 %v56_v49  ;;  %v247_v52 = vld [vmem:[%s7010_s0 + $0x18] sm:$0xff]  ;;  %v4907_v53 = vld [vmem:[%s7010_s0 + $0x20] sm:$0xff]  ;;  %v399_v54 = vld [vmem:[%s7010_s0 + $0x28] sm:$0xff] }
   0x3   :  { %v4983_v55 = vld [vmem:[%s7010_s0 + $0x30] sm:$0xff]  ;;  %v542_v56 = vld [vmem:[%s7010_s0 + $0x38] sm:$0xff]  ;;  %v5059_v57 = vld [vmem:[%s7010_s0 + $0x40] sm:$0xff] }
   0x4   :  { %v688_v58 = vld [vmem:[%s7010_s0 + $0x48] sm:$0xff]  ;;  %v5135_v59 = vld [vmem:[%s7010_s0 + $0x50] sm:$0xff]  ;;  %v831_v60 = vld [vmem:[%s7010_s0 + $0x58] sm:$0xff] }
   0x5   :  { %v5211_v61 = vld [vmem:[%s7010_s0 + $0x60] sm:$0xff]  ;;  %vm3164_vm3 = vmneg %vm1308_vm2 }
   0x8   :  { %v4525_v1 = vld [vmem:[%s7086_s23 + $0xf8] sm:$0xff]  ;;  %v4544_v4 = vld [vmem:[%s7086_s23 + $0xf0] sm:$0xff]  ;;  %v4561_v7 = vld [vmem:[%s7086_s23 + $0xe8] sm:$0xff] }
   0x9   :  { %v4530_v2 = vld [vmem:[%s7086_s23 + $0x178] sm:$0xff]  ;;  %3184 = vmatprep.subr.mxu0 %v4525_v1  ;;  %v4549_v5 = vld [vmem:[%s7086_s23 + $0x170] sm:$0xff]  ;;  %v4566_v8 = vld [vmem:[%s7086_s23 + $0x168] sm:$0xff] }
   0xa   :  { %v4535_v3 = vld [vmem:[%s7086_s23 + $0x78] sm:$0xff]  ;;  %3754 = vmatpush3.msra.mxu1 %v4530_v2  ;;  %v4554_v6 = vld [vmem:[%s7086_s23 + $0x70] sm:$0xff]  ;;  %v4573_v9 = vld [vmem:[%s7086_s23 + $0x68] sm:$0xff] }
   0xb   :  { %3185 = vmatpush3.msra.mxu0 %v4535_v3  ;;  %3755 = vmatprep.subr.mxu1 %v7027_v0  ;;  %v4580_v10 = vld [vmem:[%s7086_s23 + $0xe0] sm:$0xff]  ;;  %v4599_v13 = vld [vmem:[%s7086_s23 + $0xd8] sm:$0xff]  ;;  %v4618_v16 = vld [vmem:[%s7086_s23 + $0xd0] sm:$0xff] }
   0xc   :  { %3186 = vmatprep.subr.mxu0 %v4544_v4  ;;  %3756 = vmatpush3.msra.mxu1 %v4549_v5  ;;  %v4585_v11 = vld [vmem:[%s7086_s23 + $0x160] sm:$0xff]  ;;  %v4604_v14 = vld [vmem:[%s7086_s23 + $0x158] sm:$0xff]  ;;  %v4623_v17 = vld [vmem:[%s7086_s23 + $0x150] sm:$0xff] }
   0xd   :  { %3187 = vmatpush3.msra.mxu0 %v4554_v6  ;;  %3757 = vmatprep.subr.mxu1 %v7027_v0  ;;  %v4592_v12 = vld [vmem:[%s7086_s23 + $0x60] sm:$0xff]  ;;  %v4611_v15 = vld [vmem:[%s7086_s23 + $0x58] sm:$0xff]  ;;  %v4630_v18 = vld [vmem:[%s7086_s23 + $0x50] sm:$0xff] }
   0xe   :  { %3188 = vmatprep.subr.mxu0 %v4561_v7  ;;  %3758 = vmatpush3.msra.mxu1 %v4566_v8  ;;  %v4637_v19 = vld [vmem:[%s7086_s23 + $0xc8] sm:$0xff]  ;;  %v4656_v22 = vld [vmem:[%s7086_s23 + $0xc0] sm:$0xff]  ;;  %v4675_v25 = vld [vmem:[%s7086_s23 + $0xb8] sm:$0xff] }
   0xf   :  { %3189 = vmatpush3.msra.mxu0 %v4573_v9  ;;  %3759 = vmatprep.subr.mxu1 %v7027_v0  ;;  %v4642_v20 = vld [vmem:[%s7086_s23 + $0x148] sm:$0xff]  ;;  %v4661_v23 = vld [vmem:[%s7086_s23 + $0x140] sm:$0xff]  ;;  %v4680_v26 = vld [vmem:[%s7086_s23 + $0x138] sm:$0xff] }
  0x10   :  { %3190 = vmatprep.subr.mxu0 %v4580_v10  ;;  %3760 = vmatpush3.msra.mxu1 %v4585_v11  ;;  %v4649_v21 = vld [vmem:[%s7086_s23 + $0x48] sm:$0xff]  ;;  %v4668_v24 = vld [vmem:[%s7086_s23 + $0x40] sm:$0xff]  ;;  %v4687_v27 = vld [vmem:[%s7086_s23 + $0x38] sm:$0xff] }
  0x11   :  { %3191 = vmatpush3.msra.mxu0 %v4592_v12  ;;  %3761 = vmatprep.subr.mxu1 %v7027_v0  ;;  %v4694_v28 = vld [vmem:[%s7086_s23 + $0xb0] sm:$0xff]  ;;  %v4713_v31 = vld [vmem:[%s7086_s23 + $0xa8] sm:$0xff]  ;;  %v4732_v34 = vld [vmem:[%s7086_s23 + $0xa0] sm:$0xff] }
  0x12   :  { %3192 = vmatprep.subr.mxu0 %v4599_v13  ;;  %3762 = vmatpush3.msra.mxu1 %v4604_v14  ;;  %v4699_v29 = vld [vmem:[%s7086_s23 + $0x130] sm:$0xff]  ;;  %v4718_v32 = vld [vmem:[%s7086_s23 + $0x128] sm:$0xff]  ;;  %v4737_v35 = vld [vmem:[%s7086_s23 + $0x120] sm:$0xff] }
  0x13   :  { %3193 = vmatpush3.msra.mxu0 %v4611_v15  ;;  %3763 = vmatprep.subr.mxu1 %v7027_v0  ;;  %v4706_v30 = vld [vmem:[%s7086_s23 + $0x30] sm:$0xff]  ;;  %v4725_v33 = vld [vmem:[%s7086_s23 + $0x28] sm:$0xff]  ;;  %v4744_v36 = vld [vmem:[%s7086_s23 + $0x20] sm:$0xff] }
  0x14   :  { %3194 = vmatprep.subr.mxu0 %v4618_v16  ;;  %3764 = vmatpush3.msra.mxu1 %v4623_v17  ;;  %v4751_v37 = vld [vmem:[%s7086_s23 + $0x98] sm:$0xff]  ;;  %v4770_v40 = vld [vmem:[%s7086_s23 + $0x90] sm:$0xff]  ;;  %v4789_v43 = vld [vmem:[%s7086_s23 + $0x88] sm:$0xff] }
  0x15   :  { %3195 = vmatpush3.msra.mxu0 %v4630_v18  ;;  %3765 = vmatprep.subr.mxu1 %v7027_v0  ;;  %v4756_v38 = vld [vmem:[%s7086_s23 + $0x118] sm:$0xff]  ;;  %v4775_v41 = vld [vmem:[%s7086_s23 + $0x110] sm:$0xff]  ;;  %v4794_v44 = vld [vmem:[%s7086_s23 + $0x108] sm:$0xff] }
  0x16   :  { %3196 = vmatprep.subr.mxu0 %v4637_v19  ;;  %3766 = vmatpush3.msra.mxu1 %v4642_v20  ;;  %v4763_v39 = vld [vmem:[%s7086_s23 + $0x18] sm:$0xff]  ;;  %v4782_v42 = vld [vmem:[%s7086_s23 + $0x10] sm:$0xff]  ;;  %v4801_v45 = vld [vmem:[%s7086_s23 + $0x8] sm:$0xff] }
  0x17   :  { %3197 = vmatpush3.msra.mxu0 %v4649_v21  ;;  %3767 = vmatprep.subr.mxu1 %v7027_v0  ;;  %v4808_v46 = vld [vmem:[%s7086_s23 + $0x80] sm:$0xff]  ;;  %v1122_v49 = vld [vmem:[%s7086_s23 + $0x8] sm:$0xff] }
  0x18   :  { %3198 = vmatprep.subr.mxu0 %v4656_v22  ;;  %3768 = vmatpush3.msra.mxu1 %v4661_v23  ;;  %v4813_v47 = vld [vmem:[%s7086_s23 + $0x100] sm:$0xff] }
  0x19   :  { %3199 = vmatpush3.msra.mxu0 %v4668_v24  ;;  %3769 = vmatprep.subr.mxu1 %v7027_v0  ;;  %v4820_v48 = vld [vmem:[%s7086_s23] sm:$0xff] }
  0x1a   :  { %3200 = vmatprep.subr.mxu0 %v4675_v25  ;;  %3770 = vmatpush3.msra.mxu1 %v4680_v26 }
  0x1b   :  { %3201 = vmatpush3.msra.mxu0 %v4687_v27  ;;  %3771 = vmatprep.subr.mxu1 %v7027_v0 }
  0x1c   :  { %3202 = vmatprep.subr.mxu0 %v4694_v28  ;;  %3772 = vmatpush3.msra.mxu1 %v4699_v29 }
  0x1d   :  { %3203 = vmatpush3.msra.mxu0 %v4706_v30  ;;  %3773 = vmatprep.subr.mxu1 %v7027_v0 }
  0x1e   :  { %3204 = vmatprep.subr.mxu0 %v4713_v31  ;;  %3774 = vmatpush3.msra.mxu1 %v4718_v32 }
  0x1f   :  { %3205 = vmatpush3.msra.mxu0 %v4725_v33  ;;  %3775 = vmatprep.subr.mxu1 %v7027_v0 }
  0x20   :  { %3206 = vmatprep.subr.mxu0 %v4732_v34  ;;  %3776 = vmatpush3.msra.mxu1 %v4737_v35 }
  0x21   :  { %3207 = vmatpush3.msra.mxu0 %v4744_v36  ;;  %3777 = vmatprep.subr.mxu1 %v7027_v0 }
  0x22   :  { %3208 = vmatprep.subr.mxu0 %v4751_v37  ;;  %3778 = vmatpush3.msra.mxu1 %v4756_v38 }
  0x23   :  { %3209 = vmatpush3.msra.mxu0 %v4763_v39  ;;  %3779 = vmatprep.subr.mxu1 %v7027_v0 }
  0x24   :  { %3210 = vmatprep.subr.mxu0 %v4770_v40  ;;  %3780 = vmatpush3.msra.mxu1 %v4775_v41 }
  0x25   :  { %3211 = vmatpush3.msra.mxu0 %v4782_v42  ;;  %3781 = vmatprep.subr.mxu1 %v7027_v0 }
  0x26   :  { %3212 = vmatprep.subr.mxu0 %v4789_v43  ;;  %3782 = vmatpush3.msra.mxu1 %v4794_v44 }
  0x27   :  { %3213 = vmatpush3.msra.mxu0 %v4801_v45  ;;  %3783 = vmatprep.subr.mxu1 %v7027_v0 }
  0x28   :  { %3214 = vmatprep.subr.mxu0 %v4808_v46  ;;  %3784 = vmatpush3.msra.mxu1 %v4813_v47 }
  0x29   :  { %3215 = vmatpush3.msra.mxu0 %v4820_v48  ;;  %3786 = vmatmul.mubr.f32.vlgmr.msra.gmra.mxu1 %v4830_v50 }
  0x2a   :  { %3788 = vmatprep.subr.mxu1 %v7027_v0  ;;  %171 = vmatmul.mubr.f32.vlgmr.msra.gmra.mxu0 %v55_v51  ;;  %v1137_v51 = vld [vmem:[%s7086_s23 + $0x80] sm:$0xff] }
  0x2b   :  { %3236 = vmatprep.subr.mxu0 %v4525_v1  ;;  %3789 = vmatpush3.msra.mxu1 %v4530_v2 }
  0x2c   :  { %3237 = vmatpush3.msra.mxu0 %v4535_v3  ;;  %3790 = vmatprep.subr.mxu1 %v7027_v0 }
  0x2d   :  { %3238 = vmatprep.subr.mxu0 %v4544_v4  ;;  %3791 = vmatpush3.msra.mxu1 %v4549_v5 }
  0x2e   :  { %3239 = vmatpush3.msra.mxu0 %v4554_v6  ;;  %3792 = vmatprep.subr.mxu1 %v7027_v0 }
  0x2f   :  { %3240 = vmatprep.subr.mxu0 %v4561_v7  ;;  %3793 = vmatpush3.msra.mxu1 %v4566_v8 }
  0x30   :  { %3241 = vmatpush3.msra.mxu0 %v4573_v9  ;;  %3794 = vmatprep.subr.mxu1 %v7027_v0 }
  0x31   :  { %3242 = vmatprep.subr.mxu0 %v4580_v10  ;;  %3795 = vmatpush3.msra.mxu1 %v4585_v11 }
  0x32   :  { %3243 = vmatpush3.msra.mxu0 %v4592_v12  ;;  %3796 = vmatprep.subr.mxu1 %v7027_v0 }
  0x33   :  { %3244 = vmatprep.subr.mxu0 %v4599_v13  ;;  %3797 = vmatpush3.msra.mxu1 %v4604_v14 }
  0x34   :  { %3245 = vmatpush3.msra.mxu0 %v4611_v15  ;;  %3798 = vmatprep.subr.mxu1 %v7027_v0 }
  0x35   :  { %3246 = vmatprep.subr.mxu0 %v4618_v16  ;;  %3799 = vmatpush3.msra.mxu1 %v4623_v17 }
  0x36   :  { %3247 = vmatpush3.msra.mxu0 %v4630_v18  ;;  %3800 = vmatprep.subr.mxu1 %v7027_v0 }
  0x37   :  { %3248 = vmatprep.subr.mxu0 %v4637_v19  ;;  %3801 = vmatpush3.msra.mxu1 %v4642_v20 }
  0x38   :  { %3249 = vmatpush3.msra.mxu0 %v4649_v21  ;;  %3802 = vmatprep.subr.mxu1 %v7027_v0 }
  0x39   :  { %3250 = vmatprep.subr.mxu0 %v4656_v22  ;;  %3803 = vmatpush3.msra.mxu1 %v4661_v23 }
  0x3a   :  { %3251 = vmatpush3.msra.mxu0 %v4668_v24  ;;  %3804 = vmatprep.subr.mxu1 %v7027_v0 }
  0x3b   :  { %3252 = vmatprep.subr.mxu0 %v4675_v25  ;;  %3805 = vmatpush3.msra.mxu1 %v4680_v26 }
  0x3c   :  { %3253 = vmatpush3.msra.mxu0 %v4687_v27  ;;  %3806 = vmatprep.subr.mxu1 %v7027_v0 }
  0x3d   :  { %3254 = vmatprep.subr.mxu0 %v4694_v28  ;;  %3807 = vmatpush3.msra.mxu1 %v4699_v29 }
  0x3e   :  { %3255 = vmatpush3.msra.mxu0 %v4706_v30  ;;  %3808 = vmatprep.subr.mxu1 %v7027_v0 }
  0x3f   :  { %3256 = vmatprep.subr.mxu0 %v4713_v31  ;;  %3809 = vmatpush3.msra.mxu1 %v4718_v32 }
  0x40   :  { %3257 = vmatpush3.msra.mxu0 %v4725_v33  ;;  %3810 = vmatprep.subr.mxu1 %v7027_v0 }
  0x41   :  { %3258 = vmatprep.subr.mxu0 %v4732_v34  ;;  %3811 = vmatpush3.msra.mxu1 %v4737_v35 }
  0x42   :  { %3259 = vmatpush3.msra.mxu0 %v4744_v36  ;;  %3812 = vmatprep.subr.mxu1 %v7027_v0 }
  0x43   :  { %3260 = vmatprep.subr.mxu0 %v4751_v37  ;;  %3813 = vmatpush3.msra.mxu1 %v4756_v38 }
  0x44   :  { %3261 = vmatpush3.msra.mxu0 %v4763_v39  ;;  %3814 = vmatprep.subr.mxu1 %v7027_v0 }
  0x45   :  { %3262 = vmatprep.subr.mxu0 %v4770_v40  ;;  %3815 = vmatpush3.msra.mxu1 %v4775_v41 }
  0x46   :  { %3263 = vmatpush3.msra.mxu0 %v4782_v42  ;;  %3816 = vmatprep.subr.mxu1 %v7027_v0 }
  0x47   :  { %3264 = vmatprep.subr.mxu0 %v4789_v43  ;;  %3817 = vmatpush3.msra.mxu1 %v4794_v44 }
  0x48   :  { %3265 = vmatpush3.msra.mxu0 %v4801_v45  ;;  %3818 = vmatprep.subr.mxu1 %v7027_v0 }
  0x49   :  { %3266 = vmatprep.subr.mxu0 %v4808_v46  ;;  %3819 = vmatpush3.msra.mxu1 %v4813_v47 }
  0x4a   :  { %3820 = vmatprep.mubr.msk.f32.mxu1 %vm4435_vm0, %v7027_v0  ;;  %3267 = vmatpush3.msra.mxu0 %v4820_v48 }
  0x4b   :  { %313 = vmatprep.mubr.f32.mxu0 %v247_v52  ;;  %3821 = vmatmul.mubr.f32.vlgmr.msra.gmra.mxu1 %v4907_v53 }
  0x4c   :  { %3823 = vmatprep.subr.mxu1 %v7027_v0  ;;  %314 = vmatmul.mubr.f32.vlgmr.msra.gmra.mxu0 %v4830_v50  ;;  %v4431_v50 = vld [vmem:[%s7086_s23 + $0x110] sm:$0xff] }
  0x4d   :  { %3288 = vmatprep.subr.mxu0 %v4525_v1  ;;  %3824 = vmatpush3.msra.mxu1 %v4530_v2 }
  0x4e   :  { %3289 = vmatpush3.msra.mxu0 %v4535_v3  ;;  %3825 = vmatprep.subr.mxu1 %v7027_v0 }
  0x4f   :  { %3290 = vmatprep.subr.mxu0 %v4544_v4  ;;  %3826 = vmatpush3.msra.mxu1 %v4549_v5 }
  0x50   :  { %3291 = vmatpush3.msra.mxu0 %v4554_v6  ;;  %3827 = vmatprep.subr.mxu1 %v7027_v0 }
  0x51   :  { %3292 = vmatprep.subr.mxu0 %v4561_v7  ;;  %3828 = vmatpush3.msra.mxu1 %v4566_v8 }
  0x52   :  { %3293 = vmatpush3.msra.mxu0 %v4573_v9  ;;  %3829 = vmatprep.subr.mxu1 %v7027_v0 }
  0x53   :  { %3294 = vmatprep.subr.mxu0 %v4580_v10  ;;  %3830 = vmatpush3.msra.mxu1 %v4585_v11 }
  0x54   :  { %3295 = vmatpush3.msra.mxu0 %v4592_v12  ;;  %3831 = vmatprep.subr.mxu1 %v7027_v0 }
  0x55   :  { %3296 = vmatprep.subr.mxu0 %v4599_v13  ;;  %3832 = vmatpush3.msra.mxu1 %v4604_v14 }
  0x56   :  { %3297 = vmatpush3.msra.mxu0 %v4611_v15  ;;  %3833 = vmatprep.subr.mxu1 %v7027_v0 }
  0x57   :  { %3298 = vmatprep.subr.mxu0 %v4618_v16  ;;  %3834 = vmatpush3.msra.mxu1 %v4623_v17 }
  0x58   :  { %3299 = vmatpush3.msra.mxu0 %v4630_v18  ;;  %3835 = vmatprep.subr.mxu1 %v7027_v0 }
  0x59   :  { %3300 = vmatprep.subr.mxu0 %v4637_v19  ;;  %3836 = vmatpush3.msra.mxu1 %v4642_v20 }
  0x5a   :  { %3301 = vmatpush3.msra.mxu0 %v4649_v21  ;;  %3837 = vmatprep.subr.mxu1 %v7027_v0 }
  0x5b   :  { %3302 = vmatprep.subr.mxu0 %v4656_v22  ;;  %3838 = vmatpush3.msra.mxu1 %v4661_v23 }
  0x5c   :  { %3303 = vmatpush3.msra.mxu0 %v4668_v24  ;;  %3839 = vmatprep.subr.mxu1 %v7027_v0 }
  0x5d   :  { %3304 = vmatprep.subr.mxu0 %v4675_v25  ;;  %3840 = vmatpush3.msra.mxu1 %v4680_v26 }
  0x5e   :  { %3305 = vmatpush3.msra.mxu0 %v4687_v27  ;;  %3841 = vmatprep.subr.mxu1 %v7027_v0 }
  0x5f   :  { %3306 = vmatprep.subr.mxu0 %v4694_v28  ;;  %3842 = vmatpush3.msra.mxu1 %v4699_v29 }
  0x60   :  { %3307 = vmatpush3.msra.mxu0 %v4706_v30  ;;  %3843 = vmatprep.subr.mxu1 %v7027_v0 }
  0x61   :  { %3308 = vmatprep.subr.mxu0 %v4713_v31  ;;  %3844 = vmatpush3.msra.mxu1 %v4718_v32 }
  0x62   :  { %3309 = vmatpush3.msra.mxu0 %v4725_v33  ;;  %3845 = vmatprep.subr.mxu1 %v7027_v0 }
  0x63   :  { %3310 = vmatprep.subr.mxu0 %v4732_v34  ;;  %3846 = vmatpush3.msra.mxu1 %v4737_v35 }
  0x64   :  { %3311 = vmatpush3.msra.mxu0 %v4744_v36  ;;  %3847 = vmatprep.subr.mxu1 %v7027_v0 }
  0x65   :  { %3312 = vmatprep.subr.mxu0 %v4751_v37  ;;  %3848 = vmatpush3.msra.mxu1 %v4756_v38 }
  0x66   :  { %3313 = vmatpush3.msra.mxu0 %v4763_v39  ;;  %3849 = vmatprep.subr.mxu1 %v7027_v0 }
  0x67   :  { %3314 = vmatprep.subr.mxu0 %v4770_v40  ;;  %3850 = vmatpush3.msra.mxu1 %v4775_v41 }
  0x68   :  { %3315 = vmatpush3.msra.mxu0 %v4782_v42  ;;  %3851 = vmatprep.subr.mxu1 %v7027_v0 }
  0x69   :  { %3316 = vmatprep.subr.mxu0 %v4789_v43  ;;  %3852 = vmatpush3.msra.mxu1 %v4794_v44 }
  0x6a   :  { %3317 = vmatpush3.msra.mxu0 %v4801_v45  ;;  %3853 = vmatprep.subr.mxu1 %v7027_v0 }
  0x6b   :  { %3318 = vmatprep.subr.mxu0 %v4808_v46  ;;  %3854 = vmatpush3.msra.mxu1 %v4813_v47 }
  0x6c   :  { %3855 = vmatprep.mubr.msk.f32.mxu1 %vm4435_vm0, %v7027_v0  ;;  %3319 = vmatpush3.msra.mxu0 %v4820_v48 }
  0x6d   :  { %465 = vmatprep.mubr.f32.mxu0 %v399_v54  ;;  %3856 = vmatmul.mubr.f32.vlgmr.msra.gmra.mxu1 %v4983_v55  ;;  %v1121_v54 = vld [vmem:[%s7086_s23] sm:$0xff] }
  0x6e   :  { %3858 = vmatprep.subr.mxu1 %v7027_v0  ;;  %466 = vmatmul.mubr.f32.vlgmr.msra.gmra.mxu0 %v4907_v53 }
  0x6f   :  { %3340 = vmatprep.subr.mxu0 %v4525_v1  ;;  %3859 = vmatpush3.msra.mxu1 %v4530_v2 }
  0x70   :  { %3341 = vmatpush3.msra.mxu0 %v4535_v3  ;;  %3860 = vmatprep.subr.mxu1 %v7027_v0 }
  0x71   :  { %3342 = vmatprep.subr.mxu0 %v4544_v4  ;;  %3861 = vmatpush3.msra.mxu1 %v4549_v5 }
  0x72   :  { %3343 = vmatpush3.msra.mxu0 %v4554_v6  ;;  %3862 = vmatprep.subr.mxu1 %v7027_v0 }
  0x73   :  { %3344 = vmatprep.subr.mxu0 %v4561_v7  ;;  %3863 = vmatpush3.msra.mxu1 %v4566_v8 }
  0x74   :  { %3345 = vmatpush3.msra.mxu0 %v4573_v9  ;;  %3864 = vmatprep.subr.mxu1 %v7027_v0 }
  0x75   :  { %3346 = vmatprep.subr.mxu0 %v4580_v10  ;;  %3865 = vmatpush3.msra.mxu1 %v4585_v11 }
  0x76   :  { %3347 = vmatpush3.msra.mxu0 %v4592_v12  ;;  %3866 = vmatprep.subr.mxu1 %v7027_v0 }
  0x77   :  { %3348 = vmatprep.subr.mxu0 %v4599_v13  ;;  %3867 = vmatpush3.msra.mxu1 %v4604_v14 }
  0x78   :  { %3349 = vmatpush3.msra.mxu0 %v4611_v15  ;;  %3868 = vmatprep.subr.mxu1 %v7027_v0 }
  0x79   :  { %3350 = vmatprep.subr.mxu0 %v4618_v16  ;;  %3869 = vmatpush3.msra.mxu1 %v4623_v17 }
  0x7a   :  { %3351 = vmatpush3.msra.mxu0 %v4630_v18  ;;  %3870 = vmatprep.subr.mxu1 %v7027_v0 }
  0x7b   :  { %3352 = vmatprep.subr.mxu0 %v4637_v19  ;;  %3871 = vmatpush3.msra.mxu1 %v4642_v20 }
  0x7c   :  { %3353 = vmatpush3.msra.mxu0 %v4649_v21  ;;  %3872 = vmatprep.subr.mxu1 %v7027_v0 }
  0x7d   :  { %3354 = vmatprep.subr.mxu0 %v4656_v22  ;;  %3873 = vmatpush3.msra.mxu1 %v4661_v23 }
  0x7e   :  { %3355 = vmatpush3.msra.mxu0 %v4668_v24  ;;  %3874 = vmatprep.subr.mxu1 %v7027_v0 }
  0x7f   :  { %3356 = vmatprep.subr.mxu0 %v4675_v25  ;;  %3875 = vmatpush3.msra.mxu1 %v4680_v26 }
  0x80   :  { %3357 = vmatpush3.msra.mxu0 %v4687_v27  ;;  %3876 = vmatprep.subr.mxu1 %v7027_v0 }
  0x81   :  { %3358 = vmatprep.subr.mxu0 %v4694_v28  ;;  %3877 = vmatpush3.msra.mxu1 %v4699_v29 }
  0x82   :  { %3359 = vmatpush3.msra.mxu0 %v4706_v30  ;;  %3878 = vmatprep.subr.mxu1 %v7027_v0 }
  0x83   :  { %3360 = vmatprep.subr.mxu0 %v4713_v31  ;;  %3879 = vmatpush3.msra.mxu1 %v4718_v32 }
  0x84   :  { %3361 = vmatpush3.msra.mxu0 %v4725_v33  ;;  %3880 = vmatprep.subr.mxu1 %v7027_v0 }
  0x85   :  { %3362 = vmatprep.subr.mxu0 %v4732_v34  ;;  %3881 = vmatpush3.msra.mxu1 %v4737_v35 }
  0x86   :  { %3363 = vmatpush3.msra.mxu0 %v4744_v36  ;;  %3882 = vmatprep.subr.mxu1 %v7027_v0 }
  0x87   :  { %3364 = vmatprep.subr.mxu0 %v4751_v37  ;;  %3883 = vmatpush3.msra.mxu1 %v4756_v38 }
  0x88   :  { %3365 = vmatpush3.msra.mxu0 %v4763_v39  ;;  %3884 = vmatprep.subr.mxu1 %v7027_v0 }
  0x89   :  { %3366 = vmatprep.subr.mxu0 %v4770_v40  ;;  %3885 = vmatpush3.msra.mxu1 %v4775_v41 }
  0x8a   :  { %3367 = vmatpush3.msra.mxu0 %v4782_v42  ;;  %3886 = vmatprep.subr.mxu1 %v7027_v0 }
  0x8b   :  { %3368 = vmatprep.subr.mxu0 %v4789_v43  ;;  %3887 = vmatpush3.msra.mxu1 %v4794_v44 }
  0x8c   :  { %3369 = vmatpush3.msra.mxu0 %v4801_v45  ;;  %3888 = vmatprep.subr.mxu1 %v7027_v0 }
  0x8d   :  { %3370 = vmatprep.subr.mxu0 %v4808_v46  ;;  %3889 = vmatpush3.msra.mxu1 %v4813_v47 }
  0x8e   :  { %3890 = vmatprep.mubr.msk.f32.mxu1 %vm4435_vm0, %v7027_v0  ;;  %3371 = vmatpush3.msra.mxu0 %v4820_v48 }
  0x8f   :  { %608 = vmatprep.mubr.f32.mxu0 %v542_v56  ;;  %3891 = vmatmul.mubr.f32.vlgmr.msra.gmra.mxu1 %v5059_v57  ;;  %v4432_v56 = vld [vmem:[%s7086_s23 + $0x108] sm:$0xff] }
  0x90   :  { %3893 = vmatprep.subr.mxu1 %v7027_v0  ;;  %609 = vmatmul.mubr.f32.vlgmr.msra.gmra.mxu0 %v4983_v55  ;;  %v1120_v55 = vld [vmem:[%s7010_s0 + $0x78] sm:$0xff] }
  0x91   :  { %3392 = vmatprep.subr.mxu0 %v4525_v1  ;;  %3894 = vmatpush3.msra.mxu1 %v4530_v2 }
  0x92   :  { %3393 = vmatpush3.msra.mxu0 %v4535_v3  ;;  %3895 = vmatprep.subr.mxu1 %v7027_v0 }
  0x93   :  { %3394 = vmatprep.subr.mxu0 %v4544_v4  ;;  %3896 = vmatpush3.msra.mxu1 %v4549_v5 }
  0x94   :  { %3395 = vmatpush3.msra.mxu0 %v4554_v6  ;;  %3897 = vmatprep.subr.mxu1 %v7027_v0 }
  0x95   :  { %3396 = vmatprep.subr.mxu0 %v4561_v7  ;;  %3898 = vmatpush3.msra.mxu1 %v4566_v8 }
  0x96   :  { %3397 = vmatpush3.msra.mxu0 %v4573_v9  ;;  %3899 = vmatprep.subr.mxu1 %v7027_v0 }
  0x97   :  { %3398 = vmatprep.subr.mxu0 %v4580_v10  ;;  %3900 = vmatpush3.msra.mxu1 %v4585_v11 }
  0x98   :  { %3399 = vmatpush3.msra.mxu0 %v4592_v12  ;;  %3901 = vmatprep.subr.mxu1 %v7027_v0 }
  0x99   :  { %3400 = vmatprep.subr.mxu0 %v4599_v13  ;;  %3902 = vmatpush3.msra.mxu1 %v4604_v14 }
  0x9a   :  { %3401 = vmatpush3.msra.mxu0 %v4611_v15  ;;  %3903 = vmatprep.subr.mxu1 %v7027_v0 }
  0x9b   :  { %3402 = vmatprep.subr.mxu0 %v4618_v16  ;;  %3904 = vmatpush3.msra.mxu1 %v4623_v17 }
  0x9c   :  { %3403 = vmatpush3.msra.mxu0 %v4630_v18  ;;  %3905 = vmatprep.subr.mxu1 %v7027_v0 }
  0x9d   :  { %3404 = vmatprep.subr.mxu0 %v4637_v19  ;;  %3906 = vmatpush3.msra.mxu1 %v4642_v20 }
  0x9e   :  { %3405 = vmatpush3.msra.mxu0 %v4649_v21  ;;  %3907 = vmatprep.subr.mxu1 %v7027_v0 }
  0x9f   :  { %3406 = vmatprep.subr.mxu0 %v4656_v22  ;;  %3908 = vmatpush3.msra.mxu1 %v4661_v23 }
  0xa0   :  { %3407 = vmatpush3.msra.mxu0 %v4668_v24  ;;  %3909 = vmatprep.subr.mxu1 %v7027_v0 }
  0xa1   :  { %3408 = vmatprep.subr.mxu0 %v4675_v25  ;;  %3910 = vmatpush3.msra.mxu1 %v4680_v26 }
  0xa2   :  { %3409 = vmatpush3.msra.mxu0 %v4687_v27  ;;  %3911 = vmatprep.subr.mxu1 %v7027_v0 }
  0xa3   :  { %3410 = vmatprep.subr.mxu0 %v4694_v28  ;;  %3912 = vmatpush3.msra.mxu1 %v4699_v29 }
  0xa4   :  { %3411 = vmatpush3.msra.mxu0 %v4706_v30  ;;  %3913 = vmatprep.subr.mxu1 %v7027_v0 }
  0xa5   :  { %3412 = vmatprep.subr.mxu0 %v4713_v31  ;;  %3914 = vmatpush3.msra.mxu1 %v4718_v32 }
  0xa6   :  { %3413 = vmatpush3.msra.mxu0 %v4725_v33  ;;  %3915 = vmatprep.subr.mxu1 %v7027_v0 }
  0xa7   :  { %3414 = vmatprep.subr.mxu0 %v4732_v34  ;;  %3916 = vmatpush3.msra.mxu1 %v4737_v35 }
  0xa8   :  { %3415 = vmatpush3.msra.mxu0 %v4744_v36  ;;  %3917 = vmatprep.subr.mxu1 %v7027_v0 }
  0xa9   :  { %3416 = vmatprep.subr.mxu0 %v4751_v37  ;;  %3918 = vmatpush3.msra.mxu1 %v4756_v38 }
  0xaa   :  { %3417 = vmatpush3.msra.mxu0 %v4763_v39  ;;  %3919 = vmatprep.subr.mxu1 %v7027_v0 }
  0xab   :  { %3418 = vmatprep.subr.mxu0 %v4770_v40  ;;  %3920 = vmatpush3.msra.mxu1 %v4775_v41 }
  0xac   :  { %3419 = vmatpush3.msra.mxu0 %v4782_v42  ;;  %3921 = vmatprep.subr.mxu1 %v7027_v0 }
  0xad   :  { %3420 = vmatprep.subr.mxu0 %v4789_v43  ;;  %3922 = vmatpush3.msra.mxu1 %v4794_v44 }
  0xae   :  { %3421 = vmatpush3.msra.mxu0 %v4801_v45  ;;  %3923 = vmatprep.subr.mxu1 %v7027_v0 }
  0xaf   :  { %3422 = vmatprep.subr.mxu0 %v4808_v46  ;;  %3924 = vmatpush3.msra.mxu1 %v4813_v47 }
  0xb0   :  { %3925 = vmatprep.mubr.msk.f32.mxu1 %vm4435_vm0, %v7027_v0  ;;  %3423 = vmatpush3.msra.mxu0 %v4820_v48 }
  0xb1   :  { %754 = vmatprep.mubr.f32.mxu0 %v688_v58  ;;  %3926 = vmatmul.mubr.f32.vlgmr.msra.gmra.mxu1 %v5135_v59  ;;  %v4433_v58 = vld [vmem:[%s7086_s23 + $0x100] sm:$0xff] }
  0xb2   :  { %3928 = vmatprep.subr.mxu1 %v7027_v0  ;;  %755 = vmatmul.mubr.f32.vlgmr.msra.gmra.mxu0 %v5059_v57 }
  0xb3   :  { %3444 = vmatprep.subr.mxu0 %v4525_v1  ;;  %3929 = vmatpush3.msra.mxu1 %v4530_v2 }
  0xb4   :  { %3445 = vmatpush3.msra.mxu0 %v4535_v3  ;;  %3930 = vmatprep.subr.mxu1 %v7027_v0 }
  0xb5   :  { %3446 = vmatprep.subr.mxu0 %v4544_v4  ;;  %3931 = vmatpush3.msra.mxu1 %v4549_v5 }
  0xb6   :  { %3447 = vmatpush3.msra.mxu0 %v4554_v6  ;;  %3932 = vmatprep.subr.mxu1 %v7027_v0 }
  0xb7   :  { %3448 = vmatprep.subr.mxu0 %v4561_v7  ;;  %3933 = vmatpush3.msra.mxu1 %v4566_v8 }
  0xb8   :  { %3449 = vmatpush3.msra.mxu0 %v4573_v9  ;;  %3934 = vmatprep.subr.mxu1 %v7027_v0 }
  0xb9   :  { %3450 = vmatprep.subr.mxu0 %v4580_v10  ;;  %3935 = vmatpush3.msra.mxu1 %v4585_v11 }
  0xba   :  { %3451 = vmatpush3.msra.mxu0 %v4592_v12  ;;  %3936 = vmatprep.subr.mxu1 %v7027_v0 }
  0xbb   :  { %3452 = vmatprep.subr.mxu0 %v4599_v13  ;;  %3937 = vmatpush3.msra.mxu1 %v4604_v14 }
  0xbc   :  { %3453 = vmatpush3.msra.mxu0 %v4611_v15  ;;  %3938 = vmatprep.subr.mxu1 %v7027_v0 }
  0xbd   :  { %3454 = vmatprep.subr.mxu0 %v4618_v16  ;;  %3939 = vmatpush3.msra.mxu1 %v4623_v17 }
  0xbe   :  { %3455 = vmatpush3.msra.mxu0 %v4630_v18  ;;  %3940 = vmatprep.subr.mxu1 %v7027_v0 }
  0xbf   :  { %3456 = vmatprep.subr.mxu0 %v4637_v19  ;;  %3941 = vmatpush3.msra.mxu1 %v4642_v20 }
  0xc0   :  { %3457 = vmatpush3.msra.mxu0 %v4649_v21  ;;  %3942 = vmatprep.subr.mxu1 %v7027_v0 }
  0xc1   :  { %3458 = vmatprep.subr.mxu0 %v4656_v22  ;;  %3943 = vmatpush3.msra.mxu1 %v4661_v23 }
  0xc2   :  { %3459 = vmatpush3.msra.mxu0 %v4668_v24  ;;  %3944 = vmatprep.subr.mxu1 %v7027_v0 }
  0xc3   :  { %3460 = vmatprep.subr.mxu0 %v4675_v25  ;;  %3945 = vmatpush3.msra.mxu1 %v4680_v26 }
  0xc4   :  { %3461 = vmatpush3.msra.mxu0 %v4687_v27  ;;  %3946 = vmatprep.subr.mxu1 %v7027_v0 }
  0xc5   :  { %3462 = vmatprep.subr.mxu0 %v4694_v28  ;;  %3947 = vmatpush3.msra.mxu1 %v4699_v29 }
  0xc6   :  { %3463 = vmatpush3.msra.mxu0 %v4706_v30  ;;  %3948 = vmatprep.subr.mxu1 %v7027_v0 }
  0xc7   :  { %3464 = vmatprep.subr.mxu0 %v4713_v31  ;;  %3949 = vmatpush3.msra.mxu1 %v4718_v32 }
  0xc8   :  { %3465 = vmatpush3.msra.mxu0 %v4725_v33  ;;  %3950 = vmatprep.subr.mxu1 %v7027_v0 }
  0xc9   :  { %3466 = vmatprep.subr.mxu0 %v4732_v34  ;;  %3951 = vmatpush3.msra.mxu1 %v4737_v35 }
  0xca   :  { %3467 = vmatpush3.msra.mxu0 %v4744_v36  ;;  %3952 = vmatprep.subr.mxu1 %v7027_v0 }
  0xcb   :  { %3468 = vmatprep.subr.mxu0 %v4751_v37  ;;  %3953 = vmatpush3.msra.mxu1 %v4756_v38 }
  0xcc   :  { %3469 = vmatpush3.msra.mxu0 %v4763_v39  ;;  %3954 = vmatprep.subr.mxu1 %v7027_v0 }
  0xcd   :  { %3470 = vmatprep.subr.mxu0 %v4770_v40  ;;  %3955 = vmatpush3.msra.mxu1 %v4775_v41 }
  0xce   :  { %3471 = vmatpush3.msra.mxu0 %v4782_v42  ;;  %3956 = vmatprep.subr.mxu1 %v7027_v0 }
  0xcf   :  { %3472 = vmatprep.subr.mxu0 %v4789_v43  ;;  %3957 = vmatpush3.msra.mxu1 %v4794_v44 }
  0xd0   :  { %3473 = vmatpush3.msra.mxu0 %v4801_v45  ;;  %3958 = vmatprep.subr.mxu1 %v7027_v0 }
  0xd1   :  { %3474 = vmatprep.subr.mxu0 %v4808_v46  ;;  %3959 = vmatpush3.msra.mxu1 %v4813_v47 }
  0xd2   :  { %3960 = vmatprep.mubr.msk.f32.mxu1 %vm4435_vm0, %v7027_v0  ;;  %3475 = vmatpush3.msra.mxu0 %v4820_v48 }
  0xd3   :  { %897 = vmatprep.mubr.f32.mxu0 %v831_v60  ;;  %3961 = vmatmul.mubr.f32.vlgmr.msra.gmra.mxu1 %v5211_v61  ;;  %v5480_v60 = vld [vmem:[%s7011_s4 + $0xf0] sm:$0xff] }
  0xd4   :  { %3963 = vmatprep.subr.mxu1 %v7027_v0  ;;  %898 = vmatmul.mubr.f32.vlgmr.msra.gmra.mxu0 %v5135_v59  ;;  %v5472_v59 = vld [vmem:[%s7011_s4 + $0xf8] sm:$0xff] }
  0xd5   :  { %3496 = vmatprep.subr.mxu0 %v4525_v1  ;;  %3964 = vmatpush3.msra.mxu1 %v4530_v2  ;;  %v977_v1 = vld [vmem:[%s7010_s0 + $0x68] sm:$0xff]  ;;  %v5289_v2 = vld [vmem:[%s7010_s0 + $0x70] sm:$0xff] }
  0xd6   :  { %3497 = vmatpush3.msra.mxu0 %v4535_v3  ;;  %3965 = vmatprep.subr.mxu1 %v7027_v0  ;;  %v1152_v3 = vld [vmem:[%s7086_s23 + $0xf8] sm:$0xff] }
  0xd7   :  { %3498 = vmatprep.subr.mxu0 %v4544_v4  ;;  %3966 = vmatpush3.msra.mxu1 %v4549_v5  ;;  %v1136_v4 = vld [vmem:[%s7086_s23 + $0x78] sm:$0xff]  ;;  %v1151_v5 = vld [vmem:[%s7086_s23 + $0xf0] sm:$0xff] }
  0xd8   :  { %3499 = vmatpush3.msra.mxu0 %v4554_v6  ;;  %3967 = vmatprep.subr.mxu1 %v7027_v0  ;;  %v1135_v6 = vld [vmem:[%s7086_s23 + $0x70] sm:$0xff] }
  0xd9   :  { %3500 = vmatprep.subr.mxu0 %v4561_v7  ;;  %3968 = vmatpush3.msra.mxu1 %v4566_v8  ;;  %v4418_v7 = vld [vmem:[%s7086_s23 + $0x178] sm:$0xff]  ;;  %v1150_v8 = vld [vmem:[%s7086_s23 + $0xe8] sm:$0xff] }
  0xda   :  { %3501 = vmatpush3.msra.mxu0 %v4573_v9  ;;  %3969 = vmatprep.subr.mxu1 %v7027_v0  ;;  %v1134_v9 = vld [vmem:[%s7086_s23 + $0x68] sm:$0xff] }
  0xdb   :  { %3502 = vmatprep.subr.mxu0 %v4580_v10  ;;  %3970 = vmatpush3.msra.mxu1 %v4585_v11  ;;  %v4419_v10 = vld [vmem:[%s7086_s23 + $0x170] sm:$0xff]  ;;  %v1149_v11 = vld [vmem:[%s7086_s23 + $0xe0] sm:$0xff] }
  0xdc   :  { %3503 = vmatpush3.msra.mxu0 %v4592_v12  ;;  %3971 = vmatprep.subr.mxu1 %v7027_v0  ;;  %v1133_v12 = vld [vmem:[%s7086_s23 + $0x60] sm:$0xff] }
  0xdd   :  { %3504 = vmatprep.subr.mxu0 %v4599_v13  ;;  %3972 = vmatpush3.msra.mxu1 %v4604_v14  ;;  %v4420_v13 = vld [vmem:[%s7086_s23 + $0x168] sm:$0xff]  ;;  %v1148_v14 = vld [vmem:[%s7086_s23 + $0xd8] sm:$0xff] }
  0xde   :  { %3505 = vmatpush3.msra.mxu0 %v4611_v15  ;;  %3973 = vmatprep.subr.mxu1 %v7027_v0  ;;  %v1132_v15 = vld [vmem:[%s7086_s23 + $0x58] sm:$0xff] }
  0xdf   :  { %3506 = vmatprep.subr.mxu0 %v4618_v16  ;;  %3974 = vmatpush3.msra.mxu1 %v4623_v17  ;;  %v4421_v16 = vld [vmem:[%s7086_s23 + $0x160] sm:$0xff]  ;;  %v1147_v17 = vld [vmem:[%s7086_s23 + $0xd0] sm:$0xff] }
  0xe0   :  { %3507 = vmatpush3.msra.mxu0 %v4630_v18  ;;  %3975 = vmatprep.subr.mxu1 %v7027_v0  ;;  %v1131_v18 = vld [vmem:[%s7086_s23 + $0x50] sm:$0xff] }
  0xe1   :  { %3508 = vmatprep.subr.mxu0 %v4637_v19  ;;  %3976 = vmatpush3.msra.mxu1 %v4642_v20  ;;  %v4422_v19 = vld [vmem:[%s7086_s23 + $0x158] sm:$0xff]  ;;  %v1146_v20 = vld [vmem:[%s7086_s23 + $0xc8] sm:$0xff] }
  0xe2   :  { %3509 = vmatpush3.msra.mxu0 %v4649_v21  ;;  %3977 = vmatprep.subr.mxu1 %v7027_v0  ;;  %v1130_v21 = vld [vmem:[%s7086_s23 + $0x48] sm:$0xff] }
  0xe3   :  { %3510 = vmatprep.subr.mxu0 %v4656_v22  ;;  %3978 = vmatpush3.msra.mxu1 %v4661_v23  ;;  %v4423_v22 = vld [vmem:[%s7086_s23 + $0x150] sm:$0xff]  ;;  %v1145_v23 = vld [vmem:[%s7086_s23 + $0xc0] sm:$0xff] }
  0xe4   :  { %3511 = vmatpush3.msra.mxu0 %v4668_v24  ;;  %3979 = vmatprep.subr.mxu1 %v7027_v0  ;;  %v1129_v24 = vld [vmem:[%s7086_s23 + $0x40] sm:$0xff] }
  0xe5   :  { %3512 = vmatprep.subr.mxu0 %v4675_v25  ;;  %3980 = vmatpush3.msra.mxu1 %v4680_v26  ;;  %v4424_v25 = vld [vmem:[%s7086_s23 + $0x148] sm:$0xff]  ;;  %v1144_v26 = vld [vmem:[%s7086_s23 + $0xb8] sm:$0xff] }
  0xe6   :  { %3513 = vmatpush3.msra.mxu0 %v4687_v27  ;;  %3981 = vmatprep.subr.mxu1 %v7027_v0  ;;  %v1128_v27 = vld [vmem:[%s7086_s23 + $0x38] sm:$0xff] }
  0xe7   :  { %3514 = vmatprep.subr.mxu0 %v4694_v28  ;;  %3982 = vmatpush3.msra.mxu1 %v4699_v29  ;;  %v4425_v28 = vld [vmem:[%s7086_s23 + $0x140] sm:$0xff]  ;;  %v1143_v29 = vld [vmem:[%s7086_s23 + $0xb0] sm:$0xff] }
  0xe8   :  { %3515 = vmatpush3.msra.mxu0 %v4706_v30  ;;  %3983 = vmatprep.subr.mxu1 %v7027_v0  ;;  %v1127_v30 = vld [vmem:[%s7086_s23 + $0x30] sm:$0xff] }
  0xe9   :  { %3516 = vmatprep.subr.mxu0 %v4713_v31  ;;  %3984 = vmatpush3.msra.mxu1 %v4718_v32  ;;  %v5263_v62 = vpop.f32.mrf.mxu1  ;;  %v4426_v31 = vld [vmem:[%s7086_s23 + $0x138] sm:$0xff]  ;;  %v1142_v32 = vld [vmem:[%s7086_s23 + $0xa8] sm:$0xff] }
  0xea   :  { %3517 = vmatpush3.msra.mxu0 %v4725_v33  ;;  %3985 = vmatprep.subr.mxu1 %v7027_v0  ;;  %v1126_v33 = vld [vmem:[%s7086_s23 + $0x28] sm:$0xff] }
  0xeb   :  { %3518 = vmatprep.subr.mxu0 %v4732_v34  ;;  %3986 = vmatpush3.msra.mxu1 %v4737_v35  ;;  %v3787_v63 = vpop.f32.mrf.mxu1  ;;  %v4427_v34 = vld [vmem:[%s7086_s23 + $0x130] sm:$0xff]  ;;  %v1141_v35 = vld [vmem:[%s7086_s23 + $0xa0] sm:$0xff] }
  0xec   :  { %3519 = vmatpush3.msra.mxu0 %v4744_v36  ;;  %3987 = vmatprep.subr.mxu1 %v7027_v0  ;;  %v1125_v36 = vld [vmem:[%s7086_s23 + $0x20] sm:$0xff]  ;;  %v5489_v63 = vld [vmem:[%s7011_s4 + $0x78] sm:$0xff] }
  0xed   :  { %3520 = vmatprep.subr.mxu0 %v4751_v37  ;;  %3988 = vmatpush3.msra.mxu1 %v4756_v38  ;;  %v4428_v37 = vld [vmem:[%s7086_s23 + $0x128] sm:$0xff]  ;;  %v1140_v38 = vld [vmem:[%s7086_s23 + $0x98] sm:$0xff] }
  0xee   :  { %3521 = vmatpush3.msra.mxu0 %v4763_v39  ;;  %3989 = vmatprep.subr.mxu1 %v7027_v0 }
  0xef   :  { %3522 = vmatprep.subr.mxu0 %v4770_v40  ;;  %3990 = vmatpush3.msra.mxu1 %v4775_v41  ;;  %v1124_v40 = vld [vmem:[%s7086_s23 + $0x18] sm:$0xff]  ;;  %v4429_v41 = vld [vmem:[%s7086_s23 + $0x120] sm:$0xff] }
  0xf0   :  { %3523 = vmatpush3.msra.mxu0 %v4782_v42  ;;  %3991 = vmatprep.subr.mxu1 %v7027_v0  ;;  %v1139_v42 = vld [vmem:[%s7086_s23 + $0x90] sm:$0xff] }
  0xf1   :  { %3524 = vmatprep.subr.mxu0 %v4789_v43  ;;  %3992 = vmatpush3.msra.mxu1 %v4794_v44  ;;  %v1123_v44 = vld [vmem:[%s7086_s23 + $0x10] sm:$0xff] }
  0xf2   :  { %3525 = vmatpush3.msra.mxu0 %v4801_v45  ;;  %3993 = vmatprep.subr.mxu1 %v7027_v0  ;;  %v1153_v45 = vld [vmem:[%s7010_s0] sm:$0xfc] }
  0xf3   :  { %3526 = vmatprep.subr.mxu0 %v4808_v46  ;;  %3994 = vmatpush3.msra.mxu1 %v4813_v47  ;;  %v1154_v46 = vld [vmem:[%s7010_s0 + $0x80] sm:$0x3]  ;;  %v4430_v47 = vld [vmem:[%s7086_s23 + $0x118] sm:$0xff]  ;;  %v1158_v52 = vrot.slane %v1153_v45, 2 }
  0xf4   :  { %3995 = vmatprep.mubr.msk.f32.mxu1 %vm4435_vm0, %v7027_v0  ;;  %3527 = vmatpush3.msra.mxu0 %v4820_v48  ;;  %v1138_v48 = vld [vmem:[%s7086_s23 + $0x88] sm:$0xff]  ;;  %v1159_v53 = vrot.slane %v1154_v46, 2  ;;  %v5734_v45 = vld [vmem:[%s7011_s4 + $0x160] sm:$0xff]  ;;  %v5742_v46 = vld [vmem:[%s7011_s4 + $0x158] sm:$0xff] }
  0xf5   :  { %1043 = vmatprep.mubr.f32.mxu0 %v977_v1  ;;  %3996 = vmatmul.mubr.f32.vlgmr.msra.gmra.mxu1 %v5289_v2  ;;  %v5495_v1 = vld [vmem:[%s7011_s4 + $0xe8] sm:$0xff] }
  0xf6   :  { %3565 = vmatprep.subr.mxu1 %v1152_v3  ;;  %1044 = vmatmul.mubr.f32.vlgmr.msra.gmra.mxu0 %v5211_v61  ;;  %v1160_v57 = vsel %vm1157_vm1, %v1158_v52, %v1159_v53  ;;  %v3216_v61 = vpop.f32.mrf.mxu0  ;;  %v5509_v3 = vld [vmem:[%s7011_s4 + $0xe0] sm:$0xff]  ;;  %v5784_v53 = vld [vmem:[%s7011_s4 + $0x128] sm:$0xff] }
  0xf7   :  { %3998 = vmatprep.subr.mxu0 %v7027_v0  ;;  %3566 = vmatpush3.msra.mxu1 %v1136_v4 }
  0xf8   :  { %3999 = vmatpush3.msra.mxu0 %v4418_v7  ;;  %3567 = vmatprep.subr.mxu1 %v1151_v5  ;;  %v3217_v4 = vpop.f32.mrf.mxu0  ;;  %v5516_v5 = vld [vmem:[%s7011_s4 + $0x68] sm:$0xff] }
  0xf9   :  { %4000 = vmatprep.subr.mxu0 %v7027_v0  ;;  %3568 = vmatpush3.msra.mxu1 %v1135_v6  ;;  %v5523_v6 = vld [vmem:[%s7011_s4 + $0xd8] sm:$0xff] }
  0xfa   :  { %4001 = vmatpush3.msra.mxu0 %v4419_v10  ;;  %3569 = vmatprep.subr.mxu1 %v1150_v8  ;;  %v5530_v8 = vld [vmem:[%s7011_s4 + $0x60] sm:$0xff]  ;;  %v5544_v10 = vld [vmem:[%s7011_s4 + $0x58] sm:$0xff] }
  0xfb   :  { %4002 = vmatprep.subr.mxu0 %v7027_v0  ;;  %3570 = vmatpush3.msra.mxu1 %v1134_v9  ;;  %v5537_v9 = vld [vmem:[%s7011_s4 + $0xd0] sm:$0xff] }
  0xfc   :  { %4003 = vmatpush3.msra.mxu0 %v4420_v13  ;;  %3571 = vmatprep.subr.mxu1 %v1149_v11  ;;  %v5551_v11 = vld [vmem:[%s7011_s4 + $0xc8] sm:$0xff]  ;;  %v5558_v13 = vld [vmem:[%s7011_s4 + $0x50] sm:$0xff] }
  0xfd   :  { %4004 = vmatprep.subr.mxu0 %v7027_v0  ;;  %3572 = vmatpush3.msra.mxu1 %v1133_v12 }
  0xfe   :  { %4005 = vmatpush3.msra.mxu0 %v4421_v16  ;;  %3573 = vmatprep.subr.mxu1 %v1148_v14  ;;  %v5565_v14 = vld [vmem:[%s7011_s4 + $0xc0] sm:$0xff] }
  0xff   :  { %4006 = vmatprep.subr.mxu0 %v7027_v0  ;;  %3574 = vmatpush3.msra.mxu1 %v1132_v15  ;;  %v5572_v15 = vld [vmem:[%s7011_s4 + $0x48] sm:$0xff] }
 0x100   :  { %4007 = vmatpush3.msra.mxu0 %v4422_v19  ;;  %3575 = vmatprep.subr.mxu1 %v1147_v17  ;;  %v5579_v17 = vld [vmem:[%s7011_s4 + $0xb8] sm:$0xff]  ;;  %v3218_v19 = vadd.f32 %v3217_v4, %v3216_v61  ;;  %v5805_v61 = vld [vmem:[%s7011_s4 + $0x110] sm:$0xff] }
 0x101   :  { %4008 = vmatprep.subr.mxu0 %v7027_v0  ;;  %3576 = vmatpush3.msra.mxu1 %v1131_v18  ;;  %v5586_v18 = vld [vmem:[%s7011_s4 + $0x40] sm:$0xff] }
 0x102   :  { %4009 = vmatpush3.msra.mxu0 %v4423_v22  ;;  %3577 = vmatprep.subr.mxu1 %v1146_v20  ;;  %v5593_v20 = vld [vmem:[%s7011_s4 + $0xb0] sm:$0xff] }
 0x103   :  { %4010 = vmatprep.subr.mxu0 %v7027_v0  ;;  %3578 = vmatpush3.msra.mxu1 %v1130_v21  ;;  %v5600_v21 = vld [vmem:[%s7011_s4 + $0x38] sm:$0xff] }
 0x104   :  { %4011 = vmatpush3.msra.mxu0 %v4424_v25  ;;  %3579 = vmatprep.subr.mxu1 %v1145_v23  ;;  %v5608_v23 = vld [vmem:[%s7011_s4 + $0xa8] sm:$0xff]  ;;  %v243_v25 = vadd.f32 %v3218_v19, %v5263_v62 }
 0x105   :  { %4012 = vmatprep.subr.mxu0 %v7027_v0  ;;  %3580 = vmatpush3.msra.mxu1 %v1129_v24  ;;  %v5615_v24 = vld [vmem:[%s7011_s4 + $0x30] sm:$0xff] }
 0x106   :  { %4013 = vmatpush3.msra.mxu0 %v4425_v28  ;;  %3581 = vmatprep.subr.mxu1 %v1144_v26  ;;  %v5623_v26 = vld [vmem:[%s7011_s4 + $0xa0] sm:$0xff]  ;;  %v5632_v28 = vld [vmem:[%s7011_s4 + $0x28] sm:$0xff] }
 0x107   :  { %4014 = vmatprep.subr.mxu0 %v7027_v0  ;;  %3582 = vmatpush3.msra.mxu1 %v1128_v27 }
 0x108   :  { %4015 = vmatpush3.msra.mxu0 %v4426_v31  ;;  %3583 = vmatprep.subr.mxu1 %v1143_v29  ;;  %v5639_v29 = vld [vmem:[%s7011_s4 + $0x98] sm:$0xff] }
 0x109   :  { %4016 = vmatprep.subr.mxu0 %v7027_v0  ;;  %3584 = vmatpush3.msra.mxu1 %v1127_v30  ;;  %v5645_v30 = vld [vmem:[%s7012_s3] ss:$0 sm:$0xff] }
 0x10a   :  { %4017 = vmatpush3.msra.mxu0 %v4427_v34  ;;  %3585 = vmatprep.subr.mxu1 %v1142_v32  ;;  %v5651_v32 = vld [vmem:[%s7011_s4 + $0x20] sm:$0xff]  ;;  %v5665_v34 = vld [vmem:[%s7011_s4 + $0x18] sm:$0xff] }
 0x10b   :  { %4018 = vmatprep.subr.mxu0 %v7027_v0  ;;  %3586 = vmatpush3.msra.mxu1 %v1126_v33  ;;  %v5416_v39 = vpop.f32.mrf.mxu1  ;;  %v5658_v33 = vld [vmem:[%s7011_s4 + $0x90] sm:$0xff] }
 0x10c   :  { %4019 = vmatpush3.msra.mxu0 %v4428_v37  ;;  %3587 = vmatprep.subr.mxu1 %v1141_v35  ;;  %v3268_v7 = vpop.f32.mrf.mxu0  ;;  %v5680_v37 = vld [vmem:[%s7011_s4 + $0x10] sm:$0xff] }
 0x10d   :  { %4020 = vmatprep.subr.mxu0 %v7027_v0  ;;  %3588 = vmatpush3.msra.mxu1 %v1125_v36  ;;  %v3822_v43 = vpop.f32.mrf.mxu1  ;;  %v5673_v36 = vld [vmem:[%s7011_s4 + $0x88] sm:$0xff] }
 0x10e   :  { %4021 = vmatpush3.msra.mxu0 %v4429_v41  ;;  %3589 = vmatprep.subr.mxu1 %v1140_v38  ;;  %v3269_v12 = vpop.f32.mrf.mxu0  ;;  %v5687_v38 = vld [vmem:[%s7011_s4 + $0x80] sm:$0xff]  ;;  %v5701_v41 = vld [vmem:[%s7011_s4 + $0x178] sm:$0xff] }
 0x10f   :  { %4022 = vmatprep.subr.mxu0 %v7027_v0  ;;  %3590 = vmatpush3.msra.mxu1 %v1124_v40  ;;  %v3270_v16 = vadd.f32 %v3269_v12, %v3268_v7  ;;  %v5718_v43 = vld [vmem:[%s7011_s4] sm:$0xff] }
 0x110   :  { %4023 = vmatpush3.msra.mxu0 %v4430_v47  ;;  %3591 = vmatprep.subr.mxu1 %v1139_v42  ;;  %v5710_v42 = vld [vmem:[%s7011_s4 + $0x170] sm:$0xff] }
 0x111   :  { %4024 = vmatprep.subr.mxu0 %v7027_v0  ;;  %3592 = vmatpush3.msra.mxu1 %v1123_v44  ;;  %v386_v22 = vadd.f32 %v3270_v16, %v5416_v39  ;;  %v5694_v39 = vld [vmem:[%s7011_s4 + $0x8] sm:$0xff]  ;;  %v5749_v47 = vld [vmem:[%s7011_s4 + $0x150] sm:$0xff] }
 0x112   :  { %4025 = vmatpush3.msra.mxu0 %v4431_v50  ;;  %3593 = vmatprep.subr.mxu1 %v1138_v48  ;;  %v5724_v44 = vld [vmem:[%s7011_s4 + $0x168] sm:$0xff]  ;;  %v5770_v50 = vld [vmem:[%s7011_s4 + $0x138] sm:$0xff] }
 0x113   :  { %4026 = vmatprep.subr.mxu0 %v7027_v0  ;;  %3594 = vmatpush3.msra.mxu1 %v1122_v49  ;;  %v389_v62 = vmax.f32 %v243_v25, %v386_v22  ;;  %v5756_v48 = vld [vmem:[%s7011_s4 + $0x148] sm:$0xff]  ;;  %v5763_v49 = vld [vmem:[%s7011_s4 + $0x140] sm:$0xff] }
 0x114   :  { %4027 = vmatpush3.msra.mxu0 %v4432_v56  ;;  %3595 = vmatprep.subr.mxu1 %v1137_v51  ;;  %v5777_v51 = vld [vmem:[%s7011_s4 + $0x130] sm:$0xff]  ;;  %v5798_v56 = vld [vmem:[%s7011_s4 + $0x118] sm:$0xff]  ;;  %v5812_v16 = vld [vmem:[%s7011_s4 + $0x108] sm:$0xff] }
 0x115   :  { %4028 = vmatprep.subr.mxu0 %v7027_v0  ;;  %3596 = vmatpush3.msra.mxu1 %v1121_v54  ;;  %v396_v35 = vadd.f32 %v5645_v30, %v389_v62  ;;  %v5791_v54 = vld [vmem:[%s7011_s4 + $0x120] sm:$0xff] }
 0x116   :  { %1296 = vmatprep.mubr.f32.mxu1 %v1120_v55  ;;  %4029 = vmatpush3.msra.mxu0 %v4433_v58  ;;  %v5819_v22 = vld [vmem:[%s7011_s4 + $0x100] sm:$0xff] }
 0x117   :  { %1297 = vmatmul.mubr.f32.vlgmr.msra.gmra.mxu1 %v5289_v2  ;;  %4030 = vmatprep.mubr.msk.f32.mxu0 %vm4435_vm0, %v7027_v0  ;;  %v5502_v2 = vld [vmem:[%s7011_s4 + $0x70] sm:$0xff]  ;;  %v397_v40 = vmax.f32 %v396_v35, 0.0 }
 0x118   :  { %4033 = vmatprep.subr.mxu0 %v7027_v0  ;;  %4031 = vmatmul.mubr.f32.vlgmr.msra.gmra.mxu0 %v1160_v57 }
 0x119   :  { %4068 = vmatprep.subr.mxu1 %v7027_v0  ;;  %4034 = vmatpush3.msra.mxu0 %v5472_v59 }
 0x11a   :  { %4065 = vmatprep.mubr.msk.f32.mxu0 %vm4435_vm0, %v7027_v0  ;;  %4035 = vmatprep.subr.mxu0 %v7027_v0 }
 0x11b   :  { %4069 = vmatpush3.msra.mxu1 %v5489_v63  ;;  %4036 = vmatpush3.msra.mxu0 %v5480_v60 }
 0x11c   :  { %4070 = vmatprep.subr.mxu1 %v7027_v0  ;;  %4037 = vmatprep.subr.mxu0 %v7027_v0 }
 0x11d   :  { %4071 = vmatpush3.msra.mxu1 %v5502_v2  ;;  %4038 = vmatpush3.msra.mxu0 %v5495_v1 }
 0x11e   :  { %4072 = vmatprep.subr.mxu1 %v7027_v0  ;;  %4039 = vmatprep.subr.mxu0 %v7027_v0 }
 0x11f   :  { %4073 = vmatpush3.msra.mxu1 %v5516_v5  ;;  %4040 = vmatpush3.msra.mxu0 %v5509_v3 }
 0x120   :  { %4074 = vmatprep.subr.mxu1 %v7027_v0  ;;  %4041 = vmatprep.subr.mxu0 %v7027_v0 }
 0x121   :  { %4075 = vmatpush3.msra.mxu1 %v5530_v8  ;;  %4042 = vmatpush3.msra.mxu0 %v5523_v6 }
 0x122   :  { %4076 = vmatprep.subr.mxu1 %v7027_v0  ;;  %4043 = vmatprep.subr.mxu0 %v7027_v0 }
 0x123   :  { %4077 = vmatpush3.msra.mxu1 %v5544_v10  ;;  %4044 = vmatpush3.msra.mxu0 %v5537_v9 }
 0x124   :  { %4078 = vmatprep.subr.mxu1 %v7027_v0  ;;  %4045 = vmatprep.subr.mxu0 %v7027_v0 }
 0x125   :  { %4079 = vmatpush3.msra.mxu1 %v5558_v13  ;;  %4046 = vmatpush3.msra.mxu0 %v5551_v11 }
 0x126   :  { %4080 = vmatprep.subr.mxu1 %v7027_v0  ;;  %4047 = vmatprep.subr.mxu0 %v7027_v0 }
 0x127   :  { %4081 = vmatpush3.msra.mxu1 %v5572_v15  ;;  %4048 = vmatpush3.msra.mxu0 %v5565_v14 }
 0x128   :  { %4082 = vmatprep.subr.mxu1 %v7027_v0  ;;  %4049 = vmatprep.subr.mxu0 %v7027_v0 }
 0x129   :  { %4083 = vmatpush3.msra.mxu1 %v5586_v18  ;;  %4050 = vmatpush3.msra.mxu0 %v5579_v17 }
 0x12a   :  { %4084 = vmatprep.subr.mxu1 %v7027_v0  ;;  %4051 = vmatprep.subr.mxu0 %v7027_v0 }
 0x12b   :  { %4085 = vmatpush3.msra.mxu1 %v5600_v21  ;;  %4052 = vmatpush3.msra.mxu0 %v5593_v20 }
 0x12c   :  { %4086 = vmatprep.subr.mxu1 %v7027_v0  ;;  %4053 = vmatprep.subr.mxu0 %v7027_v0 }
 0x12d   :  { %4087 = vmatpush3.msra.mxu1 %v5615_v24  ;;  %4054 = vmatpush3.msra.mxu0 %v5608_v23  ;;  %v5627_v27 = vpop.f32.mrf.mxu1 }
 0x12e   :  { %4088 = vmatprep.subr.mxu1 %v7027_v0  ;;  %4055 = vmatprep.subr.mxu0 %v7027_v0  ;;  %v3320_v52 = vpop.f32.mrf.mxu0 }
 0x12f   :  { %4089 = vmatpush3.msra.mxu1 %v5632_v28  ;;  %4056 = vmatpush3.msra.mxu0 %v5623_v26  ;;  %v3857_v31 = vpop.f32.mrf.mxu1 }
 0x130   :  { %4090 = vmatprep.subr.mxu1 %v7027_v0  ;;  %4057 = vmatprep.subr.mxu0 %v7027_v0  ;;  %v3321_v55 = vpop.f32.mrf.mxu0 }
 0x131   :  { %4091 = vmatpush3.msra.mxu1 %v5651_v32  ;;  %4058 = vmatpush3.msra.mxu0 %v5639_v29  ;;  %v3322_v4 = vadd.f32 %v3321_v55, %v3320_v52 }
 0x132   :  { %4092 = vmatprep.subr.mxu1 %v7027_v0  ;;  %4059 = vmatprep.subr.mxu0 %v7027_v0 }
 0x133   :  { %4093 = vmatpush3.msra.mxu1 %v5665_v34  ;;  %4060 = vmatpush3.msra.mxu0 %v5658_v33  ;;  %v538_v25 = vadd.f32 %v3322_v4, %v5627_v27 }
 0x134   :  { %4094 = vmatprep.subr.mxu1 %v7027_v0  ;;  %4061 = vmatprep.subr.mxu0 %v7027_v0 }
 0x135   :  { %4095 = vmatpush3.msra.mxu1 %v5680_v37  ;;  %4062 = vmatpush3.msra.mxu0 %v5673_v36 }
 0x136   :  { %4096 = vmatprep.subr.mxu1 %v7027_v0  ;;  %4063 = vmatprep.subr.mxu0 %v7027_v0 }
 0x137   :  { %4097 = vmatpush3.msra.mxu1 %v5694_v39  ;;  %4064 = vmatpush3.msra.mxu0 %v5687_v38 }
 0x138   :  { %4098 = vmatprep.subr.mxu1 %v7027_v0  ;;  %4066 = vmatmul.mubr.f32.vlgmr.msra.gmra.mxu0 %v397_v40 }
 0x139   :  { %4103 = vmatprep.subr.mxu0 %v7027_v0  ;;  %4135 = vmatprep.mubr.msk.f32.mxu0 %vm4435_vm0, %v7027_v0 }
 0x13a   :  { %4104 = vmatpush3.msra.mxu0 %v5701_v41  ;;  %4099 = vmatpush3.msra.mxu1 %v5718_v43 }
 0x13b   :  { %4105 = vmatprep.subr.mxu0 %v7027_v0  ;;  %4100 = vmatprep.mubr.msk.f32.mxu1 %vm4435_vm0, %v7027_v0 }
 0x13c   :  { %4106 = vmatpush3.msra.mxu0 %v5710_v42  ;;  %4138 = vmatprep.subr.mxu1 %v7027_v0 }
 0x13d   :  { %4107 = vmatprep.subr.mxu0 %v7027_v0 }
 0x13e   :  { %4108 = vmatpush3.msra.mxu0 %v5724_v44 }
 0x13f   :  { %4109 = vmatprep.subr.mxu0 %v7027_v0 }
 0x140   :  { %4110 = vmatpush3.msra.mxu0 %v5734_v45 }
 0x141   :  { %4111 = vmatprep.subr.mxu0 %v7027_v0 }
 0x142   :  { %4112 = vmatpush3.msra.mxu0 %v5742_v46 }
 0x143   :  { %4113 = vmatprep.subr.mxu0 %v7027_v0 }
 0x144   :  { %4114 = vmatpush3.msra.mxu0 %v5749_v47 }
 0x145   :  { %4115 = vmatprep.subr.mxu0 %v7027_v0 }
 0x146   :  { %4116 = vmatpush3.msra.mxu0 %v5756_v48 }
 0x147   :  { %4117 = vmatprep.subr.mxu0 %v7027_v0 }
 0x148   :  { %4118 = vmatpush3.msra.mxu0 %v5763_v49 }
 0x149   :  { %4119 = vmatprep.subr.mxu0 %v7027_v0 }
 0x14a   :  { %4120 = vmatpush3.msra.mxu0 %v5770_v50 }
 0x14b   :  { %4121 = vmatprep.subr.mxu0 %v7027_v0 }
 0x14c   :  { %4122 = vmatpush3.msra.mxu0 %v5777_v51 }
 0x14d   :  { %4123 = vmatprep.subr.mxu0 %v7027_v0 }
 0x14e   :  { %4124 = vmatpush3.msra.mxu0 %v5784_v53 }
 0x14f   :  { %4125 = vmatprep.subr.mxu0 %v7027_v0  ;;  %v680_v57 = vpop.f32.mrf.mxu1 }
 0x150   :  { %4126 = vmatpush3.msra.mxu0 %v5791_v54  ;;  %v3372_v58 = vpop.f32.mrf.mxu0 }
 0x151   :  { %4127 = vmatprep.subr.mxu0 %v7027_v0  ;;  %v3892_v7 = vpop.f32.mrf.mxu1 }
 0x152   :  { %4128 = vmatpush3.msra.mxu0 %v5798_v56  ;;  %v3373_v12 = vpop.f32.mrf.mxu0 }
 0x153   :  { %4129 = vmatprep.subr.mxu0 %v7027_v0  ;;  %v3374_v19 = vadd.f32 %v3373_v12, %v3372_v58 }
 0x154   :  { %4130 = vmatpush3.msra.mxu0 %v5805_v61 }
 0x155   :  { %4131 = vmatprep.subr.mxu0 %v7027_v0  ;;  %v681_v62 = vadd.f32 %v3374_v19, %v680_v57 }
 0x156   :  { %4132 = vmatpush3.msra.mxu0 %v5812_v16 }
 0x157   :  { %4133 = vmatprep.subr.mxu0 %v7027_v0  ;;  %v684_v31 = vmax.f32 %v538_v25, %v681_v62 }
 0x158   :  { %4134 = vmatpush3.msra.mxu0 %v5819_v22 }
 0x159   :  { %4173 = vmatprep.subr.mxu0 %v7027_v0  ;;  %v685_v35 = vadd.f32 %v5645_v30, %v684_v31 }
 0x15b   :  { %v686_v40 = vmax.f32 %v685_v35, 0.0 }
 0x15d   :  { %4136 = vmatmul.mubr.f32.vlgmr.msra.gmra.mxu0 %v686_v40 }
 0x15e   :  { %4174 = vmatpush3.msra.mxu0 %v5489_v63  ;;  %4205 = vmatprep.mubr.msk.f32.mxu0 %vm4435_vm0, %v7027_v0 }
 0x15f   :  { %4175 = vmatprep.subr.mxu0 %v7027_v0 }
 0x160   :  { %4176 = vmatpush3.msra.mxu0 %v5502_v2 }
 0x161   :  { %4177 = vmatprep.subr.mxu0 %v7027_v0 }
 0x162   :  { %4178 = vmatpush3.msra.mxu0 %v5516_v5 }
 0x163   :  { %4179 = vmatprep.subr.mxu0 %v7027_v0 }
 0x164   :  { %4180 = vmatpush3.msra.mxu0 %v5530_v8 }
 0x165   :  { %4181 = vmatprep.subr.mxu0 %v7027_v0 }
 0x166   :  { %4182 = vmatpush3.msra.mxu0 %v5544_v10 }
 0x167   :  { %4183 = vmatprep.subr.mxu0 %v7027_v0 }
 0x168   :  { %4184 = vmatpush3.msra.mxu0 %v5558_v13 }
 0x169   :  { %4185 = vmatprep.subr.mxu0 %v7027_v0 }
 0x16a   :  { %4186 = vmatpush3.msra.mxu0 %v5572_v15 }
 0x16b   :  { %4187 = vmatprep.subr.mxu0 %v7027_v0 }
 0x16c   :  { %4188 = vmatpush3.msra.mxu0 %v5586_v18 }
 0x16d   :  { %4189 = vmatprep.subr.mxu0 %v7027_v0 }
 0x16e   :  { %4190 = vmatpush3.msra.mxu0 %v5600_v21 }
 0x16f   :  { %4191 = vmatprep.subr.mxu0 %v7027_v0 }
 0x170   :  { %4192 = vmatpush3.msra.mxu0 %v5615_v24 }
 0x171   :  { %v826_v63 = vpop.f32.mrf.mxu1  ;;  %4193 = vmatprep.subr.mxu0 %v7027_v0 }
 0x172   :  { %4194 = vmatpush3.msra.mxu0 %v5632_v28  ;;  %v3424_v5 = vpop.f32.mrf.mxu0 }
 0x173   :  { %v3927_v2 = vpop.f32.mrf.mxu1  ;;  %4195 = vmatprep.subr.mxu0 %v7027_v0 }
 0x174   :  { %4196 = vmatpush3.msra.mxu0 %v5651_v32  ;;  %v3425_v8 = vpop.f32.mrf.mxu0  ;;  %v1827_v2 = vld [vmem:[%s7013_s6 + $0x130] sm:$0xff] }
 0x175   :  { %4197 = vmatprep.subr.mxu0 %v7027_v0  ;;  %v3426_v15 = vadd.f32 %v3425_v8, %v3424_v5  ;;  %v1822_v5 = vld [vmem:[%s7013_s6 + $0x108] sm:$0xff]  ;;  %v1824_v8 = vld [vmem:[%s7013_s6 + $0x118] sm:$0xff] }
 0x176   :  { %4198 = vmatpush3.msra.mxu0 %v5665_v34 }
 0x177   :  { %4199 = vmatprep.subr.mxu0 %v7027_v0  ;;  %v827_v27 = vadd.f32 %v3426_v15, %v826_v63  ;;  %v1825_v63 = vld [vmem:[%s7013_s6 + $0x120] sm:$0xff]  ;;  %v1818_v15 = vld [vmem:[%s7013_s6 + $0xe8] sm:$0xff] }
 0x178   :  { %4200 = vmatpush3.msra.mxu0 %v5680_v37 }
 0x179   :  { %4201 = vmatprep.subr.mxu0 %v7027_v0 }
 0x17a   :  { %4202 = vmatpush3.msra.mxu0 %v5694_v39 }
 0x17b   :  { %4203 = vmatprep.subr.mxu0 %v7027_v0 }
 0x17c   :  { %4204 = vmatpush3.msra.mxu0 %v5718_v43 }
 0x17d   :  { %4206 = vmatmul.mubr.f32.vlgmr.msra.gmra.mxu0 %v686_v40  ;;  %v1828_v40 = vld [vmem:[%s7013_s6 + $0x138] sm:$0xff] }
 0x17e   :  { %1939 = vmatprep.mubr.f32.mxu0 %v7027_v0 }
 0x193   :  { %v969_v10 = vpop.f32.mrf.mxu1 }
 0x194   :  { %v3476_v13 = vpop.f32.mrf.mxu0 }
 0x195   :  { %v3962_v18 = vpop.f32.mrf.mxu1 }
 0x196   :  { %v3477_v21 = vpop.f32.mrf.mxu0  ;;  %v1820_v18 = vld [vmem:[%s7013_s6 + $0xf8] sm:$0xff] }
 0x197   :  { %v3478_v24 = vadd.f32 %v3477_v21, %v3476_v13  ;;  %v1823_v13 = vld [vmem:[%s7013_s6 + $0x110] sm:$0xff]  ;;  %v1817_v21 = vld [vmem:[%s7013_s6 + $0xe0] sm:$0xff] }
 0x199   :  { %v970_v28 = vadd.f32 %v3478_v24, %v969_v10  ;;  %v1821_v10 = vld [vmem:[%s7013_s6 + $0x100] sm:$0xff]  ;;  %v1819_v24 = vld [vmem:[%s7013_s6 + $0xf0] sm:$0xff] }
 0x19b   :  { %v973_v32 = vmax.f32 %v827_v27, %v970_v28  ;;  %v1814_v27 = vld [vmem:[%s7013_s6 + $0xc8] sm:$0xff]  ;;  %v1816_v28 = vld [vmem:[%s7013_s6 + $0xd8] sm:$0xff] }
 0x1b5   :  { %v1115_v34 = vpop.f32.mrf.mxu1 }
 0x1b6   :  { %v3528_v39 = vpop.f32.mrf.mxu0 }
 0x1b7   :  { %v3997_v37 = vpop.f32.mrf.mxu1 }
 0x1b8   :  { %v3529_v52 = vpop.f32.mrf.mxu0  ;;  %v1810_v37 = vld [vmem:[%s7013_s6 + $0xa8] sm:$0xff] }
 0x1b9   :  { %v3530_v43 = vadd.f32 %v3529_v52, %v3528_v39  ;;  %v1812_v39 = vld [vmem:[%s7013_s6 + $0xb8] sm:$0xff]  ;;  %v1809_v52 = vld [vmem:[%s7013_s6 + $0xa0] sm:$0xff] }
 0x1bb   :  { %v1116_v12 = vadd.f32 %v3530_v43, %v1115_v34  ;;  %v1815_v34 = vld [vmem:[%s7013_s6 + $0xd0] sm:$0xff]  ;;  %v1806_v43 = vld [vmem:[%s7013_s6 + $0x88] sm:$0xff] }
 0x1d7   :  { %v3597_v55 = vpop.f32.mrf.mxu1 }
 0x1d8   :  { %v1228_v57 = vpop.f32.mrf.mxu0 }
 0x1d9   :  { %v3598_v58 = vpop.f32.mrf.mxu1 }
 0x1da   :  { %v3599_v4 = vadd.f32 %v3598_v58, %v3597_v55  ;;  %v4032_v7 = vpop.f32.mrf.mxu0  ;;  %v1811_v55 = vld [vmem:[%s7013_s6 + $0xb0] sm:$0xff]  ;;  %v1805_v58 = vld [vmem:[%s7013_s6 + $0x80] sm:$0xff] }
 0x1db   :  { %v1802_v7 = vld [vmem:[%s7013_s6 + $0x68] sm:$0xff] }
 0x1dc   :  { %v1299_v19 = vadd.f32 %v3599_v4, %v1228_v57  ;;  %v1808_v57 = vld [vmem:[%s7013_s6 + $0x98] sm:$0xff]  ;;  %v1807_v4 = vld [vmem:[%s7013_s6 + $0x90] sm:$0xff] }
 0x1de   :  { %v1302_v25 = vmax.f32 %v1116_v12, %v1299_v19  ;;  %v1804_v12 = vld [vmem:[%s7013_s6 + $0x78] sm:$0xff]  ;;  %v1801_v19 = vld [vmem:[%s7013_s6 + $0x60] sm:$0xff] }
 0x1e0   :  { %v5862_v62 = vadd.f32 %v5645_v30, %v1302_v25  ;;  %v1803_v25 = vld [vmem:[%s7013_s6 + $0x70] sm:$0xff] }
 0x1e2   :  { %v1304_v31 = vmax.f32 %v5862_v62, 0.0  ;;  %v1798_v62 = vld [vmem:[%s7013_s6 + $0x48] sm:$0xff] }
 0x1e4   :  { %v1306_v35 = vrot.slane %v1304_v31, 6 }
 0x1e6   :  { %4101 = vmatmul.mubr.msk.f32.vlgmr.msra.gmra.mxu1 %vm3164_vm3, %v1306_v35  ;;  %v1797_v35 = vld [vmem:[%s7013_s6 + $0x40] sm:$0xff] }
 0x1e7   :  { %4139 = vmatpush3.msra.mxu1 %v5472_v59  ;;  %4170 = vmatprep.mubr.msk.f32.mxu1 %vm4435_vm0, %v7027_v0 }
 0x1e8   :  { %4140 = vmatprep.subr.mxu1 %v7027_v0 }
 0x1e9   :  { %4141 = vmatpush3.msra.mxu1 %v5480_v60 }
 0x1ea   :  { %4142 = vmatprep.subr.mxu1 %v7027_v0 }
 0x1eb   :  { %4143 = vmatpush3.msra.mxu1 %v5495_v1  ;;  %v974_v1 = vadd.f32 %v5645_v30, %v973_v32  ;;  %v1848_v30 = vld [vmem:[%s7013_s6 + $0x1d8] sm:$0xff]  ;;  %v1813_v32 = vld [vmem:[%s7013_s6 + $0xc0] sm:$0xff] }
 0x1ec   :  { %4144 = vmatprep.subr.mxu1 %v7027_v0 }
 0x1ed   :  { %4145 = vmatpush3.msra.mxu1 %v5509_v3  ;;  %v975_v3 = vmax.f32 %v974_v1, 0.0  ;;  %v1794_v1 = vld [vmem:[%s7013_s6 + $0x28] sm:$0xff] }
 0x1ee   :  { %4146 = vmatprep.subr.mxu1 %v7027_v0 }
 0x1ef   :  { %4147 = vmatpush3.msra.mxu1 %v5523_v6 }
 0x1f0   :  { %4148 = vmatprep.subr.mxu1 %v7027_v0 }
 0x1f1   :  { %4149 = vmatpush3.msra.mxu1 %v5537_v9 }
 0x1f2   :  { %4150 = vmatprep.subr.mxu1 %v7027_v0 }
 0x1f3   :  { %4151 = vmatpush3.msra.mxu1 %v5551_v11 }
 0x1f4   :  { %4152 = vmatprep.subr.mxu1 %v7027_v0 }
 0x1f5   :  { %4153 = vmatpush3.msra.mxu1 %v5565_v14 }
 0x1f6   :  { %4154 = vmatprep.subr.mxu1 %v7027_v0 }
 0x1f7   :  { %4155 = vmatpush3.msra.mxu1 %v5579_v17  ;;  %v1850_v17 = vld [vmem:[%s7013_s6 + $0x1e8] sm:$0xff] }
 0x1f8   :  { %4156 = vmatprep.subr.mxu1 %v7027_v0  ;;  %v5888_v59 = vpop.f32.mrf.mxu0  ;;  %1875 = vmatprep.subr.mxu0 %v1850_v17  ;;  %v1790_v17 = vld [vmem:[%s7013_s6 + $0x8] sm:$0xff] }
 0x1f9   :  { %4157 = vmatpush3.msra.mxu1 %v5593_v20  ;;  %v1852_v20 = vld [vmem:[%s7013_s6 + $0x1f8] sm:$0xff] }
 0x1fa   :  { %4158 = vmatprep.subr.mxu1 %v7027_v0  ;;  %v4067_v60 = vpop.f32.mrf.mxu0 }
 0x1fb   :  { %4159 = vmatpush3.msra.mxu1 %v5608_v23  ;;  %v1849_v23 = vld [vmem:[%s7013_s6 + $0x1e0] sm:$0xff]  ;;  %v1799_v60 = vld [vmem:[%s7013_s6 + $0x50] sm:$0xff] }
 0x1fc   :  { %4160 = vmatprep.subr.mxu1 %v7027_v0  ;;  %1876 = vmatpush1.msra.mxu0 %v1849_v23  ;;  %v1789_v23 = vld [vmem:[%s7013_s6] sm:$0xff] }
 0x1fd   :  { %4161 = vmatpush3.msra.mxu1 %v5623_v26  ;;  %v1851_v26 = vld [vmem:[%s7013_s6 + $0x1f0] sm:$0xff] }
 0x1fe   :  { %4162 = vmatprep.subr.mxu1 %v7027_v0 }
 0x1ff   :  { %4163 = vmatpush3.msra.mxu1 %v5639_v29  ;;  %v1846_v29 = vld [vmem:[%s7013_s6 + $0x1c8] sm:$0xff] }
 0x200   :  { %4164 = vmatprep.subr.mxu1 %v7027_v0  ;;  %1877 = vmatprep.subr.mxu0 %v1846_v29  ;;  %v6140_v29 = vld [vmem:[%s7014_s7 + $0x1e8] sm:$0xff] }
 0x201   :  { %4165 = vmatpush3.msra.mxu1 %v5658_v33  ;;  %v1845_v33 = vld [vmem:[%s7013_s6 + $0x1c0] sm:$0xff]  ;;  %7087 = vst [vmem:[#allocation2_spill] sm:$0xff] %v6140_v29 }
 0x202   :  { %4166 = vmatprep.subr.mxu1 %v7027_v0  ;;  %1878 = vmatpush1.msra.mxu0 %v1845_v33 }
 0x203   :  { %4167 = vmatpush3.msra.mxu1 %v5673_v36  ;;  %v1847_v36 = vld [vmem:[%s7013_s6 + $0x1d0] sm:$0xff] }
 0x204   :  { %4168 = vmatprep.subr.mxu1 %v7027_v0 }
 0x205   :  { %4169 = vmatpush3.msra.mxu1 %v5687_v38  ;;  %v1842_v38 = vld [vmem:[%s7013_s6 + $0x1a8] sm:$0xff] }
 0x206   :  { %4171 = vmatmul.mubr.f32.vlgmr.msra.gmra.mxu1 %v975_v3  ;;  %4208 = vmatprep.subr.mxu1 %v7027_v0  ;;  %v1796_v3 = vld [vmem:[%s7013_s6 + $0x38] sm:$0xff] }
 0x207   :  { %4209 = vmatpush3.msra.mxu1 %v5701_v41  ;;  %4240 = vmatprep.mubr.msk.f32.mxu1 %vm4435_vm0, %v7027_v0  ;;  %v1844_v41 = vld [vmem:[%s7013_s6 + $0x1b8] sm:$0xff] }
 0x208   :  { %4210 = vmatprep.subr.mxu1 %v7027_v0  ;;  %1879 = vmatprep.subr.mxu0 %v1842_v38 }
 0x209   :  { %4211 = vmatpush3.msra.mxu1 %v5710_v42  ;;  %v1841_v42 = vld [vmem:[%s7013_s6 + $0x1a0] sm:$0xff] }
 0x20a   :  { %4212 = vmatprep.subr.mxu1 %v7027_v0  ;;  %1880 = vmatpush1.msra.mxu0 %v1841_v42 }
 0x20b   :  { %4213 = vmatpush3.msra.mxu1 %v5724_v44  ;;  %v1843_v44 = vld [vmem:[%s7013_s6 + $0x1b0] sm:$0xff] }
 0x20c   :  { %4214 = vmatprep.subr.mxu1 %v7027_v0 }
 0x20d   :  { %4215 = vmatpush3.msra.mxu1 %v5734_v45  ;;  %v1838_v45 = vld [vmem:[%s7013_s6 + $0x188] sm:$0xff] }
 0x20e   :  { %4216 = vmatprep.subr.mxu1 %v7027_v0  ;;  %1881 = vmatprep.subr.mxu0 %v1838_v45 }
 0x20f   :  { %4217 = vmatpush3.msra.mxu1 %v5742_v46  ;;  %v1840_v46 = vld [vmem:[%s7013_s6 + $0x198] sm:$0xff] }
 0x210   :  { %4218 = vmatprep.subr.mxu1 %v7027_v0 }
 0x211   :  { %4219 = vmatpush3.msra.mxu1 %v5749_v47  ;;  %v1837_v47 = vld [vmem:[%s7013_s6 + $0x180] sm:$0xff] }
 0x212   :  { %4220 = vmatprep.subr.mxu1 %v7027_v0  ;;  %1882 = vmatpush1.msra.mxu0 %v1837_v47 }
 0x213   :  { %4221 = vmatpush3.msra.mxu1 %v5756_v48  ;;  %v1839_v48 = vld [vmem:[%s7013_s6 + $0x190] sm:$0xff] }
 0x214   :  { %4222 = vmatprep.subr.mxu1 %v7027_v0 }
 0x215   :  { %4223 = vmatpush3.msra.mxu1 %v5763_v49  ;;  %v1834_v49 = vld [vmem:[%s7013_s6 + $0x168] sm:$0xff] }
 0x216   :  { %4224 = vmatprep.subr.mxu1 %v7027_v0  ;;  %1883 = vmatprep.subr.mxu0 %v1834_v49 }
 0x217   :  { %4225 = vmatpush3.msra.mxu1 %v5770_v50  ;;  %v1836_v50 = vld [vmem:[%s7013_s6 + $0x178] sm:$0xff] }
 0x218   :  { %4226 = vmatprep.subr.mxu1 %v7027_v0 }
 0x219   :  { %4227 = vmatpush3.msra.mxu1 %v5777_v51  ;;  %v1833_v51 = vld [vmem:[%s7013_s6 + $0x160] sm:$0xff] }
 0x21a   :  { %4228 = vmatprep.subr.mxu1 %v7027_v0  ;;  %1884 = vmatpush1.msra.mxu0 %v1833_v51 }
 0x21b   :  { %4229 = vmatpush3.msra.mxu1 %v5784_v53  ;;  %v1835_v53 = vld [vmem:[%s7013_s6 + $0x170] sm:$0xff] }
 0x21c   :  { %4230 = vmatprep.subr.mxu1 %v7027_v0 }
 0x21d   :  { %4231 = vmatpush3.msra.mxu1 %v5791_v54  ;;  %v5931_v6 = vpop.f32.mrf.mxu0  ;;  %v1830_v54 = vld [vmem:[%s7013_s6 + $0x148] sm:$0xff] }
 0x21e   :  { %4232 = vmatprep.subr.mxu1 %v7027_v0  ;;  %1885 = vmatprep.subr.mxu0 %v1830_v54  ;;  %v6158_v54 = vld [vmem:[%s7014_s7 + $0x1e0] sm:$0xff] }
 0x21f   :  { %4233 = vmatpush3.msra.mxu1 %v5798_v56  ;;  %v4137_v9 = vpop.f32.mrf.mxu0  ;;  %v1832_v56 = vld [vmem:[%s7013_s6 + $0x158] sm:$0xff] }
 0x220   :  { %4234 = vmatprep.subr.mxu1 %v7027_v0  ;;  %v1793_v9 = vld [vmem:[%s7013_s6 + $0x20] sm:$0xff] }
 0x221   :  { %4235 = vmatpush3.msra.mxu1 %v5805_v61  ;;  %v1829_v61 = vld [vmem:[%s7013_s6 + $0x140] sm:$0xff] }
 0x222   :  { %4236 = vmatprep.subr.mxu1 %v7027_v0  ;;  %1886 = vmatpush1.msra.mxu0 %v1829_v61  ;;  %v6183_v61 = vld [vmem:[%s7014_s7 + $0x1d0] sm:$0xff] }
 0x223   :  { %4237 = vmatpush3.msra.mxu1 %v5812_v16  ;;  %v1831_v16 = vld [vmem:[%s7013_s6 + $0x150] sm:$0xff] }
 0x224   :  { %4238 = vmatprep.subr.mxu1 %v7027_v0 }
 0x225   :  { %4239 = vmatpush3.msra.mxu1 %v5819_v22  ;;  %v1826_v22 = vld [vmem:[%s7013_s6 + $0x128] sm:$0xff] }
 0x226   :  { %4241 = vmatmul.mubr.f32.vlgmr.msra.gmra.mxu1 %v1304_v31  ;;  %1946 = vmatprep.subr.mxu1 %v1852_v20  ;;  %v1800_v31 = vld [vmem:[%s7013_s6 + $0x58] sm:$0xff] }
 0x227   :  { %2010 = vmatprep.mubr.f32.mxu1 %v7027_v0  ;;  %1947 = vmatpush1.msra.mxu1 %v1851_v26  ;;  %v1792_v20 = vld [vmem:[%s7013_s6 + $0x18] sm:$0xff]  ;;  %v1791_v26 = vld [vmem:[%s7013_s6 + $0x10] sm:$0xff] }
 0x228   :  { %1948 = vmatprep.subr.mxu1 %v1848_v30  ;;  %1887 = vmatprep.subr.mxu0 %v1826_v22  ;;  %v6145_v30 = vld [vmem:[%s7014_s7 + $0x1f8] sm:$0xff]  ;;  %v6521_v0 = vld [vmem:[%s7014_s7 + $0x10] sm:$0xff] }
 0x229   :  { %1949 = vmatpush1.msra.mxu1 %v1847_v36  ;;  %1888 = vmatpush1.msra.mxu0 %v1825_v63  ;;  %7088 = vst [vmem:[#allocation3_spill] sm:$0xff] %v6145_v30  ;;  %v6195_v22 = vld [vmem:[%s7014_s7 + $0x1b8] sm:$0xff]  ;;  %v6207_v63 = vld [vmem:[%s7014_s7 + $0x1b0] sm:$0xff]  ;;  %7112 = vst [vmem:[#allocation27_spill] sm:$0xff] %v6521_v0 }
 0x22a   :  { %1950 = vmatprep.subr.mxu1 %v1844_v41  ;;  %1889 = vmatprep.subr.mxu0 %v1822_v5  ;;  %v6219_v5 = vld [vmem:[%s7014_s7 + $0x198] sm:$0xff] }
 0x22b   :  { %1951 = vmatpush1.msra.mxu1 %v1843_v44  ;;  %1890 = vmatpush1.msra.mxu0 %v1821_v10  ;;  %v6231_v10 = vld [vmem:[%s7014_s7 + $0x190] sm:$0xff] }
 0x22c   :  { %1952 = vmatprep.subr.mxu1 %v1840_v46  ;;  %1891 = vmatprep.subr.mxu0 %v1818_v15  ;;  %v6243_v15 = vld [vmem:[%s7014_s7 + $0x178] sm:$0xff] }
 0x22d   :  { %1953 = vmatpush1.msra.mxu1 %v1839_v48  ;;  %1892 = vmatpush1.msra.mxu0 %v1817_v21  ;;  %v3166_v48 = vld [vmem:[%s7015_s5] ss:$0 sm:$0xff]  ;;  %v6255_v21 = vld [vmem:[%s7014_s7 + $0x170] sm:$0xff] }
 0x22e   :  { %1954 = vmatprep.subr.mxu1 %v1836_v50  ;;  %1893 = vmatprep.subr.mxu0 %v1814_v27  ;;  %v6267_v27 = vld [vmem:[%s7014_s7 + $0x158] sm:$0xff] }
 0x22f   :  { %1955 = vmatpush1.msra.mxu1 %v1835_v53  ;;  %1894 = vmatpush1.msra.mxu0 %v1813_v32  ;;  %v6279_v32 = vld [vmem:[%s7014_s7 + $0x150] sm:$0xff] }
 0x230   :  { %1956 = vmatprep.subr.mxu1 %v1832_v56  ;;  %1895 = vmatprep.subr.mxu0 %v1810_v37  ;;  %v6178_v56 = vld [vmem:[%s7014_s7 + $0x1c0] sm:$0xff]  ;;  %v6291_v37 = vld [vmem:[%s7014_s7 + $0x138] sm:$0xff] }
 0x231   :  { %1957 = vmatpush1.msra.mxu1 %v1831_v16  ;;  %1896 = vmatpush1.msra.mxu0 %v1809_v52  ;;  %v6190_v16 = vld [vmem:[%s7014_s7 + $0x1a8] sm:$0xff]  ;;  %v6303_v52 = vld [vmem:[%s7014_s7 + $0x130] sm:$0xff] }
 0x232   :  { %1958 = vmatprep.subr.mxu1 %v1828_v40  ;;  %1897 = vmatprep.subr.mxu0 %v1806_v43  ;;  %v6202_v40 = vld [vmem:[%s7014_s7 + $0x1a0] sm:$0xff]  ;;  %v6315_v43 = vld [vmem:[%s7014_s7 + $0x118] sm:$0xff] }
 0x233   :  { %1959 = vmatpush1.msra.mxu1 %v1827_v2  ;;  %1898 = vmatpush1.msra.mxu0 %v1805_v58  ;;  %v6214_v2 = vld [vmem:[%s7014_s7 + $0x188] sm:$0xff]  ;;  %v6327_v58 = vld [vmem:[%s7014_s7 + $0x110] sm:$0xff] }
 0x234   :  { %1960 = vmatprep.subr.mxu1 %v1824_v8  ;;  %1899 = vmatprep.subr.mxu0 %v1802_v7  ;;  %v6226_v8 = vld [vmem:[%s7014_s7 + $0x180] sm:$0xff]  ;;  %v6339_v7 = vld [vmem:[%s7014_s7 + $0xf8] sm:$0xff] }
 0x235   :  { %1961 = vmatpush1.msra.mxu1 %v1823_v13  ;;  %1900 = vmatpush1.msra.mxu0 %v1801_v19  ;;  %v6238_v13 = vld [vmem:[%s7014_s7 + $0x168] sm:$0xff]  ;;  %v6351_v19 = vld [vmem:[%s7014_s7 + $0xf0] sm:$0xff] }
 0x236   :  { %1962 = vmatprep.subr.mxu1 %v1820_v18  ;;  %1901 = vmatprep.subr.mxu0 %v1798_v62  ;;  %v6250_v18 = vld [vmem:[%s7014_s7 + $0x160] sm:$0xff]  ;;  %v6363_v62 = vld [vmem:[%s7014_s7 + $0xd8] sm:$0xff] }
 0x237   :  { %1963 = vmatpush1.msra.mxu1 %v1819_v24  ;;  %1902 = vmatpush1.msra.mxu0 %v1797_v35  ;;  %v6262_v24 = vld [vmem:[%s7014_s7 + $0x148] sm:$0xff]  ;;  %v6375_v35 = vld [vmem:[%s7014_s7 + $0xd0] sm:$0xff] }
 0x238   :  { %1964 = vmatprep.subr.mxu1 %v1816_v28  ;;  %1903 = vmatprep.subr.mxu0 %v1794_v1  ;;  %v6274_v28 = vld [vmem:[%s7014_s7 + $0x140] sm:$0xff]  ;;  %v6387_v1 = vld [vmem:[%s7014_s7 + $0xb8] sm:$0xff] }
 0x239   :  { %1965 = vmatpush1.msra.mxu1 %v1815_v34  ;;  %1904 = vmatpush1.msra.mxu0 %v1793_v9  ;;  %v6286_v34 = vld [vmem:[%s7014_s7 + $0x128] sm:$0xff]  ;;  %7090 = vst [vmem:[#allocation5_spill] sm:$0xff] %v6387_v1  ;;  %v6399_v9 = vld [vmem:[%s7014_s7 + $0xb0] sm:$0xff] }
 0x23a   :  { %1966 = vmatprep.subr.mxu1 %v1812_v39  ;;  %1905 = vmatprep.subr.mxu0 %v1790_v17  ;;  %v6298_v39 = vld [vmem:[%s7014_s7 + $0x120] sm:$0xff]  ;;  %7092 = vst [vmem:[#allocation7_spill] sm:$0xff] %v6399_v9  ;;  %v6411_v17 = vld [vmem:[%s7014_s7 + $0x98] sm:$0xff] }
 0x23b   :  { %1967 = vmatpush1.msra.mxu1 %v1811_v55  ;;  %1906 = vmatpush1.msra.mxu0 %v1789_v23  ;;  %v6310_v55 = vld [vmem:[%s7014_s7 + $0x108] sm:$0xff]  ;;  %7094 = vst [vmem:[#allocation9_spill] sm:$0xff] %v6411_v17  ;;  %v6423_v23 = vld [vmem:[%s7014_s7 + $0x90] sm:$0xff] }
 0x23c   :  { %1968 = vmatprep.subr.mxu1 %v1808_v57  ;;  %2122 = vmatprep.subr.mxu0 %v6140_v29  ;;  %v6322_v57 = vld [vmem:[%s7014_s7 + $0x100] sm:$0xff]  ;;  %7096 = vst [vmem:[#allocation11_spill] sm:$0xff] %v6423_v23 }
 0x23d   :  { %v5943_v11 = vpop.f32.mrf.mxu0  ;;  %1969 = vmatpush1.msra.mxu1 %v1807_v4  ;;  %v6334_v4 = vld [vmem:[%s7014_s7 + $0xe8] sm:$0xff] }
 0x23e   :  { %1970 = vmatprep.subr.mxu1 %v1804_v12  ;;  %v6346_v12 = vld [vmem:[%s7014_s7 + $0xe0] sm:$0xff] }
 0x23f   :  { %v4207_v14 = vpop.f32.mrf.mxu0  ;;  %1971 = vmatpush1.msra.mxu1 %v1803_v25  ;;  %v6358_v25 = vld [vmem:[%s7014_s7 + $0xc8] sm:$0xff] }
 0x240   :  { %1972 = vmatprep.subr.mxu1 %v1800_v31  ;;  %v1795_v14 = vld [vmem:[%s7013_s6 + $0x30] sm:$0xff]  ;;  %v6370_v31 = vld [vmem:[%s7014_s7 + $0xc0] sm:$0xff] }
 0x241   :  { %1973 = vmatpush1.msra.mxu1 %v1799_v60  ;;  %v6382_v60 = vld [vmem:[%s7014_s7 + $0xa8] sm:$0xff] }
 0x242   :  { %1974 = vmatprep.subr.mxu1 %v1796_v3  ;;  %7089 = vst [vmem:[#allocation4_spill] sm:$0xff] %v6382_v60  ;;  %v6394_v3 = vld [vmem:[%s7014_s7 + $0xa0] sm:$0xff] }
 0x243   :  { %1975 = vmatpush1.msra.mxu1 %v1795_v14  ;;  %7091 = vst [vmem:[#allocation6_spill] sm:$0xff] %v6394_v3  ;;  %v6406_v14 = vld [vmem:[%s7014_s7 + $0x88] sm:$0xff] }
 0x244   :  { %1976 = vmatprep.subr.mxu1 %v1792_v20  ;;  %7093 = vst [vmem:[#allocation8_spill] sm:$0xff] %v6406_v14  ;;  %v6418_v20 = vld [vmem:[%s7014_s7 + $0x80] sm:$0xff] }
 0x245   :  { %1977 = vmatpush1.msra.mxu1 %v1791_v26  ;;  %7095 = vst [vmem:[#allocation10_spill] sm:$0xff] %v6418_v20  ;;  %v6430_v26 = vld [vmem:[%s7014_s7 + $0x68] sm:$0xff] }
 0x246   :  { %2193 = vmatprep.subr.mxu1 %v6145_v30  ;;  %7097 = vst [vmem:[#allocation12_spill] sm:$0xff] %v6430_v26 }
 0x2a6   :  { %v1494_v33 = vpop.f32.mrf.mxu1 }
 0x2a7   :  { %v1495_v42 = vadd.f32 %v1494_v33, %v5888_v59  ;;  %v6163_v59 = vld [vmem:[%s7014_s7 + $0x1f0] sm:$0xff]  ;;  %v6435_v33 = vld [vmem:[%s7014_s7 + $0x78] sm:$0xff] }
 0x2a8   :  { %v4102_v36 = vpop.f32.mrf.mxu1  ;;  %7098 = vst [vmem:[#allocation13_spill] sm:$0xff] %v6435_v33 }
 0x2a9   :  { %v1568_v46 = vadd.f32 %v5931_v6, %v1495_v42  ;;  %v6168_v6 = vld [vmem:[%s7014_s7 + $0x1c8] sm:$0xff]  ;;  %v6442_v36 = vld [vmem:[%s7014_s7 + $0x60] sm:$0xff]  ;;  %v6459_v42 = vld [vmem:[%s7014_s7 + $0x58] sm:$0xff] }
 0x2aa   :  { %7099 = vst [vmem:[#allocation14_spill] sm:$0xff] %v6442_v36  ;;  %7102 = vst [vmem:[#allocation17_spill] sm:$0xff] %v6459_v42 }
 0x2c6   :  { %v1635_v38 = vpop.f32.mrf.mxu1 }
 0x2c7   :  { %v1706_v44 = vadd.f32 %v5943_v11, %v1635_v38  ;;  %v6173_v11 = vld [vmem:[%s7014_s7 + $0x1d8] sm:$0xff]  ;;  %v6447_v38 = vld [vmem:[%s7014_s7 + $0x70] sm:$0xff] }
 0x2c8   :  { %v4172_v41 = vpop.f32.mrf.mxu1  ;;  %7100 = vst [vmem:[#allocation15_spill] sm:$0xff] %v6447_v38 }
 0x2c9   :  { %v6454_v41 = vld [vmem:[%s7014_s7 + $0x48] sm:$0xff] }
 0x2ca   :  { %7101 = vst [vmem:[#allocation16_spill] sm:$0xff] %v6454_v41 }
 0x2e6   :  { %v1775_v45 = vpop.f32.mrf.mxu1 }
 0x2e7   :  { %v1779_v47 = vadd.f32 %v1775_v45, %v1706_v44  ;;  %v6466_v44 = vld [vmem:[%s7014_s7 + $0x40] sm:$0xff]  ;;  %v6471_v45 = vld [vmem:[%s7014_s7 + $0x50] sm:$0xff] }
 0x2e8   :  { %v4242_v49 = vpop.f32.mrf.mxu1  ;;  %7103 = vst [vmem:[#allocation18_spill] sm:$0xff] %v6466_v44  ;;  %7104 = vst [vmem:[#allocation19_spill] sm:$0xff] %v6471_v45 }
 0x2e9   :  { %v1780_v50 = vmax.f32 %v1568_v46, %v1779_v47  ;;  %v6478_v46 = vld [vmem:[%s7014_s7 + $0x28] sm:$0xff]  ;;  %v6483_v47 = vld [vmem:[%s7014_s7 + $0x38] sm:$0xff]  ;;  %v6495_v49 = vld [vmem:[%s7014_s7 + $0x30] sm:$0xff] }
 0x2ea   :  { %7105 = vst [vmem:[#allocation20_spill] sm:$0xff] %v6478_v46  ;;  %7106 = vst [vmem:[#allocation21_spill] sm:$0xff] %v6483_v47 }
 0x2eb   :  { %v1787_v51 = vadd.f32 %v3166_v48, %v1780_v50  ;;  %v6490_v48 = vld [vmem:[%s7014_s7 + $0x20] sm:$0xff]  ;;  %7108 = vst [vmem:[#allocation23_spill] sm:$0xff] %v6495_v49  ;;  %v6502_v50 = vld [vmem:[%s7014_s7 + $0x8] sm:$0xff] }
 0x2ec   :  { %7107 = vst [vmem:[#allocation22_spill] sm:$0xff] %v6490_v48  ;;  %7109 = vst [vmem:[#allocation24_spill] sm:$0xff] %v6502_v50 }
 0x2ed   :  { %v1788_v53 = vmax.f32 %v1787_v51, 0.0  ;;  %v6507_v51 = vld [vmem:[%s7014_s7 + $0x18] sm:$0xff] }
 0x2ee   :  { %7110 = vst [vmem:[#allocation25_spill] sm:$0xff] %v6507_v51 }
 0x2ef   :  { %1940 = vmatmul.mubr.f32.vlgmr.msra.gmra.mxu0 %v1788_v53  ;;  %2011 = vmatmul.mubr.f32.vlgmr.msra.gmra.mxu1 %v1788_v53  ;;  %v6514_v53 = vld [vmem:[%s7014_s7] sm:$0xff] }
 0x2f0   :  { %2123 = vmatpush1.msra.mxu0 %v6158_v54  ;;  %2194 = vmatpush1.msra.mxu1 %v6163_v59  ;;  %7111 = vst [vmem:[#allocation26_spill] sm:$0xff] %v6514_v53 }
 0x2f1   :  { %2124 = vmatprep.subr.mxu0 %v6168_v6  ;;  %2195 = vmatprep.subr.mxu1 %v6173_v11 }
 0x2f2   :  { %2125 = vmatpush1.msra.mxu0 %v6178_v56  ;;  %2196 = vmatpush1.msra.mxu1 %v6183_v61 }
 0x2f3   :  { %2126 = vmatprep.subr.mxu0 %v6190_v16  ;;  %2197 = vmatprep.subr.mxu1 %v6195_v22 }
 0x2f4   :  { %2127 = vmatpush1.msra.mxu0 %v6202_v40  ;;  %2198 = vmatpush1.msra.mxu1 %v6207_v63 }
 0x2f5   :  { %2128 = vmatprep.subr.mxu0 %v6214_v2  ;;  %2199 = vmatprep.subr.mxu1 %v6219_v5 }
 0x2f6   :  { %2129 = vmatpush1.msra.mxu0 %v6226_v8  ;;  %2200 = vmatpush1.msra.mxu1 %v6231_v10 }
 0x2f7   :  { %2130 = vmatprep.subr.mxu0 %v6238_v13  ;;  %2201 = vmatprep.subr.mxu1 %v6243_v15 }
 0x2f8   :  { %2131 = vmatpush1.msra.mxu0 %v6250_v18  ;;  %2202 = vmatpush1.msra.mxu1 %v6255_v21 }
 0x2f9   :  { %2132 = vmatprep.subr.mxu0 %v6262_v24  ;;  %2203 = vmatprep.subr.mxu1 %v6267_v27 }
 0x2fa   :  { %2133 = vmatpush1.msra.mxu0 %v6274_v28  ;;  %2204 = vmatpush1.msra.mxu1 %v6279_v32 }
 0x2fb   :  { %2134 = vmatprep.subr.mxu0 %v6286_v34  ;;  %2205 = vmatprep.subr.mxu1 %v6291_v37 }
 0x2fc   :  { %2135 = vmatpush1.msra.mxu0 %v6298_v39  ;;  %2206 = vmatpush1.msra.mxu1 %v6303_v52 }
 0x2fd   :  { %2136 = vmatprep.subr.mxu0 %v6310_v55  ;;  %2207 = vmatprep.subr.mxu1 %v6315_v43 }
 0x2fe   :  { %2137 = vmatpush1.msra.mxu0 %v6322_v57  ;;  %2208 = vmatpush1.msra.mxu1 %v6327_v58 }
 0x2ff   :  { %2138 = vmatprep.subr.mxu0 %v6334_v4  ;;  %2209 = vmatprep.subr.mxu1 %v6339_v7 }
 0x300   :  { %2139 = vmatpush1.msra.mxu0 %v6346_v12  ;;  %2210 = vmatpush1.msra.mxu1 %v6351_v19 }
 0x301   :  { %2140 = vmatprep.subr.mxu0 %v6358_v25  ;;  %2211 = vmatprep.subr.mxu1 %v6363_v62 }
 0x302   :  { %2141 = vmatpush1.msra.mxu0 %v6370_v31  ;;  %2212 = vmatpush1.msra.mxu1 %v6375_v35 }
 0x303   :  { %2142 = vmatprep.subr.mxu0 %v6382_v60  ;;  %2213 = vmatprep.subr.mxu1 %v6387_v1 }
 0x304   :  { %2143 = vmatpush1.msra.mxu0 %v6394_v3  ;;  %2214 = vmatpush1.msra.mxu1 %v6399_v9 }
 0x305   :  { %2144 = vmatprep.subr.mxu0 %v6406_v14  ;;  %2215 = vmatprep.subr.mxu1 %v6411_v17 }
 0x306   :  { %2145 = vmatpush1.msra.mxu0 %v6418_v20  ;;  %2216 = vmatpush1.msra.mxu1 %v6423_v23 }
 0x307   :  { %2146 = vmatprep.subr.mxu0 %v6430_v26  ;;  %2217 = vmatprep.subr.mxu1 %v6435_v33 }
 0x308   :  { %2147 = vmatpush1.msra.mxu0 %v6442_v36  ;;  %2218 = vmatpush1.msra.mxu1 %v6447_v38 }
 0x309   :  { %2148 = vmatprep.subr.mxu0 %v6454_v41  ;;  %2219 = vmatprep.subr.mxu1 %v6459_v42 }
 0x30a   :  { %2149 = vmatpush1.msra.mxu0 %v6466_v44  ;;  %2220 = vmatpush1.msra.mxu1 %v6471_v45 }
 0x30b   :  { %2150 = vmatprep.subr.mxu0 %v6478_v46  ;;  %2221 = vmatprep.subr.mxu1 %v6483_v47  ;;  %v7113_v47 = vmov 0.0  }
 0x30c   :  { %2151 = vmatpush1.msra.mxu0 %v6490_v48  ;;  %2222 = vmatpush1.msra.mxu1 %v6495_v49 }
 0x30d   :  { %2152 = vmatprep.subr.mxu0 %v6502_v50  ;;  %2223 = vmatprep.subr.mxu1 %v6507_v51 }
 0x30e   :  { %2153 = vmatpush1.msra.mxu0 %v6514_v53  ;;  %2186 = vmatprep.mubr.f32.mxu0 %v7113_v47 }
 0x30f   :  { %2224 = vmatpush1.msra.mxu1 %v6521_v0  ;;  %2257 = vmatprep.mubr.f32.mxu1 %v7113_v47 }
 0x310   :  { %2187 = vmatmul.mubr.f32.vlgmr.msra.gmra.mxu0 %v7113_v47  ;;  %2258 = vmatmul.mubr.f32.vlgmr.msra.gmra.mxu1 %v7113_v47 }
 0x311   :  { %2292 = vmatprep.subr.mxu0 %v6140_v29  ;;  %2363 = vmatprep.subr.mxu1 %v6145_v30 }
 0x312   :  { %2293 = vmatpush1.msra.mxu0 %v6158_v54  ;;  %2364 = vmatpush1.msra.mxu1 %v6163_v59 }
 0x313   :  { %2294 = vmatprep.subr.mxu0 %v6168_v6  ;;  %2365 = vmatprep.subr.mxu1 %v6173_v11 }
 0x314   :  { %2295 = vmatpush1.msra.mxu0 %v6178_v56  ;;  %2366 = vmatpush1.msra.mxu1 %v6183_v61 }
 0x315   :  { %2296 = vmatprep.subr.mxu0 %v6190_v16  ;;  %2367 = vmatprep.subr.mxu1 %v6195_v22 }
 0x316   :  { %2297 = vmatpush1.msra.mxu0 %v6202_v40  ;;  %2368 = vmatpush1.msra.mxu1 %v6207_v63 }
 0x317   :  { %2298 = vmatprep.subr.mxu0 %v6214_v2  ;;  %2369 = vmatprep.subr.mxu1 %v6219_v5 }
 0x318   :  { %2299 = vmatpush1.msra.mxu0 %v6226_v8  ;;  %2370 = vmatpush1.msra.mxu1 %v6231_v10 }
 0x319   :  { %2300 = vmatprep.subr.mxu0 %v6238_v13  ;;  %2371 = vmatprep.subr.mxu1 %v6243_v15 }
 0x31a   :  { %2301 = vmatpush1.msra.mxu0 %v6250_v18  ;;  %2372 = vmatpush1.msra.mxu1 %v6255_v21 }
 0x31b   :  { %2302 = vmatprep.subr.mxu0 %v6262_v24  ;;  %2373 = vmatprep.subr.mxu1 %v6267_v27 }
 0x31c   :  { %2303 = vmatpush1.msra.mxu0 %v6274_v28  ;;  %2374 = vmatpush1.msra.mxu1 %v6279_v32 }
 0x31d   :  { %2304 = vmatprep.subr.mxu0 %v6286_v34  ;;  %2375 = vmatprep.subr.mxu1 %v6291_v37 }
 0x31e   :  { %2305 = vmatpush1.msra.mxu0 %v6298_v39  ;;  %2376 = vmatpush1.msra.mxu1 %v6303_v52 }
 0x31f   :  { %2306 = vmatprep.subr.mxu0 %v6310_v55  ;;  %2377 = vmatprep.subr.mxu1 %v6315_v43 }
 0x320   :  { %2307 = vmatpush1.msra.mxu0 %v6322_v57  ;;  %2378 = vmatpush1.msra.mxu1 %v6327_v58 }
 0x321   :  { %2308 = vmatprep.subr.mxu0 %v6334_v4  ;;  %2379 = vmatprep.subr.mxu1 %v6339_v7 }
 0x322   :  { %2309 = vmatpush1.msra.mxu0 %v6346_v12  ;;  %2380 = vmatpush1.msra.mxu1 %v6351_v19 }
 0x323   :  { %2310 = vmatprep.subr.mxu0 %v6358_v25  ;;  %2381 = vmatprep.subr.mxu1 %v6363_v62 }
 0x324   :  { %2311 = vmatpush1.msra.mxu0 %v6370_v31  ;;  %2382 = vmatpush1.msra.mxu1 %v6375_v35 }
 0x325   :  { %2312 = vmatprep.subr.mxu0 %v6382_v60  ;;  %2383 = vmatprep.subr.mxu1 %v6387_v1 }
 0x326   :  { %2313 = vmatpush1.msra.mxu0 %v6394_v3  ;;  %2384 = vmatpush1.msra.mxu1 %v6399_v9 }
 0x327   :  { %2314 = vmatprep.subr.mxu0 %v6406_v14  ;;  %2385 = vmatprep.subr.mxu1 %v6411_v17 }
 0x328   :  { %2315 = vmatpush1.msra.mxu0 %v6418_v20  ;;  %2386 = vmatpush1.msra.mxu1 %v6423_v23  ;;  %v7114_v20 = vld [vmem:[#allocation21_spill] sm:$0xff] }
 0x329   :  { %2316 = vmatprep.subr.mxu0 %v6430_v26  ;;  %2387 = vmatprep.subr.mxu1 %v6435_v33 }
 0x32a   :  { %2317 = vmatpush1.msra.mxu0 %v6442_v36  ;;  %2388 = vmatpush1.msra.mxu1 %v6447_v38 }
 0x32b   :  { %2318 = vmatprep.subr.mxu0 %v6454_v41  ;;  %2389 = vmatprep.subr.mxu1 %v6459_v42 }
 0x32c   :  { %2319 = vmatpush1.msra.mxu0 %v6466_v44  ;;  %2390 = vmatpush1.msra.mxu1 %v6471_v45 }
 0x32d   :  { %2320 = vmatprep.subr.mxu0 %v6478_v46  ;;  %2391 = vmatprep.subr.mxu1 %v7114_v20  ;;  %v1855_v20 = vlaneseq }
 0x32e   :  { %2321 = vmatpush1.msra.mxu0 %v6490_v48  ;;  %2392 = vmatpush1.msra.mxu1 %v6495_v49 }
 0x32f   :  { %2322 = vmatprep.subr.mxu0 %v6502_v50  ;;  %2393 = vmatprep.subr.mxu1 %v6507_v51  ;;  %v1856_v48 = vshrl.u32 %v1855_v20, 7  ;;  %v2018_v46 = vand.u32 127, %v1855_v20  ;;  %v1853_v51 = vld [vmem:[%s7016_s8] sm:$0xf] }
 0x330   :  { %2323 = vmatpush1.msra.mxu0 %v6514_v53  ;;  %2356 = vmatprep.mubr.f32.mxu0 %v7113_v47 }
 0x331   :  { %2394 = vmatpush1.msra.mxu1 %v6521_v0  ;;  %2427 = vmatprep.mubr.f32.mxu1 %v7113_v47  ;;  %v1857_v49 = vsub.s32 0, %v1856_v48  ;;  %v1865_v45 = vsub.s32 2, %v1856_v48  ;;  %v1861_v53 = vsub.s32 1, %v1856_v48  ;;  %v1869_v50 = vsub.s32 3, %v1856_v48 }
 0x332   :  { %2480 = vmatprep.subr.mxu0 %v6140_v29  ;;  %2551 = vmatprep.subr.mxu1 %v6145_v30  ;;  %v2020_v44 = vadd.s32 256, %v2018_v46  ;;  %v2019_v41 = vadd.s32 128, %v2018_v46  ;;  %v2021_v47 = vadd.s32 384, %v2018_v46  ;;  %v2022_v36 = vand.u32 64, %v2018_v46 }
 0x333   :  { %v1858_v42 = vrot.slane %v1853_v51, %v1857_v49  ;;  %v1866_v0 = vrot.slane %v1853_v51, %v1865_v45  ;;  %v1862_v38 = vrot.slane %v1853_v51, %v1861_v53  ;;  %v1870_v29 = vrot.slane %v1853_v51, %v1869_v50 }
 0x334   :  { %v2024_v30 = vand.u32 64, %v2020_v44  ;;  %v2023_v17 = vand.u32 64, %v2019_v41  ;;  %v2025_v14 = vand.u32 64, %v2021_v47  ;;  %vm2026_vm4 = vcmp.eq.s32.totalorder %v2022_v36, 0 }
 0x336   :  { %vm6602_vm5 = vcmp.eq.s32.totalorder %v2024_v30, 0  ;;  %vm2027_vm6 = vcmp.eq.s32.totalorder %v2023_v17, 0  ;;  %vm6606_vm7 = vcmp.eq.s32.totalorder %v2025_v14, 0 }
 0x3af   :  { %v1941_v33 = vpop.f32.mrf.mxu0  ;;  %v2012_v26 = vpop.f32.mrf.mxu1 }
 0x3b0   :  { %v1942_v20 = vadd.f32 %v1941_v33, %v1858_v42  ;;  %v2013_v23 = vadd.f32 %v2012_v26, %v1866_v0 }
 0x3b1   :  { %v1943_v9 = vpop.f32.mrf.mxu0  ;;  %v2014_v3 = vpop.f32.mrf.mxu1 }
 0x3b2   :  { %v1944_v1 = vadd.f32 %v1943_v9, %v1862_v38  ;;  %v2015_v60 = vadd.f32 %v2014_v3, %v1870_v29  ;;  %v2046_v45 = vrot.slane %v1942_v20, 2  ;;  %v2048_v49 = vrot.slane %v2013_v23, 2 }
 0x3b3   :  { %v2034_v26 = vrot.slane %v1942_v20, 6  ;;  %v2036_v51 = vrot.slane %v2013_v23, 6 }
 0x3b4   :  { %v6610_v33 = vsel %vm2026_vm4, %v1942_v20, %v2046_v45  ;;  %v6614_v0 = vsel %vm6602_vm5, %v2013_v23, %v2048_v49  ;;  %v2047_v9 = vrot.slane %v1944_v1, 2  ;;  %v2049_v29 = vrot.slane %v2015_v60, 2 }
 0x3b5   :  { %v2035_v17 = vrot.slane %v1944_v1, 6  ;;  %v6622_v14 = vsel %vm2026_vm4, %v1942_v20, %v2034_v26  ;;  %v6630_v45 = vsel %vm6602_vm5, %v2013_v23, %v2036_v51  ;;  %v2037_v49 = vrot.slane %v2015_v60, 6 }
 0x3b6   :  { %v6616_v3 = vsel %vm2027_vm6, %v1944_v1, %v2047_v9  ;;  %v6620_v30 = vsel %vm6606_vm7, %v2015_v60, %v2049_v29  ;;  %7119 = vst [vmem:[#allocation28_spill] sm:$0xff] %v6622_v14  ;;  %7121 = vst [vmem:[#allocation30_spill] sm:$0xff] %v6630_v45 }
 0x3b7   :  { %v6625_v41 = vsel %vm2027_vm6, %v1944_v1, %v2035_v17  ;;  %v6635_v1 = vsel %vm6606_vm7, %v2015_v60, %v2037_v49 }
 0x3b8   :  { %7120 = vst [vmem:[#allocation29_spill] sm:$0xff] %v6625_v41  ;;  %7122 = vst [vmem:[#allocation31_spill] sm:$0xff] %v6635_v1 }
 0x3d0   :  { %v2188_v36 = vpop.f32.mrf.mxu0  ;;  %v2259_v53 = vpop.f32.mrf.mxu1 }
 0x3d1   :  { %v2264_v38 = vadd.f32 %v2188_v36, %v6622_v14  ;;  %v2266_v20 = vadd.f32 %v2259_v53, %v6630_v45  ;;  %v7141_v45 = vld [vmem:[#allocation22_spill] sm:$0xff]  ;;  %v7143_v14 = vld [vmem:[#allocation24_spill] sm:$0xff] }
 0x3d2   :  { %v2190_v42 = vpop.f32.mrf.mxu0  ;;  %v2261_v9 = vpop.f32.mrf.mxu1 }
 0x3d3   :  { %v3167_v46 = vmul.f32 -1.442695, %v2264_v38  ;;  %v2265_v47 = vadd.f32 %v2190_v42, %v6625_v41  ;;  %v3169_v29 = vmul.f32 -1.442695, %v2266_v20  ;;  %v2267_v17 = vadd.f32 %v2261_v9, %v6635_v1  ;;  %v7123_v9 = vld [vmem:[#allocation4_spill] sm:$0xff]  ;;  %v7140_v1 = vld [vmem:[#allocation21_spill] sm:$0xff] }
 0x3d4   :  { %v7142_v41 = vld [vmem:[#allocation23_spill] sm:$0xff] }
 0x3d5   :  { %4350 = vpow2.f32 %v3167_v46  ;;  %v3168_v50 = vmul.f32 -1.442695, %v2265_v47 }
 0x3d7   :  { %4352 = vpow2.f32 %v3168_v50 }
 0x3d8   :  { %4354 = vpow2.f32 %v3169_v29  ;;  %v7124_v29 = vld [vmem:[#allocation5_spill] sm:$0xff] }
 0x3e2   :  { %v4351_v26 = vpop.eup %4350 }
 0x3e3   :  { %v2277_v36 = vadd.f32 1.0, %v4351_v26  ;;  %v7125_v26 = vld [vmem:[#allocation6_spill] sm:$0xff] }
 0x3e4   :  { %v4353_v38 = vpop.eup %4352 }
 0x3e5   :  { %4356 = vrcp.f32 %v2277_v36  ;;  %v2278_v42 = vadd.f32 1.0, %v4353_v38  ;;  %v4355_v23 = vpop.eup %4354  ;;  %v7127_v36 = vld [vmem:[#allocation8_spill] sm:$0xff]  ;;  %v7128_v38 = vld [vmem:[#allocation9_spill] sm:$0xff] }
 0x3e6   :  { %4358 = vtanh.f32 %v2267_v17  ;;  %v2279_v50 = vadd.f32 1.0, %v4355_v23  ;;  %v7126_v17 = vld [vmem:[#allocation7_spill] sm:$0xff] }
 0x3e7   :  { %4360 = vrcp.f32 %v2278_v42  ;;  %v7129_v42 = vld [vmem:[#allocation10_spill] sm:$0xff]  ;;  %v7130_v23 = vld [vmem:[#allocation11_spill] sm:$0xff] }
 0x3e8   :  { %4362 = vrcp.f32 %v2279_v50  ;;  %v7134_v50 = vld [vmem:[#allocation15_spill] sm:$0xff] }
 0x3f2   :  { %v4357_v48 = vpop.eup %4356 }
 0x3f3   :  { %v4359_v46 = vpop.eup %4358 }
 0x3f4   :  { %v4361_v47 = vpop.eup %4360  ;;  %v2288_v53 = vmul.f32 %v4359_v46, %v4357_v48  ;;  %v7131_v48 = vld [vmem:[#allocation12_spill] sm:$0xff]  ;;  %v7132_v46 = vld [vmem:[#allocation13_spill] sm:$0xff] }
 0x3f5   :  { %v2287_v51 = vmul.f32 0.0, %v4361_v47  ;;  %v4363_v60 = vpop.eup %4362  ;;  %v7133_v47 = vld [vmem:[#allocation14_spill] sm:$0xff] }
 0x3f7   :  { %v6638_v44 = vadd.f32 %v2288_v53, %v2287_v51  ;;  %v7135_v51 = vld [vmem:[#allocation16_spill] sm:$0xff]  ;;  %v7136_v53 = vld [vmem:[#allocation17_spill] sm:$0xff] }
 0x3f9   :  { %4364 = vtanh.f32 %v6638_v44 }
 0x406   :  { %v4365_v20 = vpop.eup %4364 }
 0x407   :  { %v2291_v49 = vmul.f32 %v4365_v20, %v4363_v60  ;;  %v7137_v60 = vld [vmem:[#allocation18_spill] sm:$0xff]  ;;  %v7138_v20 = vld [vmem:[#allocation19_spill] sm:$0xff] }
 0x409   :  { %2357 = vmatmul.mubr.f32.vlgmr.msra.gmra.mxu0 %v2291_v49  ;;  %2428 = vmatmul.mubr.f32.vlgmr.msra.gmra.mxu1 %v2291_v49  ;;  %v7139_v49 = vld [vmem:[#allocation20_spill] sm:$0xff] }
 0x40a   :  { %2481 = vmatpush1.msra.mxu0 %v6158_v54  ;;  %2552 = vmatpush1.msra.mxu1 %v6163_v59 }
 0x40b   :  { %2482 = vmatprep.subr.mxu0 %v6168_v6  ;;  %2553 = vmatprep.subr.mxu1 %v6173_v11 }
 0x40c   :  { %2483 = vmatpush1.msra.mxu0 %v6178_v56  ;;  %2554 = vmatpush1.msra.mxu1 %v6183_v61 }
 0x40d   :  { %2484 = vmatprep.subr.mxu0 %v6190_v16  ;;  %2555 = vmatprep.subr.mxu1 %v6195_v22 }
 0x40e   :  { %2485 = vmatpush1.msra.mxu0 %v6202_v40  ;;  %2556 = vmatpush1.msra.mxu1 %v6207_v63 }
 0x40f   :  { %2486 = vmatprep.subr.mxu0 %v6214_v2  ;;  %2557 = vmatprep.subr.mxu1 %v6219_v5 }
 0x410   :  { %2487 = vmatpush1.msra.mxu0 %v6226_v8  ;;  %2558 = vmatpush1.msra.mxu1 %v6231_v10 }
 0x411   :  { %2488 = vmatprep.subr.mxu0 %v6238_v13  ;;  %2559 = vmatprep.subr.mxu1 %v6243_v15 }
 0x412   :  { %2489 = vmatpush1.msra.mxu0 %v6250_v18  ;;  %2560 = vmatpush1.msra.mxu1 %v6255_v21 }
 0x413   :  { %2490 = vmatprep.subr.mxu0 %v6262_v24  ;;  %2561 = vmatprep.subr.mxu1 %v6267_v27 }
 0x414   :  { %2491 = vmatpush1.msra.mxu0 %v6274_v28  ;;  %2562 = vmatpush1.msra.mxu1 %v6279_v32 }
 0x415   :  { %2492 = vmatprep.subr.mxu0 %v6286_v34  ;;  %2563 = vmatprep.subr.mxu1 %v6291_v37 }
 0x416   :  { %2493 = vmatpush1.msra.mxu0 %v6298_v39  ;;  %2564 = vmatpush1.msra.mxu1 %v6303_v52 }
 0x417   :  { %2494 = vmatprep.subr.mxu0 %v6310_v55  ;;  %2565 = vmatprep.subr.mxu1 %v6315_v43 }
 0x418   :  { %2495 = vmatpush1.msra.mxu0 %v6322_v57  ;;  %2566 = vmatpush1.msra.mxu1 %v6327_v58 }
 0x419   :  { %2496 = vmatprep.subr.mxu0 %v6334_v4  ;;  %2567 = vmatprep.subr.mxu1 %v6339_v7 }
 0x41a   :  { %2497 = vmatpush1.msra.mxu0 %v6346_v12  ;;  %2568 = vmatpush1.msra.mxu1 %v6351_v19 }
 0x41b   :  { %2498 = vmatprep.subr.mxu0 %v6358_v25  ;;  %2569 = vmatprep.subr.mxu1 %v6363_v62 }
 0x41c   :  { %2499 = vmatpush1.msra.mxu0 %v6370_v31  ;;  %2570 = vmatpush1.msra.mxu1 %v6375_v35 }
 0x41d   :  { %2500 = vmatprep.subr.mxu0 %v7123_v9  ;;  %2571 = vmatprep.subr.mxu1 %v7124_v29 }
 0x41e   :  { %2501 = vmatpush1.msra.mxu0 %v7125_v26  ;;  %2572 = vmatpush1.msra.mxu1 %v7126_v17 }
 0x41f   :  { %2502 = vmatprep.subr.mxu0 %v7127_v36  ;;  %2573 = vmatprep.subr.mxu1 %v7128_v38 }
 0x420   :  { %2503 = vmatpush1.msra.mxu0 %v7129_v42  ;;  %2574 = vmatpush1.msra.mxu1 %v7130_v23 }
 0x421   :  { %2504 = vmatprep.subr.mxu0 %v7131_v48  ;;  %2575 = vmatprep.subr.mxu1 %v7132_v46 }
 0x422   :  { %2505 = vmatpush1.msra.mxu0 %v7133_v47  ;;  %2576 = vmatpush1.msra.mxu1 %v7134_v50  ;;  %v7144_v47 = vld [vmem:[#allocation25_spill] sm:$0xff]  ;;  %v7145_v50 = vld [vmem:[#allocation26_spill] sm:$0xff] }
 0x423   :  { %2506 = vmatprep.subr.mxu0 %v7135_v51  ;;  %2577 = vmatprep.subr.mxu1 %v7136_v53  ;;  %v7146_v51 = vmov 0.0   ;;  %v7147_v53 = vld [vmem:[#allocation27_spill] sm:$0xff] }
 0x424   :  { %2507 = vmatpush1.msra.mxu0 %v7137_v60  ;;  %2578 = vmatpush1.msra.mxu1 %v7138_v20  ;;  %v7148_v20 = vld [vmem:[#allocation2_spill] sm:$0xff] }
 0x425   :  { %2508 = vmatprep.subr.mxu0 %v7139_v49  ;;  %2579 = vmatprep.subr.mxu1 %v7140_v1  ;;  %v7149_v49 = vld [vmem:[#allocation3_spill] sm:$0xff] }
 0x426   :  { %2509 = vmatpush1.msra.mxu0 %v7141_v45  ;;  %2580 = vmatpush1.msra.mxu1 %v7142_v41 }
 0x427   :  { %2510 = vmatprep.subr.mxu0 %v7143_v14  ;;  %2581 = vmatprep.subr.mxu1 %v7144_v47 }
 0x428   :  { %2511 = vmatpush1.msra.mxu0 %v7145_v50  ;;  %2544 = vmatprep.mubr.f32.mxu0 %v7146_v51 }
 0x429   :  { %2582 = vmatpush1.msra.mxu1 %v7147_v53  ;;  %2615 = vmatprep.mubr.f32.mxu1 %v7146_v51 }
 0x42a   :  { %2668 = vmatprep.subr.mxu0 %v7148_v20  ;;  %2739 = vmatprep.subr.mxu1 %v7149_v49 }
 0x4c9   :  { %v2358_v1 = vpop.f32.mrf.mxu0  ;;  %v2429_v50 = vpop.f32.mrf.mxu1 }
 0x4ca   :  { %v2438_v45 = vrot.slane %v2358_v1, 6  ;;  %v2440_v53 = vrot.slane %v2429_v50, 6 }
 0x4cb   :  { %v2360_v60 = vpop.f32.mrf.mxu0  ;;  %v2431_v23 = vpop.f32.mrf.mxu1 }
 0x4cc   :  { %v2446_v41 = vadd.f32 %v2438_v45, %v6610_v33  ;;  %v2439_v14 = vrot.slane %v2360_v60, 6  ;;  %v2448_v51 = vadd.f32 %v2440_v53, %v6614_v0  ;;  %v2441_v20 = vrot.slane %v2431_v23, 6 }
 0x4ce   :  { %v3170_v46 = vmul.f32 -1.442695, %v2446_v41  ;;  %v2447_v47 = vadd.f32 %v2439_v14, %v6616_v3  ;;  %v3172_v42 = vmul.f32 -1.442695, %v2448_v51  ;;  %v2449_v1 = vadd.f32 %v2441_v20, %v6620_v30 }
 0x4d0   :  { %4366 = vpow2.f32 %v3170_v46  ;;  %v3171_v48 = vmul.f32 -1.442695, %v2447_v47 }
 0x4d2   :  { %4368 = vpow2.f32 %v3171_v48  ;;  %v2470_v48 = vrot.slane %v6638_v44, 6 }
 0x4d3   :  { %4370 = vpow2.f32 %v3172_v42 }
 0x4dd   :  { %v4367_v49 = vpop.eup %4366 }
 0x4de   :  { %v2459_v38 = vadd.f32 1.0, %v4367_v49 }
 0x4df   :  { %v4369_v36 = vpop.eup %4368 }
 0x4e0   :  { %4372 = vrcp.f32 %v2459_v38  ;;  %v2460_v41 = vadd.f32 1.0, %v4369_v36  ;;  %v4371_v14 = vpop.eup %4370 }
 0x4e1   :  { %4374 = vtanh.f32 %v2449_v1  ;;  %v2461_v50 = vadd.f32 1.0, %v4371_v14 }
 0x4e2   :  { %4376 = vrcp.f32 %v2460_v41 }
 0x4e3   :  { %4378 = vrcp.f32 %v2461_v50 }
 0x4ed   :  { %v4373_v45 = vpop.eup %4372 }
 0x4ee   :  { %v4375_v46 = vpop.eup %4374 }
 0x4ef   :  { %v4377_v47 = vpop.eup %4376  ;;  %v2473_v23 = vmul.f32 %v4375_v46, %v4373_v45 }
 0x4f0   :  { %v2472_v53 = vmul.f32 %v4377_v47, %v2470_v48  ;;  %v4379_v60 = vpop.eup %4378 }
 0x4f2   :  { %v6712_v51 = vadd.f32 %v2473_v23, %v2472_v53 }
 0x4f4   :  { %4380 = vtanh.f32 %v6712_v51  ;;  %v2658_v14 = vrot.slane %v6712_v51, 6  ;;  %v2885_v51 = vld [vmem:[%s7017_s10 + $0x78] sm:$0xff] }
 0x501   :  { %v4381_v42 = vpop.eup %4380 }
 0x502   :  { %v2476_v38 = vmul.f32 %v4381_v42, %v4379_v60 }
 0x504   :  { %v2478_v36 = vrot.slane %v2476_v38, 2  ;;  %v2884_v38 = vld [vmem:[%s7017_s10 + $0x70] sm:$0xff] }
 0x506   :  { %2545 = vmatmul.mubr.f32.vlgmr.msra.gmra.mxu0 %v2478_v36  ;;  %2616 = vmatmul.mubr.f32.vlgmr.msra.gmra.mxu1 %v2478_v36  ;;  %v2868_v36 = vld [vmem:[%s7018_s9 + $0x78] sm:$0xff] }
 0x507   :  { %2669 = vmatpush1.msra.mxu0 %v6158_v54  ;;  %2740 = vmatpush1.msra.mxu1 %v6163_v59  ;;  %v7150_v54 = vld [vmem:[#allocation8_spill] sm:$0xff]  ;;  %v7151_v59 = vld [vmem:[#allocation9_spill] sm:$0xff] }
 0x508   :  { %2670 = vmatprep.subr.mxu0 %v6168_v6  ;;  %2741 = vmatprep.subr.mxu1 %v6173_v11  ;;  %v7152_v6 = vld [vmem:[#allocation10_spill] sm:$0xff]  ;;  %v7153_v11 = vld [vmem:[#allocation11_spill] sm:$0xff] }
 0x509   :  { %2671 = vmatpush1.msra.mxu0 %v6178_v56  ;;  %2742 = vmatpush1.msra.mxu1 %v6183_v61  ;;  %v7154_v56 = vld [vmem:[#allocation12_spill] sm:$0xff]  ;;  %v7155_v61 = vld [vmem:[#allocation13_spill] sm:$0xff] }
 0x50a   :  { %2672 = vmatprep.subr.mxu0 %v6190_v16  ;;  %2743 = vmatprep.subr.mxu1 %v6195_v22  ;;  %v7156_v16 = vld [vmem:[#allocation14_spill] sm:$0xff]  ;;  %v7157_v22 = vld [vmem:[#allocation15_spill] sm:$0xff] }
 0x50b   :  { %2673 = vmatpush1.msra.mxu0 %v6202_v40  ;;  %2744 = vmatpush1.msra.mxu1 %v6207_v63  ;;  %v7158_v40 = vld [vmem:[#allocation16_spill] sm:$0xff]  ;;  %v7159_v63 = vld [vmem:[#allocation17_spill] sm:$0xff] }
 0x50c   :  { %2674 = vmatprep.subr.mxu0 %v6214_v2  ;;  %2745 = vmatprep.subr.mxu1 %v6219_v5  ;;  %v7160_v2 = vld [vmem:[#allocation18_spill] sm:$0xff]  ;;  %v7161_v5 = vld [vmem:[#allocation19_spill] sm:$0xff] }
 0x50d   :  { %2675 = vmatpush1.msra.mxu0 %v6226_v8  ;;  %2746 = vmatpush1.msra.mxu1 %v6231_v10  ;;  %v7162_v8 = vld [vmem:[#allocation20_spill] sm:$0xff]  ;;  %v7163_v10 = vld [vmem:[#allocation21_spill] sm:$0xff] }
 0x50e   :  { %2676 = vmatprep.subr.mxu0 %v6238_v13  ;;  %2747 = vmatprep.subr.mxu1 %v6243_v15  ;;  %v7164_v13 = vld [vmem:[#allocation22_spill] sm:$0xff]  ;;  %v7165_v15 = vld [vmem:[#allocation23_spill] sm:$0xff] }
 0x50f   :  { %2677 = vmatpush1.msra.mxu0 %v6250_v18  ;;  %2748 = vmatpush1.msra.mxu1 %v6255_v21  ;;  %v7166_v18 = vld [vmem:[#allocation24_spill] sm:$0xff]  ;;  %v7167_v21 = vld [vmem:[#allocation25_spill] sm:$0xff] }
 0x510   :  { %2678 = vmatprep.subr.mxu0 %v6262_v24  ;;  %2749 = vmatprep.subr.mxu1 %v6267_v27  ;;  %v7168_v24 = vld [vmem:[#allocation26_spill] sm:$0xff]  ;;  %v7169_v27 = vmov 0.0  }
 0x511   :  { %2679 = vmatpush1.msra.mxu0 %v6274_v28  ;;  %2750 = vmatpush1.msra.mxu1 %v6279_v32  ;;  %v7170_v28 = vld [vmem:[#allocation27_spill] sm:$0xff] }
 0x512   :  { %2680 = vmatprep.subr.mxu0 %v6286_v34  ;;  %2751 = vmatprep.subr.mxu1 %v6291_v37 }
 0x513   :  { %2681 = vmatpush1.msra.mxu0 %v6298_v39  ;;  %2752 = vmatpush1.msra.mxu1 %v6303_v52  ;;  %v7171_v39 = vld [vmem:[#allocation28_spill] sm:$0xff] }
 0x514   :  { %2682 = vmatprep.subr.mxu0 %v6310_v55  ;;  %2753 = vmatprep.subr.mxu1 %v6315_v43 }
 0x515   :  { %2683 = vmatpush1.msra.mxu0 %v6322_v57  ;;  %2754 = vmatpush1.msra.mxu1 %v6327_v58  ;;  %v7172_v57 = vld [vmem:[#allocation29_spill] sm:$0xff] }
 0x516   :  { %2684 = vmatprep.subr.mxu0 %v6334_v4  ;;  %2755 = vmatprep.subr.mxu1 %v6339_v7 }
 0x517   :  { %2685 = vmatpush1.msra.mxu0 %v6346_v12  ;;  %2756 = vmatpush1.msra.mxu1 %v6351_v19 }
 0x518   :  { %2686 = vmatprep.subr.mxu0 %v6358_v25  ;;  %2757 = vmatprep.subr.mxu1 %v6363_v62  ;;  %v7173_v25 = vld [vmem:[#allocation30_spill] sm:$0xff] }
 0x519   :  { %2687 = vmatpush1.msra.mxu0 %v6370_v31  ;;  %2758 = vmatpush1.msra.mxu1 %v6375_v35 }
 0x51a   :  { %2688 = vmatprep.subr.mxu0 %v7123_v9  ;;  %2759 = vmatprep.subr.mxu1 %v7124_v29  ;;  %v7174_v9 = vld [vmem:[#allocation31_spill] sm:$0xff] }
 0x51b   :  { %2689 = vmatpush1.msra.mxu0 %v7125_v26  ;;  %2760 = vmatpush1.msra.mxu1 %v7126_v17 }
 0x51c   :  { %2690 = vmatprep.subr.mxu0 %v7150_v54  ;;  %2761 = vmatprep.subr.mxu1 %v7151_v59  ;;  %v2883_v54 = vld [vmem:[%s7017_s10 + $0x68] sm:$0xff]  ;;  %v2867_v59 = vld [vmem:[%s7018_s9 + $0x70] sm:$0xff] }
 0x51d   :  { %2691 = vmatpush1.msra.mxu0 %v7152_v6  ;;  %2762 = vmatpush1.msra.mxu1 %v7153_v11  ;;  %v2882_v6 = vld [vmem:[%s7017_s10 + $0x60] sm:$0xff]  ;;  %v2866_v11 = vld [vmem:[%s7018_s9 + $0x68] sm:$0xff] }
 0x51e   :  { %2692 = vmatprep.subr.mxu0 %v7154_v56  ;;  %2763 = vmatprep.subr.mxu1 %v7155_v61  ;;  %v2881_v56 = vld [vmem:[%s7017_s10 + $0x58] sm:$0xff]  ;;  %v2865_v61 = vld [vmem:[%s7018_s9 + $0x60] sm:$0xff] }
 0x51f   :  { %2693 = vmatpush1.msra.mxu0 %v7156_v16  ;;  %2764 = vmatpush1.msra.mxu1 %v7157_v22  ;;  %v2880_v16 = vld [vmem:[%s7017_s10 + $0x50] sm:$0xff]  ;;  %v2864_v22 = vld [vmem:[%s7018_s9 + $0x58] sm:$0xff] }
 0x520   :  { %2694 = vmatprep.subr.mxu0 %v7158_v40  ;;  %2765 = vmatprep.subr.mxu1 %v7159_v63  ;;  %v2879_v40 = vld [vmem:[%s7017_s10 + $0x48] sm:$0xff]  ;;  %v2863_v63 = vld [vmem:[%s7018_s9 + $0x50] sm:$0xff] }
 0x521   :  { %2695 = vmatpush1.msra.mxu0 %v7160_v2  ;;  %2766 = vmatpush1.msra.mxu1 %v7161_v5  ;;  %v2878_v2 = vld [vmem:[%s7017_s10 + $0x40] sm:$0xff]  ;;  %v2862_v5 = vld [vmem:[%s7018_s9 + $0x48] sm:$0xff] }
 0x522   :  { %2696 = vmatprep.subr.mxu0 %v7162_v8  ;;  %2767 = vmatprep.subr.mxu1 %v7163_v10  ;;  %v2877_v8 = vld [vmem:[%s7017_s10 + $0x38] sm:$0xff]  ;;  %v2861_v10 = vld [vmem:[%s7018_s9 + $0x40] sm:$0xff] }
 0x523   :  { %2697 = vmatpush1.msra.mxu0 %v7164_v13  ;;  %2768 = vmatpush1.msra.mxu1 %v7165_v15  ;;  %v2876_v13 = vld [vmem:[%s7017_s10 + $0x30] sm:$0xff]  ;;  %v2860_v15 = vld [vmem:[%s7018_s9 + $0x38] sm:$0xff] }
 0x524   :  { %2698 = vmatprep.subr.mxu0 %v7166_v18  ;;  %2769 = vmatprep.subr.mxu1 %v7167_v21  ;;  %v2875_v18 = vld [vmem:[%s7017_s10 + $0x28] sm:$0xff]  ;;  %v2859_v21 = vld [vmem:[%s7018_s9 + $0x30] sm:$0xff] }
 0x525   :  { %2699 = vmatpush1.msra.mxu0 %v7168_v24  ;;  %2732 = vmatprep.mubr.f32.mxu0 %v7169_v27  ;;  %v2874_v24 = vld [vmem:[%s7017_s10 + $0x20] sm:$0xff] }
 0x526   :  { %2770 = vmatpush1.msra.mxu1 %v7170_v28  ;;  %2803 = vmatprep.mubr.f32.mxu1 %v7169_v27  ;;  %v2858_v28 = vld [vmem:[%s7018_s9 + $0x28] sm:$0xff] }
 0x527   :  { %4243 = vmatprep.subr.mxu0 %v7169_v27  ;;  %4278 = vmatprep.subr.mxu1 %v7169_v27 }
 0x5c6   :  { %v2546_v32 = vpop.f32.mrf.mxu0  ;;  %v2617_v4 = vpop.f32.mrf.mxu1 }
 0x5c7   :  { %v2626_v34 = vrot.slane %v2546_v32, 4  ;;  %v2628_v12 = vrot.slane %v2617_v4, 4  ;;  %v2873_v32 = vld [vmem:[%s7017_s10 + $0x18] sm:$0xff]  ;;  %v2853_v4 = vld [vmem:[%s7018_s9] sm:$0xff] }
 0x5c8   :  { %v2548_v37 = vpop.f32.mrf.mxu0  ;;  %v2619_v19 = vpop.f32.mrf.mxu1 }
 0x5c9   :  { %v2634_v52 = vadd.f32 %v2626_v34, %v7171_v39  ;;  %v2627_v55 = vrot.slane %v2548_v37, 4  ;;  %v2636_v62 = vadd.f32 %v2628_v12, %v7173_v25  ;;  %v2629_v31 = vrot.slane %v2619_v19, 4  ;;  %v2857_v34 = vld [vmem:[%s7018_s9 + $0x20] sm:$0xff]  ;;  %v2872_v37 = vld [vmem:[%s7017_s10 + $0x10] sm:$0xff]  ;;  %v2856_v39 = vld [vmem:[%s7018_s9 + $0x18] sm:$0xff] }
 0x5ca   :  { %v3052_v12 = vld [vmem:[%s7020_s12 + $0x70] sm:$0xff]  ;;  %v3051_v19 = vld [vmem:[%s7020_s12 + $0x68] sm:$0xff]  ;;  %v3050_v25 = vld [vmem:[%s7020_s12 + $0x60] sm:$0xff] }
 0x5cb   :  { %v3173_v43 = vmul.f32 -1.442695, %v2634_v52  ;;  %v2635_v58 = vadd.f32 %v2627_v55, %v7172_v57  ;;  %v3175_v35 = vmul.f32 -1.442695, %v2636_v62  ;;  %v2637_v29 = vadd.f32 %v2629_v31, %v7174_v9  ;;  %v2871_v52 = vld [vmem:[%s7017_s10 + $0x8] sm:$0xff]  ;;  %v2855_v55 = vld [vmem:[%s7018_s9 + $0x10] sm:$0xff] }
 0x5cc   :  { %v2854_v57 = vld [vmem:[%s7018_s9 + $0x8] sm:$0xff]  ;;  %v3049_v62 = vld [vmem:[%s7020_s12 + $0x58] sm:$0xff]  ;;  %v3048_v31 = vld [vmem:[%s7020_s12 + $0x50] sm:$0xff] }
 0x5cd   :  { %4382 = vpow2.f32 %v3173_v43  ;;  %v3174_v7 = vmul.f32 -1.442695, %v2635_v58  ;;  %v2870_v43 = vld [vmem:[%s7017_s10] sm:$0xff]  ;;  %v3045_v9 = vld [vmem:[%s7020_s12 + $0x38] sm:$0xff] }
 0x5ce   :  { %v2869_v58 = vld [vmem:[%s7019_s1] sm:$0x3] }
 0x5cf   :  { %4384 = vpow2.f32 %v3174_v7  ;;  %v3053_v7 = vld [vmem:[%s7020_s12 + $0x78] sm:$0xff] }
 0x5d0   :  { %4386 = vpow2.f32 %v3175_v35  ;;  %v3047_v35 = vld [vmem:[%s7020_s12 + $0x48] sm:$0xff] }
 0x5da   :  { %v4383_v44 = vpop.eup %4382 }
 0x5db   :  { %v2647_v26 = vadd.f32 1.0, %v4383_v44  ;;  %v3046_v44 = vld [vmem:[%s7020_s12 + $0x40] sm:$0xff] }
 0x5dc   :  { %v4385_v17 = vpop.eup %4384 }
 0x5dd   :  { %4388 = vrcp.f32 %v2647_v26  ;;  %v2648_v20 = vadd.f32 1.0, %v4385_v17  ;;  %v4387_v49 = vpop.eup %4386  ;;  %v3043_v26 = vld [vmem:[%s7020_s12 + $0x28] sm:$0xff]  ;;  %v3042_v17 = vld [vmem:[%s7020_s12 + $0x20] sm:$0xff] }
 0x5de   :  { %4390 = vtanh.f32 %v2637_v29  ;;  %v2649_v46 = vadd.f32 1.0, %v4387_v49  ;;  %v3044_v29 = vld [vmem:[%s7020_s12 + $0x30] sm:$0xff] }
 0x5df   :  { %4392 = vrcp.f32 %v2648_v20 }
 0x5e0   :  { %4394 = vrcp.f32 %v2649_v46 }
 0x5ea   :  { %v4389_v1 = vpop.eup %4388 }
 0x5eb   :  { %v4391_v41 = vpop.eup %4390 }
 0x5ec   :  { %v4393_v45 = vpop.eup %4392  ;;  %v2661_v47 = vmul.f32 %v4391_v41, %v4389_v1 }
 0x5ed   :  { %v2660_v48 = vmul.f32 %v4393_v45, %v2658_v14  ;;  %v4395_v53 = vpop.eup %4394 }
 0x5ef   :  { %v6786_v50 = vadd.f32 %v2661_v47, %v2660_v48 }
 0x5f1   :  { %4396 = vtanh.f32 %v6786_v50 }
 0x5fe   :  { %v4397_v23 = vpop.eup %4396 }
 0x5ff   :  { %v2664_v60 = vmul.f32 %v4397_v23, %v4395_v53 }
 0x601   :  { %v2666_v42 = vrot.slane %v2664_v60, 4 }
 0x603   :  { %2733 = vmatmul.mubr.f32.vlgmr.msra.gmra.mxu0 %v2666_v42  ;;  %2804 = vmatmul.mubr.f32.vlgmr.msra.gmra.mxu1 %v2666_v42 }
 0x604   :  { %4275 = vmatprep.mubr.msk.f32.mxu0 %vm4435_vm0, %v7169_v27  ;;  %4310 = vmatprep.mubr.msk.f32.mxu1 %vm4435_vm0, %v7169_v27 }
 0x605   :  { %4244 = vmatpush3.msra.mxu0 %v2885_v51  ;;  %4279 = vmatpush3.msra.mxu1 %v2868_v36 }
 0x606   :  { %4245 = vmatprep.subr.mxu0 %v7169_v27  ;;  %4280 = vmatprep.subr.mxu1 %v7169_v27 }
 0x607   :  { %4246 = vmatpush3.msra.mxu0 %v2884_v38  ;;  %4281 = vmatpush3.msra.mxu1 %v2867_v59 }
 0x608   :  { %4247 = vmatprep.subr.mxu0 %v7169_v27  ;;  %4282 = vmatprep.subr.mxu1 %v7169_v27 }
 0x609   :  { %4248 = vmatpush3.msra.mxu0 %v2883_v54  ;;  %4283 = vmatpush3.msra.mxu1 %v2866_v11 }
 0x60a   :  { %4249 = vmatprep.subr.mxu0 %v7169_v27  ;;  %4284 = vmatprep.subr.mxu1 %v7169_v27 }
 0x60b   :  { %4250 = vmatpush3.msra.mxu0 %v2882_v6  ;;  %4285 = vmatpush3.msra.mxu1 %v2865_v61 }
 0x60c   :  { %4251 = vmatprep.subr.mxu0 %v7169_v27  ;;  %4286 = vmatprep.subr.mxu1 %v7169_v27 }
 0x60d   :  { %4252 = vmatpush3.msra.mxu0 %v2881_v56  ;;  %4287 = vmatpush3.msra.mxu1 %v2864_v22  ;;  %v2846_v56 = vrot.slane %v6786_v50, 6  ;;  %v3040_v50 = vld [vmem:[%s7020_s12 + $0x10] sm:$0xff] }
 0x60e   :  { %4253 = vmatprep.subr.mxu0 %v7169_v27  ;;  %4288 = vmatprep.subr.mxu1 %v7169_v27 }
 0x60f   :  { %4254 = vmatpush3.msra.mxu0 %v2880_v16  ;;  %4289 = vmatpush3.msra.mxu1 %v2863_v63 }
 0x610   :  { %4255 = vmatprep.subr.mxu0 %v7169_v27  ;;  %4290 = vmatprep.subr.mxu1 %v7169_v27 }
 0x611   :  { %4256 = vmatpush3.msra.mxu0 %v2879_v40  ;;  %4291 = vmatpush3.msra.mxu1 %v2862_v5 }
 0x612   :  { %4257 = vmatprep.subr.mxu0 %v7169_v27  ;;  %4292 = vmatprep.subr.mxu1 %v7169_v27 }
 0x613   :  { %4258 = vmatpush3.msra.mxu0 %v2878_v2  ;;  %4293 = vmatpush3.msra.mxu1 %v2861_v10  ;;  %v3041_v10 = vld [vmem:[%s7020_s12 + $0x18] sm:$0xff] }
 0x614   :  { %4259 = vmatprep.subr.mxu0 %v7169_v27  ;;  %4294 = vmatprep.subr.mxu1 %v7169_v27 }
 0x615   :  { %4260 = vmatpush3.msra.mxu0 %v2877_v8  ;;  %4295 = vmatpush3.msra.mxu1 %v2860_v15  ;;  %v3039_v15 = vld [vmem:[%s7020_s12 + $0x8] sm:$0xff] }
 0x616   :  { %4261 = vmatprep.subr.mxu0 %v7169_v27  ;;  %4296 = vmatprep.subr.mxu1 %v7169_v27 }
 0x617   :  { %4262 = vmatpush3.msra.mxu0 %v2876_v13  ;;  %4297 = vmatpush3.msra.mxu1 %v2859_v21 }
 0x618   :  { %4263 = vmatprep.subr.mxu0 %v7169_v27  ;;  %4298 = vmatprep.subr.mxu1 %v7169_v27 }
 0x619   :  { %4264 = vmatpush3.msra.mxu0 %v2875_v18  ;;  %4299 = vmatpush3.msra.mxu1 %v2858_v28  ;;  %v3038_v18 = vld [vmem:[%s7020_s12] sm:$0xff] }
 0x61a   :  { %4265 = vmatprep.subr.mxu0 %v7169_v27  ;;  %4300 = vmatprep.subr.mxu1 %v7169_v27 }
 0x61b   :  { %4266 = vmatpush3.msra.mxu0 %v2874_v24  ;;  %4301 = vmatpush3.msra.mxu1 %v2857_v34  ;;  %v3179_v24 = vld [vmem:[%s7021_s11] ss:$0 sm:$0xff] }
 0x61c   :  { %4267 = vmatprep.subr.mxu0 %v7169_v27  ;;  %4302 = vmatprep.subr.mxu1 %v7169_v27 }
 0x61d   :  { %4268 = vmatpush3.msra.mxu0 %v2873_v32  ;;  %4303 = vmatpush3.msra.mxu1 %v2856_v39  ;;  %v3180_v39 = vld [vmem:[%s7022_s13] ss:$0 sm:$0xff] }
 0x61e   :  { %4269 = vmatprep.subr.mxu0 %v7169_v27  ;;  %4304 = vmatprep.subr.mxu1 %v7169_v27 }
 0x61f   :  { %4270 = vmatpush3.msra.mxu0 %v2872_v37  ;;  %4305 = vmatpush3.msra.mxu1 %v2855_v55 }
 0x620   :  { %4271 = vmatprep.subr.mxu0 %v7169_v27  ;;  %4306 = vmatprep.subr.mxu1 %v7169_v27 }
 0x621   :  { %4272 = vmatpush3.msra.mxu0 %v2871_v52  ;;  %4307 = vmatpush3.msra.mxu1 %v2854_v57 }
 0x622   :  { %4273 = vmatprep.subr.mxu0 %v7169_v27  ;;  %4308 = vmatprep.subr.mxu1 %v7169_v27 }
 0x623   :  { %4274 = vmatpush3.msra.mxu0 %v2870_v43  ;;  %4309 = vmatpush3.msra.mxu1 %v2853_v4 }
 0x624   :  { %4276 = vmatmul.mubr.f32.vlgmr.msra.gmra.mxu0 %v2869_v58  ;;  %4313 = vmatprep.subr.mxu0 %v7169_v27 }
 0x625   :  { %4314 = vmatpush3.msra.mxu0 %v3053_v7  ;;  %4345 = vmatprep.mubr.msk.f32.mxu0 %vm4435_vm0, %v7169_v27  ;;  %v3182_v7 = vld [vmem:[%s7024_s15] ss:$0 sm:$0xff] }
 0x626   :  { %4315 = vmatprep.subr.mxu0 %v7169_v27 }
 0x627   :  { %4316 = vmatpush3.msra.mxu0 %v3052_v12 }
 0x628   :  { %4317 = vmatprep.subr.mxu0 %v7169_v27 }
 0x629   :  { %4318 = vmatpush3.msra.mxu0 %v3051_v19 }
 0x62a   :  { %4319 = vmatprep.subr.mxu0 %v7169_v27 }
 0x62b   :  { %4320 = vmatpush3.msra.mxu0 %v3050_v25 }
 0x62c   :  { %4321 = vmatprep.subr.mxu0 %v7169_v27 }
 0x62d   :  { %4322 = vmatpush3.msra.mxu0 %v3049_v62 }
 0x62e   :  { %4323 = vmatprep.subr.mxu0 %v7169_v27 }
 0x62f   :  { %4324 = vmatpush3.msra.mxu0 %v3048_v31 }
 0x630   :  { %4325 = vmatprep.subr.mxu0 %v7169_v27 }
 0x631   :  { %4326 = vmatpush3.msra.mxu0 %v3047_v35 }
 0x632   :  { %4327 = vmatprep.subr.mxu0 %v7169_v27 }
 0x633   :  { %4328 = vmatpush3.msra.mxu0 %v3046_v44 }
 0x634   :  { %4329 = vmatprep.subr.mxu0 %v7169_v27 }
 0x635   :  { %4330 = vmatpush3.msra.mxu0 %v3045_v9 }
 0x636   :  { %4331 = vmatprep.subr.mxu0 %v7169_v27 }
 0x637   :  { %4332 = vmatpush3.msra.mxu0 %v3044_v29 }
 0x638   :  { %4333 = vmatprep.subr.mxu0 %v7169_v27 }
 0x639   :  { %4334 = vmatpush3.msra.mxu0 %v3043_v26 }
 0x63a   :  { %4335 = vmatprep.subr.mxu0 %v7169_v27 }
 0x63b   :  { %4336 = vmatpush3.msra.mxu0 %v3042_v17 }
 0x63c   :  { %4337 = vmatprep.subr.mxu0 %v7169_v27 }
 0x63d   :  { %4338 = vmatpush3.msra.mxu0 %v3041_v10 }
 0x63e   :  { %4339 = vmatprep.subr.mxu0 %v7169_v27 }
 0x63f   :  { %4340 = vmatpush3.msra.mxu0 %v3040_v50 }
 0x640   :  { %4341 = vmatprep.subr.mxu0 %v7169_v27 }
 0x641   :  { %4342 = vmatpush3.msra.mxu0 %v3039_v15 }
 0x642   :  { %4343 = vmatprep.subr.mxu0 %v7169_v27  ;;  %v3181_v27 = vld [vmem:[%s7023_s14] ss:$0 sm:$0xff] }
 0x643   :  { %4344 = vmatpush3.msra.mxu0 %v3038_v18 }
 0x6c3   :  { %v2734_v20 = vpop.f32.mrf.mxu0  ;;  %v2805_v48 = vpop.f32.mrf.mxu1 }
 0x6c4   :  { %v2814_v49 = vrot.slane %v2734_v20, 2  ;;  %v2816_v53 = vrot.slane %v2805_v48, 2 }
 0x6c5   :  { %v2736_v1 = vpop.f32.mrf.mxu0  ;;  %v2807_v23 = vpop.f32.mrf.mxu1 }
 0x6c6   :  { %v2822_v41 = vadd.f32 %v2814_v49, %v6610_v33  ;;  %v2815_v14 = vrot.slane %v2736_v1, 2  ;;  %v2824_v60 = vadd.f32 %v2816_v53, %v6614_v0  ;;  %v2817_v42 = vrot.slane %v2807_v23, 2 }
 0x6c8   :  { %v3176_v45 = vmul.f32 -1.442695, %v2822_v41  ;;  %v2823_v46 = vadd.f32 %v2815_v14, %v6616_v3  ;;  %v3178_v51 = vmul.f32 -1.442695, %v2824_v60  ;;  %v2825_v36 = vadd.f32 %v2817_v42, %v6620_v30 }
 0x6ca   :  { %4398 = vpow2.f32 %v3176_v45  ;;  %v3177_v47 = vmul.f32 -1.442695, %v2823_v46 }
 0x6cc   :  { %4400 = vpow2.f32 %v3177_v47 }
 0x6cd   :  { %4402 = vpow2.f32 %v3178_v51 }
 0x6d7   :  { %v4399_v38 = vpop.eup %4398 }
 0x6d8   :  { %v2835_v54 = vadd.f32 1.0, %v4399_v38 }
 0x6d9   :  { %v4401_v59 = vpop.eup %4400 }
 0x6da   :  { %4404 = vrcp.f32 %v2835_v54  ;;  %v2836_v33 = vadd.f32 1.0, %v4401_v59  ;;  %v4403_v3 = vpop.eup %4402 }
 0x6db   :  { %4406 = vtanh.f32 %v2825_v36  ;;  %v2837_v16 = vadd.f32 1.0, %v4403_v3 }
 0x6dc   :  { %4408 = vrcp.f32 %v2836_v33 }
 0x6dd   :  { %4410 = vrcp.f32 %v2837_v16 }
 0x6e4   :  { %v2952_v8 = vpop.f32.mrf.mxu0 }
 0x6e6   :  { %v4277_v13 = vpop.f32.mrf.mxu0 }
 0x6e7   :  { %v4405_v6 = vpop.eup %4404 }
 0x6e8   :  { %v4407_v11 = vpop.eup %4406 }
 0x6e9   :  { %v4409_v61 = vpop.eup %4408  ;;  %v2849_v22 = vmul.f32 %v4407_v11, %v4405_v6 }
 0x6ea   :  { %v2848_v0 = vmul.f32 %v4409_v61, %v2846_v56  ;;  %v4411_v30 = vpop.eup %4410 }
 0x6ec   :  { %v2850_v40 = vadd.f32 %v2849_v22, %v2848_v0 }
 0x6ee   :  { %4412 = vtanh.f32 %v2850_v40 }
 0x6fb   :  { %v4413_v63 = vpop.eup %4412 }
 0x6fc   :  { %v2852_v2 = vmul.f32 %v4413_v63, %v4411_v30 }
 0x6fe   :  { %v2957_v5 = vrot.slane %v2852_v2, 6 }
 0x700   :  { %4311 = vmatmul.mubr.f32.vlgmr.msra.gmra.mxu1 %v2957_v5 }
 0x7c0   :  { %v3025_v21 = vpop.f32.mrf.mxu1 }
 0x7c1   :  { %v3026_v28 = vadd.f32 %v3025_v21, %v2952_v8 }
 0x7c2   :  { %v4312_v32 = vpop.f32.mrf.mxu1 }
 0x7c3   :  { %v3036_v34 = vadd.f32 %v3179_v24, %v3026_v28 }
 0x7c5   :  { %v3037_v37 = vmax.f32 %v3036_v34, 0.0 }
 0x7c7   :  { %4346 = vmatmul.mubr.f32.vlgmr.msra.gmra.mxu0 %v3037_v37 }
 0x887   :  { %v3127_v52 = vpop.f32.mrf.mxu0 }
 0x888   :  { %v3128_v55 = vadd.f32 %v3180_v39, %v3127_v52 }
 0x889   :  { %v4347_v43 = vpop.f32.mrf.mxu0 }
 0x88a   :  { %v3131_v57 = vmax.f32 %v3128_v55, 0.0 }
 0x88c   :  { %v3139_v58 = vmul.f32 %v3181_v27, %v3131_v57 }
 0x88e   :  { %v3140_v4 = vsel %vm1308_vm2, %v3139_v58, 0.0 }
 0x88f   :  { %3141 = vadd.xlane.f32.xlu0 %v3140_v4 }
 0x918   :  { %v3142_v12 = vpop.xlane.xlu0 %3141 }
 0x919   :  { %v3150_v19 = vadd.f32 %v3182_v7, %v3142_v12 }
 0x91b   :  { %v3183_v25 = vmul.f32 -1.442695, %v3150_v19 }
 0x91d   :  { %4414 = vpow2.f32 %v3183_v25 }
 0x92a   :  { %v4415_v62 = vpop.eup %4414 }
 0x92b   :  { %v3154_v31 = vadd.f32 1.0, %v4415_v62 }
 0x92d   :  { %4416 = vrcp.f32 %v3154_v31 }
 0x93a   :  { %v4417_v35 = vpop.eup %4416 }
 0x93b   :  { %3158 = vst.msk [vmem:[%s7025_s16] sm:$0x3] %vm3157_vm8, %v4417_v35 }

</bundles_post_ra>
